<compile_context>
chip_gen: v7x
topology: tpu7x:2x2x1
jax: 0.10.0
libtpu: 0.0.40
codegen_flags: <defaults>
</compile_context>

<pallas_src>
import functools

import jax
import jax.numpy as jnp
from jax import lax
from jax.experimental import pallas as pl
from jax.experimental.pallas import tpu as pltpu

_K = 5                        # conv kernel size
_C1P = 32                     # conv1 out channels padded 20 -> 32 (VMEM only)
_C2P = 64                     # conv2 out channels padded 50 -> 64
_H1 = 12                      # pooled conv1 height
_V8 = 8                       # pooled conv1 half-width padded 6 -> 8
_ROWS1 = 2 * _H1 * _V8        # 192 pooled-conv1 rows per image: (w_parity, h, v8)
_FEAT = 4 * 4 * _C2P          # 1024 padded FC-input features


def _round_up(x, m):
    return ((x + m - 1) // m) * m


# ----------------------------------------------------------------------------
# Kernels
# ----------------------------------------------------------------------------
def _conv_block_kernel(taps_ref, w1_ref, b1_ref, w2_ref, b2_ref, o_ref, *, bt):
    """conv1 + bias + ReLU + 2x2 pool + conv2 + bias + ReLU + 2x2 pool.

    taps_ref : (bt, 4, 192, 25) bf16   conv1 im2col rows (one group per pool
               tap); rows within an image ordered (w_parity, h, v8), w = 2v+wp.
    w1_ref   : (25, 32) bf16      b1_ref : (1, 32) f32
    w2_ref   : (30, 32, 128) f32  conv2 weight, terms (kh, m); lanes = (dj, c)
    b2_ref   : (1, 64) f32
    o_ref    : (bt, 4, 4, 64) bf16  pooled conv2 output, features (i, j, c)
    """
    # ---- conv1: ONE merged matmul over all four pooling taps ----------------
    lhs1 = taps_ref[...].reshape(bt * 4 * _ROWS1, 25)           # aligned merge
    c1 = jnp.dot(lhs1, w1_ref[...], preferred_element_type=jnp.float32)
    c1 = c1.reshape(bt, 4, _ROWS1, _C1P)                        # aligned split
    pooled = jnp.maximum(jnp.maximum(c1[:, 0], c1[:, 1]),
                         jnp.maximum(c1[:, 2], c1[:, 3]))       # max over taps
    pooled = jnp.maximum(pooled + b1_ref[...], 0.0)             # (bt, 192, 32)

    # pooled conv1 activation, phase layout: (b, w_parity, h, v8, c)
    p1 = pooled.reshape(bt, 2, _H1, _V8, _C1P)                  # aligned split
    # v8-shifted copies (shift s: row v8 holds original v8+s); only rows
    # v8 <= 3 of the conv2 accumulator are read, so wrap-around is harmless.
    p1v = [p1]
    for s in (1, 2):
        p1v.append(jnp.concatenate(
            [p1[:, :, :, s:, :], p1[:, :, :, :s, :]], axis=3))

    # ---- conv2: 30 accumulating matmuls over (kh, m = dj + kw) --------------
    # output rows = (b, y, j') with y in 0..7, j' in 0..7 (j'=0..3 valid);
    # output lanes = dj*64 + c  (x = 2*j' + dj).
    acc = jnp.zeros((bt * 64, 2 * _C2P), jnp.float32)
    for kh in range(_K):
        for m in range(6):
            wp, sh = m % 2, m // 2
            slab = p1v[sh][:, wp, kh:kh + 8, :, :]              # (bt, 8, 8, 32)
            acc = acc + jnp.dot(slab.reshape(bt * 64, _C1P),
                                w2_ref[kh * 6 + m],
                                preferred_element_type=jnp.float32)

    # ---- 2x2 max-pool + bias + ReLU -----------------------------------------
    mx = jnp.maximum(acc[:, :_C2P], acc[:, _C2P:])              # pool over x
    mx = mx.reshape(bt, 4, 2, 8, _C2P)                          # (b, i, dy, j', c)
    mx = jnp.maximum(mx[:, :, 0], mx[:, :, 1])                  # pool over y
    mx = mx[:, :, :4, :]                                        # valid j only
    o_ref[...] = jnp.maximum(mx + b2_ref[...], 0.0).astype(o_ref.dtype)


def _fc_head_kernel(x_ref, w1_ref, b1_ref, w2_ref, b2_ref, o_ref, *, n_valid):
    """fc1 + ReLU + fc2 + log_softmax; the hidden activation never leaves VMEM."""
    h = jnp.dot(x_ref[...], w1_ref[...], preferred_element_type=jnp.float32)
    h = jnp.maximum(h + b1_ref[...], 0.0)
    logits = jnp.dot(h.astype(w2_ref.dtype), w2_ref[...],
                     preferred_element_type=jnp.float32) + b2_ref[...]
    lane = lax.broadcasted_iota(jnp.int32, logits.shape, 1)
    logits = jnp.where(lane < n_valid, logits, -1e30)           # mask padded lanes
    m = jnp.max(logits, axis=-1, keepdims=True)
    y = logits - m
    lse = jnp.log(jnp.sum(jnp.exp(y), axis=-1, keepdims=True))
    o_ref[...] = (y - lse).astype(o_ref.dtype)


# ----------------------------------------------------------------------------
# Wrappers (pallas_call + minimal XLA glue)
# ----------------------------------------------------------------------------
def _conv1_tap_rows(x_nhwc):
    """Stride-2 5x5 im2col rows of the input for each 2x2-pool tap.

    Rows per image are reordered from (h, w) to (w_parity, h, v8) (w = 2v + wp,
    v padded 6->8) so that the fused kernel can build all conv2 patches from
    the pooled activation with only aligned, contiguous slices.
    Returns (N, 4, 192, 25) bf16.
    """
    n = x_nhwc.shape[0]
    dn = ("NHWC", "HWIO", "NHWC")
    taps = []
    for t1 in (0, 1):
        for t2 in (0, 1):
            p = lax.conv_general_dilated_patches(
                x_nhwc[:, t1:, t2:, :], (_K, _K), (2, 2), "VALID",
                dimension_numbers=dn)                       # (n, 12, 12, 25)
            p = p.reshape(n, _H1, 6, 2, 25)                 # w = 2v + wp
            p = p.transpose(0, 3, 1, 2, 4)                  # (n, wp, h, v, 25)
            p = jnp.pad(p, ((0, 0), (0, 0), (0, 0), (0, _V8 - 6), (0, 0)))
            taps.append(p.reshape(n, _ROWS1, 25))
    return jnp.stack(taps, axis=1)                          # (n, 4, 192, 25)


def _conv_block(taps, w1, b1, w2hat, b2, bt):
    npad = taps.shape[0]
    flops = 2 * npad * (4 * _ROWS1 * 25 * _C1P + 30 * 64 * _C1P * 2 * _C2P)
    cost = pl.CostEstimate(
        flops=flops, transcendentals=0,
        bytes_accessed=(taps.size * 2 + w1.size * 2 + b1.size * 4
                        + w2hat.size * 4 + b2.size * 4 + npad * 16 * _C2P * 2))
    return pl.pallas_call(
        functools.partial(_conv_block_kernel, bt=bt),
        out_shape=jax.ShapeDtypeStruct((npad, 4, 4, _C2P), jnp.bfloat16),
        grid=(npad // bt,),
        in_specs=[
            pl.BlockSpec((bt, 4, _ROWS1, 25), lambda i: (i, 0, 0, 0)),
            pl.BlockSpec((25, _C1P), lambda i: (0, 0)),
            pl.BlockSpec((1, _C1P), lambda i: (0, 0)),
            pl.BlockSpec((30, _C1P, 2 * _C2P), lambda i: (0, 0, 0)),
            pl.BlockSpec((1, _C2P), lambda i: (0, 0)),
        ],
        out_specs=pl.BlockSpec((bt, 4, 4, _C2P), lambda i: (i, 0, 0, 0)),
        compiler_params=pltpu.CompilerParams(dimension_semantics=("parallel",)),
        cost_estimate=cost,
    )(taps, w1, b1, w2hat, b2)


def _fc_head(x, w1, b1, w2, b2, *, n_valid):
    m, k = x.shape
    n1, n2 = w1.shape[1], w2.shape[1]
    tile = min(1024, _round_up(m, 8))
    mp = _round_up(m, tile)
    if mp != m:
        x = jnp.pad(x, ((0, mp - m), (0, 0)))
    cost = pl.CostEstimate(
        flops=2 * mp * (k * n1 + n1 * n2),
        transcendentals=mp * n2,
        bytes_accessed=mp * k * 2 + (k * n1 + n1 * n2) * 2 + mp * n2 * 4
        + (n1 + n2) * 4)
    out = pl.pallas_call(
        functools.partial(_fc_head_kernel, n_valid=n_valid),
        out_shape=jax.ShapeDtypeStruct((mp, n2), jnp.float32),
        grid=(mp // tile,),
        in_specs=[
            pl.BlockSpec((tile, k), lambda i: (i, 0)),
            pl.BlockSpec((k, n1), lambda i: (0, 0)),
            pl.BlockSpec((1, n1), lambda i: (0, 0)),
            pl.BlockSpec((n1, n2), lambda i: (0, 0)),
            pl.BlockSpec((1, n2), lambda i: (0, 0)),
        ],
        out_specs=pl.BlockSpec((tile, n2), lambda i: (i, 0)),
        compiler_params=pltpu.CompilerParams(dimension_semantics=("parallel",)),
        cost_estimate=cost,
    )(x, w1, b1, w2, b2)
    return out[:m, :n_valid]


# ----------------------------------------------------------------------------
# Parameters (PyTorch layout) + one-time prep
# ----------------------------------------------------------------------------
def init_params(key):
    """PyTorch-layout parameters (same init scheme as nn.Conv2d / nn.Linear)."""
    ks = jax.random.split(key, 8)

    def u(k, shape, fan_in):
        bound = 1.0 / jnp.sqrt(fan_in)
        return jax.random.uniform(k, shape, jnp.float32, -bound, bound)

    return {
        "conv1_w": u(ks[0], (20, 1, 5, 5), 25),
        "conv1_b": u(ks[1], (20,), 25),
        "conv2_w": u(ks[2], (50, 20, 5, 5), 500),
        "conv2_b": u(ks[3], (50,), 500),
        "fc1_w":   u(ks[4], (500, 800), 800),
        "fc1_b":   u(ks[5], (500,), 800),
        "fc2_w":   u(ks[6], (10, 500), 500),
        "fc2_b":   u(ks[7], (10,), 500),
    }


def prepare_params(params):
    """One-time weight prep (runs once, outside the hot path)."""
    f32, bf = jnp.float32, jnp.bfloat16

    def pad_to(a, shape):
        return jnp.pad(a, [(0, s - d) for d, s in zip(a.shape, shape)])

    # conv1: (cout, cin*kh*kw) -> (25, 20) -> pad channels to 32, bf16.
    c1 = params["conv1_w"].astype(f32).reshape(20, 25).T
    c1w = pad_to(c1, (25, _C1P)).astype(bf)
    c1b = pad_to(params["conv1_b"].astype(f32).reshape(1, 20), (1, _C1P))

    # conv2 "lane-packed" weight for the (kh, m = dj + kw) decomposition:
    #   w2hat[kh, m, cin, dj*64 + cout] = W2[kh, m - dj, cin, cout], 0<=m-dj<=4
    w2 = params["conv2_w"].astype(f32).transpose(2, 3, 1, 0)    # (kh, kw, cin, cout)
    w2hat = jnp.zeros((_K, 6, _C1P, 2 * _C2P), f32)
    for m in range(6):
        for dj in range(2):
            kw = m - dj
            if 0 <= kw < _K:
                w2hat = w2hat.at[:, m, :20, dj * _C2P:dj * _C2P + 50].set(w2[:, kw])
    w2hat = w2hat.reshape(_K * 6, _C1P, 2 * _C2P)               # keep f32
    c2b = pad_to(params["conv2_b"].astype(f32).reshape(1, 50), (1, _C2P))

    # fc1: PyTorch columns are NCHW-flatten (c, i, j); kernel features are
    # (i, j, c_pad64) -> permute + pad once.
    n1 = _round_up(500, 128)                                    # 512
    f1 = params["fc1_w"].astype(f32).reshape(500, 50, 4, 4)
    f1 = f1.transpose(0, 2, 3, 1)                               # (500, 4, 4, 50)
    f1 = jnp.pad(f1, ((0, 0), (0, 0), (0, 0), (0, _C2P - 50)))
    f1 = f1.reshape(500, _FEAT).T                               # (1024, 500)
    f1w = pad_to(f1, (_FEAT, n1)).astype(bf)
    f1b = pad_to(params["fc1_b"].astype(f32).reshape(1, 500), (1, n1))

    f2w = pad_to(params["fc2_w"].astype(f32).T, (n1, 128)).astype(bf)
    f2b = pad_to(params["fc2_b"].astype(f32).reshape(1, 10), (1, 128))

    return {"c1w": c1w, "c1b": c1b, "w2hat": w2hat, "c2b": c2b,
            "f1w": f1w, "f1b": f1b, "f2w": f2w, "f2b": f2b}


# ----------------------------------------------------------------------------
# Full forward (public interface: NCHW f32 in, (N, 10) log-probs out)
# ----------------------------------------------------------------------------
def net_forward(x, prep, *, batch_tile=8):
    n = x.shape[0]
    x = jnp.transpose(x, (0, 2, 3, 1)).astype(jnp.bfloat16)     # NHWC once
    taps = _conv1_tap_rows(x)                                   # (n, 4, 192, 25)

    bt = min(batch_tile, n)
    npad = _round_up(n, bt)
    if npad != n:
        taps = jnp.pad(taps, ((0, npad - n), (0, 0), (0, 0), (0, 0)))

    feat = _conv_block(taps, prep["c1w"], prep["c1b"],
                       prep["w2hat"], prep["c2b"], bt)          # (npad, 4, 4, 64)
    feat = feat[:n].reshape(n, _FEAT)                           # (n, 1024)
    return _fc_head(feat, prep["f1w"], prep["f1b"],
                    prep["f2w"], prep["f2b"], n_valid=10)


def _reference_forward(x, params):
    """Pure-JAX f32 reference with exact PyTorch semantics (self-check only)."""
    dn = ("NCHW", "OIHW", "NCHW")
    y = lax.conv_general_dilated(x, params["conv1_w"], (1, 1), "VALID",
                                 dimension_numbers=dn)
    y = jax.nn.relu(y + params["conv1_b"].reshape(1, -1, 1, 1))
    y = lax.reduce_window(y, -jnp.inf, lax.max, (1, 1, 2, 2), (1, 1, 2, 2), "VALID")
    y = lax.conv_general_dilated(y, params["conv2_w"], (1, 1), "VALID",
                                 dimension_numbers=dn)
    y = jax.nn.relu(y + params["conv2_b"].reshape(1, -1, 1, 1))
    y = lax.reduce_window(y, -jnp.inf, lax.max, (1, 1, 2, 2), (1, 1, 2, 2), "VALID")
    y = y.reshape(y.shape[0], -1)                               # == .view(-1, 800)
    y = jax.nn.relu(y @ params["fc1_w"].T + params["fc1_b"])
    y = y @ params["fc2_w"].T + params["fc2_b"]
    return jax.nn.log_softmax(y, axis=-1)


if __name__ == "__main__":
    key = jax.random.PRNGKey(0)
    pkey, xkey = jax.random.split(key)
    params = init_params(pkey)
    prep = prepare_params(params)          # hoisted weight prep (runs once)
    # The architecture fixes the input to MNIST shape: (batch, 1, 28, 28).
    x = jax.random.normal(xkey, (2, 1, 28, 28), jnp.float32)

    fwd = jax.jit(functools.partial(net_forward, batch_tile=8))
    out = jax.block_until_ready(fwd(x, prep))

    assert out.shape == (2, 10)
    # rows must be valid log-probabilities
    assert bool(jnp.allclose(jnp.sum(jnp.exp(out), axis=1), 1.0, atol=1e-3))
    # match the pure-JAX f32 reference (bf16 matmul inputs -> loose tolerance)
    ref = _reference_forward(x, params)
    assert float(jnp.max(jnp.abs(out - ref))) < 0.1
    print("KERNEL_OK")
</pallas_src>

<mosaic_0001>
module attributes {stable_mosaic.version = 11 : i64} {
  func.func @_conv_block_kernel(%arg0: i32, %arg1: memref<2x4x192x25xbf16, #tpu.memory_space<vmem>>, %arg2: memref<25x32xbf16, #tpu.memory_space<vmem>>, %arg3: memref<1x32xf32, #tpu.memory_space<vmem>>, %arg4: memref<30x32x128xf32, #tpu.memory_space<vmem>>, %arg5: memref<1x64xf32, #tpu.memory_space<vmem>>, %arg6: memref<2x4x4x64xbf16, #tpu.memory_space<vmem>>) attributes {dimension_semantics = [#tpu.dimension_semantics<parallel>], iteration_bounds = array<i64: 1>, scalar_prefetch = 0 : i64, scratch_operands = 0 : i64, tpu.core_type = #tpu.core_type<tc>, window_params = [{transform_indices = @transform_0, window_bounds = array<i64: 2, 4, 192, 25>}, {pipeline_mode = #tpu.pipeline_mode<synchronous>, transform_indices = @transform_1, window_bounds = array<i64: 25, 32>}, {pipeline_mode = #tpu.pipeline_mode<synchronous>, transform_indices = @transform_2, window_bounds = array<i64: 1, 32>}, {pipeline_mode = #tpu.pipeline_mode<synchronous>, transform_indices = @transform_3, window_bounds = array<i64: 30, 32, 128>}, {pipeline_mode = #tpu.pipeline_mode<synchronous>, transform_indices = @transform_4, window_bounds = array<i64: 1, 64>}, {transform_indices = @transform_5, window_bounds = array<i64: 2, 4, 4, 64>}]} {
    %c0 = arith.constant 0 : index
    %c0_0 = arith.constant 0 : index
    %c0_1 = arith.constant 0 : index
    %c0_2 = arith.constant 0 : index
    %0 = vector.load %arg1[%c0, %c0_0, %c0_1, %c0_2] : memref<2x4x192x25xbf16, #tpu.memory_space<vmem>>, vector<2x4x192x25xbf16>
    %1 = vector.shape_cast %0 : vector<2x4x192x25xbf16> to vector<1536x25xbf16>
    %c0_3 = arith.constant 0 : index
    %c0_4 = arith.constant 0 : index
    %2 = vector.load %arg2[%c0_3, %c0_4] : memref<25x32xbf16, #tpu.memory_space<vmem>>, vector<25x32xbf16>
    %cst = arith.constant dense<0.000000e+00> : vector<1536x32xf32>
    %3 = tpu.matmul %1, %2, %cst {dimension_numbers = #tpu.dot_dimension_numbers<[1], [0], [0], [1], [0, 0, 1, 1], [], []>} : vector<1536x25xbf16>, vector<25x32xbf16>, vector<1536x32xf32> -> vector<1536x32xf32>
    %4 = vector.shape_cast %3 : vector<1536x32xf32> to vector<2x4x192x32xf32>
    %5 = vector.extract_strided_slice %4 {offsets = [0, 0, 0, 0], sizes = [2, 1, 192, 32], strides = [1, 1, 1, 1]} : vector<2x4x192x32xf32> to vector<2x1x192x32xf32>
    %6 = vector.shape_cast %5 : vector<2x1x192x32xf32> to vector<2x192x32xf32>
    %7 = vector.extract_strided_slice %4 {offsets = [0, 1, 0, 0], sizes = [2, 1, 192, 32], strides = [1, 1, 1, 1]} : vector<2x4x192x32xf32> to vector<2x1x192x32xf32>
    %8 = vector.shape_cast %7 : vector<2x1x192x32xf32> to vector<2x192x32xf32>
    %9 = arith.maximumf %6, %8 : vector<2x192x32xf32>
    %10 = vector.extract_strided_slice %4 {offsets = [0, 2, 0, 0], sizes = [2, 1, 192, 32], strides = [1, 1, 1, 1]} : vector<2x4x192x32xf32> to vector<2x1x192x32xf32>
    %11 = vector.shape_cast %10 : vector<2x1x192x32xf32> to vector<2x192x32xf32>
    %12 = vector.extract_strided_slice %4 {offsets = [0, 3, 0, 0], sizes = [2, 1, 192, 32], strides = [1, 1, 1, 1]} : vector<2x4x192x32xf32> to vector<2x1x192x32xf32>
    %13 = vector.shape_cast %12 : vector<2x1x192x32xf32> to vector<2x192x32xf32>
    %14 = arith.maximumf %11, %13 : vector<2x192x32xf32>
    %15 = arith.maximumf %9, %14 : vector<2x192x32xf32>
    %c0_5 = arith.constant 0 : index
    %c0_6 = arith.constant 0 : index
    %16 = vector.load %arg3[%c0_5, %c0_6] : memref<1x32xf32, #tpu.memory_space<vmem>>, vector<1x32xf32>
    %17 = vector.shape_cast %16 : vector<1x32xf32> to vector<1x1x32xf32>
    %18 = vector.broadcast %17 : vector<1x1x32xf32> to vector<2x192x32xf32>
    %19 = arith.addf %15, %18 : vector<2x192x32xf32>
    %cst_7 = arith.constant 0.000000e+00 : f32
    %20 = vector.broadcast %cst_7 : f32 to vector<2x192x32xf32>
    %21 = arith.maximumf %19, %20 : vector<2x192x32xf32>
    %22 = vector.shape_cast %21 : vector<2x192x32xf32> to vector<2x2x12x8x32xf32>
    %23 = vector.extract_strided_slice %22 {offsets = [0, 0, 0, 1, 0], sizes = [2, 2, 12, 7, 32], strides = [1, 1, 1, 1, 1]} : vector<2x2x12x8x32xf32> to vector<2x2x12x7x32xf32>
    %24 = vector.extract_strided_slice %22 {offsets = [0, 0, 0, 0, 0], sizes = [2, 2, 12, 1, 32], strides = [1, 1, 1, 1, 1]} : vector<2x2x12x8x32xf32> to vector<2x2x12x1x32xf32>
    %25 = tpu.concatenate %23, %24 in 3 : vector<2x2x12x7x32xf32>, vector<2x2x12x1x32xf32> -> vector<2x2x12x8x32xf32>
    %26 = vector.extract_strided_slice %22 {offsets = [0, 0, 0, 2, 0], sizes = [2, 2, 12, 6, 32], strides = [1, 1, 1, 1, 1]} : vector<2x2x12x8x32xf32> to vector<2x2x12x6x32xf32>
    %27 = vector.extract_strided_slice %22 {offsets = [0, 0, 0, 0, 0], sizes = [2, 2, 12, 2, 32], strides = [1, 1, 1, 1, 1]} : vector<2x2x12x8x32xf32> to vector<2x2x12x2x32xf32>
    %28 = tpu.concatenate %26, %27 in 3 : vector<2x2x12x6x32xf32>, vector<2x2x12x2x32xf32> -> vector<2x2x12x8x32xf32>
    %cst_8 = arith.constant 0.000000e+00 : f32
    %29 = vector.broadcast %cst_8 : f32 to vector<128x128xf32>
    %30 = vector.extract_strided_slice %22 {offsets = [0, 0, 0, 0, 0], sizes = [2, 1, 8, 8, 32], strides = [1, 1, 1, 1, 1]} : vector<2x2x12x8x32xf32> to vector<2x1x8x8x32xf32>
    %31 = vector.shape_cast %30 : vector<2x1x8x8x32xf32> to vector<2x8x8x32xf32>
    %32 = vector.shape_cast %31 : vector<2x8x8x32xf32> to vector<128x32xf32>
    %c0_9 = arith.constant 0 : index
    %c0_10 = arith.constant 0 : index
    %c0_11 = arith.constant 0 : index
    %33 = vector.load %arg4[%c0_9, %c0_10, %c0_11] : memref<30x32x128xf32, #tpu.memory_space<vmem>>, vector<1x32x128xf32>
    %34 = vector.shape_cast %33 : vector<1x32x128xf32> to vector<32x128xf32>
    %cst_12 = arith.constant dense<0.000000e+00> : vector<128x128xf32>
    %35 = tpu.matmul %32, %34, %cst_12 {dimension_numbers = #tpu.dot_dimension_numbers<[1], [0], [0], [1], [0, 0, 1, 1], [], []>} : vector<128x32xf32>, vector<32x128xf32>, vector<128x128xf32> -> vector<128x128xf32>
    %36 = arith.addf %29, %35 : vector<128x128xf32>
    %37 = vector.extract_strided_slice %22 {offsets = [0, 1, 0, 0, 0], sizes = [2, 1, 8, 8, 32], strides = [1, 1, 1, 1, 1]} : vector<2x2x12x8x32xf32> to vector<2x1x8x8x32xf32>
    %38 = vector.shape_cast %37 : vector<2x1x8x8x32xf32> to vector<2x8x8x32xf32>
    %39 = vector.shape_cast %38 : vector<2x8x8x32xf32> to vector<128x32xf32>
    %c1 = arith.constant 1 : index
    %c0_13 = arith.constant 0 : index
    %c0_14 = arith.constant 0 : index
    %40 = vector.load %arg4[%c1, %c0_13, %c0_14] : memref<30x32x128xf32, #tpu.memory_space<vmem>>, vector<1x32x128xf32>
    %41 = vector.shape_cast %40 : vector<1x32x128xf32> to vector<32x128xf32>
    %cst_15 = arith.constant dense<0.000000e+00> : vector<128x128xf32>
    %42 = tpu.matmul %39, %41, %cst_15 {dimension_numbers = #tpu.dot_dimension_numbers<[1], [0], [0], [1], [0, 0, 1, 1], [], []>} : vector<128x32xf32>, vector<32x128xf32>, vector<128x128xf32> -> vector<128x128xf32>
    %43 = arith.addf %36, %42 : vector<128x128xf32>
    %44 = vector.extract_strided_slice %25 {offsets = [0, 0, 0, 0, 0], sizes = [2, 1, 8, 8, 32], strides = [1, 1, 1, 1, 1]} : vector<2x2x12x8x32xf32> to vector<2x1x8x8x32xf32>
    %45 = vector.shape_cast %44 : vector<2x1x8x8x32xf32> to vector<2x8x8x32xf32>
    %46 = vector.shape_cast %45 : vector<2x8x8x32xf32> to vector<128x32xf32>
    %c2 = arith.constant 2 : index
    %c0_16 = arith.constant 0 : index
    %c0_17 = arith.constant 0 : index
    %47 = vector.load %arg4[%c2, %c0_16, %c0_17] : memref<30x32x128xf32, #tpu.memory_space<vmem>>, vector<1x32x128xf32>
    %48 = vector.shape_cast %47 : vector<1x32x128xf32> to vector<32x128xf32>
    %cst_18 = arith.constant dense<0.000000e+00> : vector<128x128xf32>
    %49 = tpu.matmul %46, %48, %cst_18 {dimension_numbers = #tpu.dot_dimension_numbers<[1], [0], [0], [1], [0, 0, 1, 1], [], []>} : vector<128x32xf32>, vector<32x128xf32>, vector<128x128xf32> -> vector<128x128xf32>
    %50 = arith.addf %43, %49 : vector<128x128xf32>
    %51 = vector.extract_strided_slice %25 {offsets = [0, 1, 0, 0, 0], sizes = [2, 1, 8, 8, 32], strides = [1, 1, 1, 1, 1]} : vector<2x2x12x8x32xf32> to vector<2x1x8x8x32xf32>
    %52 = vector.shape_cast %51 : vector<2x1x8x8x32xf32> to vector<2x8x8x32xf32>
    %53 = vector.shape_cast %52 : vector<2x8x8x32xf32> to vector<128x32xf32>
    %c3 = arith.constant 3 : index
    %c0_19 = arith.constant 0 : index
    %c0_20 = arith.constant 0 : index
    %54 = vector.load %arg4[%c3, %c0_19, %c0_20] : memref<30x32x128xf32, #tpu.memory_space<vmem>>, vector<1x32x128xf32>
    %55 = vector.shape_cast %54 : vector<1x32x128xf32> to vector<32x128xf32>
    %cst_21 = arith.constant dense<0.000000e+00> : vector<128x128xf32>
    %56 = tpu.matmul %53, %55, %cst_21 {dimension_numbers = #tpu.dot_dimension_numbers<[1], [0], [0], [1], [0, 0, 1, 1], [], []>} : vector<128x32xf32>, vector<32x128xf32>, vector<128x128xf32> -> vector<128x128xf32>
    %57 = arith.addf %50, %56 : vector<128x128xf32>
    %58 = vector.extract_strided_slice %28 {offsets = [0, 0, 0, 0, 0], sizes = [2, 1, 8, 8, 32], strides = [1, 1, 1, 1, 1]} : vector<2x2x12x8x32xf32> to vector<2x1x8x8x32xf32>
    %59 = vector.shape_cast %58 : vector<2x1x8x8x32xf32> to vector<2x8x8x32xf32>
    %60 = vector.shape_cast %59 : vector<2x8x8x32xf32> to vector<128x32xf32>
    %c4 = arith.constant 4 : index
    %c0_22 = arith.constant 0 : index
    %c0_23 = arith.constant 0 : index
    %61 = vector.load %arg4[%c4, %c0_22, %c0_23] : memref<30x32x128xf32, #tpu.memory_space<vmem>>, vector<1x32x128xf32>
    %62 = vector.shape_cast %61 : vector<1x32x128xf32> to vector<32x128xf32>
    %cst_24 = arith.constant dense<0.000000e+00> : vector<128x128xf32>
    %63 = tpu.matmul %60, %62, %cst_24 {dimension_numbers = #tpu.dot_dimension_numbers<[1], [0], [0], [1], [0, 0, 1, 1], [], []>} : vector<128x32xf32>, vector<32x128xf32>, vector<128x128xf32> -> vector<128x128xf32>
    %64 = arith.addf %57, %63 : vector<128x128xf32>
    %65 = vector.extract_strided_slice %28 {offsets = [0, 1, 0, 0, 0], sizes = [2, 1, 8, 8, 32], strides = [1, 1, 1, 1, 1]} : vector<2x2x12x8x32xf32> to vector<2x1x8x8x32xf32>
    %66 = vector.shape_cast %65 : vector<2x1x8x8x32xf32> to vector<2x8x8x32xf32>
    %67 = vector.shape_cast %66 : vector<2x8x8x32xf32> to vector<128x32xf32>
    %c5 = arith.constant 5 : index
    %c0_25 = arith.constant 0 : index
    %c0_26 = arith.constant 0 : index
    %68 = vector.load %arg4[%c5, %c0_25, %c0_26] : memref<30x32x128xf32, #tpu.memory_space<vmem>>, vector<1x32x128xf32>
    %69 = vector.shape_cast %68 : vector<1x32x128xf32> to vector<32x128xf32>
    %cst_27 = arith.constant dense<0.000000e+00> : vector<128x128xf32>
    %70 = tpu.matmul %67, %69, %cst_27 {dimension_numbers = #tpu.dot_dimension_numbers<[1], [0], [0], [1], [0, 0, 1, 1], [], []>} : vector<128x32xf32>, vector<32x128xf32>, vector<128x128xf32> -> vector<128x128xf32>
    %71 = arith.addf %64, %70 : vector<128x128xf32>
    %72 = vector.extract_strided_slice %22 {offsets = [0, 0, 1, 0, 0], sizes = [2, 1, 8, 8, 32], strides = [1, 1, 1, 1, 1]} : vector<2x2x12x8x32xf32> to vector<2x1x8x8x32xf32>
    %73 = vector.shape_cast %72 : vector<2x1x8x8x32xf32> to vector<2x8x8x32xf32>
    %74 = vector.shape_cast %73 : vector<2x8x8x32xf32> to vector<128x32xf32>
    %c6 = arith.constant 6 : index
    %c0_28 = arith.constant 0 : index
    %c0_29 = arith.constant 0 : index
    %75 = vector.load %arg4[%c6, %c0_28, %c0_29] : memref<30x32x128xf32, #tpu.memory_space<vmem>>, vector<1x32x128xf32>
    %76 = vector.shape_cast %75 : vector<1x32x128xf32> to vector<32x128xf32>
    %cst_30 = arith.constant dense<0.000000e+00> : vector<128x128xf32>
    %77 = tpu.matmul %74, %76, %cst_30 {dimension_numbers = #tpu.dot_dimension_numbers<[1], [0], [0], [1], [0, 0, 1, 1], [], []>} : vector<128x32xf32>, vector<32x128xf32>, vector<128x128xf32> -> vector<128x128xf32>
    %78 = arith.addf %71, %77 : vector<128x128xf32>
    %79 = vector.extract_strided_slice %22 {offsets = [0, 1, 1, 0, 0], sizes = [2, 1, 8, 8, 32], strides = [1, 1, 1, 1, 1]} : vector<2x2x12x8x32xf32> to vector<2x1x8x8x32xf32>
    %80 = vector.shape_cast %79 : vector<2x1x8x8x32xf32> to vector<2x8x8x32xf32>
    %81 = vector.shape_cast %80 : vector<2x8x8x32xf32> to vector<128x32xf32>
    %c7 = arith.constant 7 : index
    %c0_31 = arith.constant 0 : index
    %c0_32 = arith.constant 0 : index
    %82 = vector.load %arg4[%c7, %c0_31, %c0_32] : memref<30x32x128xf32, #tpu.memory_space<vmem>>, vector<1x32x128xf32>
    %83 = vector.shape_cast %82 : vector<1x32x128xf32> to vector<32x128xf32>
    %cst_33 = arith.constant dense<0.000000e+00> : vector<128x128xf32>
    %84 = tpu.matmul %81, %83, %cst_33 {dimension_numbers = #tpu.dot_dimension_numbers<[1], [0], [0], [1], [0, 0, 1, 1], [], []>} : vector<128x32xf32>, vector<32x128xf32>, vector<128x128xf32> -> vector<128x128xf32>
    %85 = arith.addf %78, %84 : vector<128x128xf32>
    %86 = vector.extract_strided_slice %25 {offsets = [0, 0, 1, 0, 0], sizes = [2, 1, 8, 8, 32], strides = [1, 1, 1, 1, 1]} : vector<2x2x12x8x32xf32> to vector<2x1x8x8x32xf32>
    %87 = vector.shape_cast %86 : vector<2x1x8x8x32xf32> to vector<2x8x8x32xf32>
    %88 = vector.shape_cast %87 : vector<2x8x8x32xf32> to vector<128x32xf32>
    %c8 = arith.constant 8 : index
    %c0_34 = arith.constant 0 : index
    %c0_35 = arith.constant 0 : index
    %89 = vector.load %arg4[%c8, %c0_34, %c0_35] : memref<30x32x128xf32, #tpu.memory_space<vmem>>, vector<1x32x128xf32>
    %90 = vector.shape_cast %89 : vector<1x32x128xf32> to vector<32x128xf32>
    %cst_36 = arith.constant dense<0.000000e+00> : vector<128x128xf32>
    %91 = tpu.matmul %88, %90, %cst_36 {dimension_numbers = #tpu.dot_dimension_numbers<[1], [0], [0], [1], [0, 0, 1, 1], [], []>} : vector<128x32xf32>, vector<32x128xf32>, vector<128x128xf32> -> vector<128x128xf32>
    %92 = arith.addf %85, %91 : vector<128x128xf32>
    %93 = vector.extract_strided_slice %25 {offsets = [0, 1, 1, 0, 0], sizes = [2, 1, 8, 8, 32], strides = [1, 1, 1, 1, 1]} : vector<2x2x12x8x32xf32> to vector<2x1x8x8x32xf32>
    %94 = vector.shape_cast %93 : vector<2x1x8x8x32xf32> to vector<2x8x8x32xf32>
    %95 = vector.shape_cast %94 : vector<2x8x8x32xf32> to vector<128x32xf32>
    %c9 = arith.constant 9 : index
    %c0_37 = arith.constant 0 : index
    %c0_38 = arith.constant 0 : index
    %96 = vector.load %arg4[%c9, %c0_37, %c0_38] : memref<30x32x128xf32, #tpu.memory_space<vmem>>, vector<1x32x128xf32>
    %97 = vector.shape_cast %96 : vector<1x32x128xf32> to vector<32x128xf32>
    %cst_39 = arith.constant dense<0.000000e+00> : vector<128x128xf32>
    %98 = tpu.matmul %95, %97, %cst_39 {dimension_numbers = #tpu.dot_dimension_numbers<[1], [0], [0], [1], [0, 0, 1, 1], [], []>} : vector<128x32xf32>, vector<32x128xf32>, vector<128x128xf32> -> vector<128x128xf32>
    %99 = arith.addf %92, %98 : vector<128x128xf32>
    %100 = vector.extract_strided_slice %28 {offsets = [0, 0, 1, 0, 0], sizes = [2, 1, 8, 8, 32], strides = [1, 1, 1, 1, 1]} : vector<2x2x12x8x32xf32> to vector<2x1x8x8x32xf32>
    %101 = vector.shape_cast %100 : vector<2x1x8x8x32xf32> to vector<2x8x8x32xf32>
    %102 = vector.shape_cast %101 : vector<2x8x8x32xf32> to vector<128x32xf32>
    %c10 = arith.constant 10 : index
    %c0_40 = arith.constant 0 : index
    %c0_41 = arith.constant 0 : index
    %103 = vector.load %arg4[%c10, %c0_40, %c0_41] : memref<30x32x128xf32, #tpu.memory_space<vmem>>, vector<1x32x128xf32>
    %104 = vector.shape_cast %103 : vector<1x32x128xf32> to vector<32x128xf32>
    %cst_42 = arith.constant dense<0.000000e+00> : vector<128x128xf32>
    %105 = tpu.matmul %102, %104, %cst_42 {dimension_numbers = #tpu.dot_dimension_numbers<[1], [0], [0], [1], [0, 0, 1, 1], [], []>} : vector<128x32xf32>, vector<32x128xf32>, vector<128x128xf32> -> vector<128x128xf32>
    %106 = arith.addf %99, %105 : vector<128x128xf32>
    %107 = vector.extract_strided_slice %28 {offsets = [0, 1, 1, 0, 0], sizes = [2, 1, 8, 8, 32], strides = [1, 1, 1, 1, 1]} : vector<2x2x12x8x32xf32> to vector<2x1x8x8x32xf32>
    %108 = vector.shape_cast %107 : vector<2x1x8x8x32xf32> to vector<2x8x8x32xf32>
    %109 = vector.shape_cast %108 : vector<2x8x8x32xf32> to vector<128x32xf32>
    %c11 = arith.constant 11 : index
    %c0_43 = arith.constant 0 : index
    %c0_44 = arith.constant 0 : index
    %110 = vector.load %arg4[%c11, %c0_43, %c0_44] : memref<30x32x128xf32, #tpu.memory_space<vmem>>, vector<1x32x128xf32>
    %111 = vector.shape_cast %110 : vector<1x32x128xf32> to vector<32x128xf32>
    %cst_45 = arith.constant dense<0.000000e+00> : vector<128x128xf32>
    %112 = tpu.matmul %109, %111, %cst_45 {dimension_numbers = #tpu.dot_dimension_numbers<[1], [0], [0], [1], [0, 0, 1, 1], [], []>} : vector<128x32xf32>, vector<32x128xf32>, vector<128x128xf32> -> vector<128x128xf32>
    %113 = arith.addf %106, %112 : vector<128x128xf32>
    %114 = vector.extract_strided_slice %22 {offsets = [0, 0, 2, 0, 0], sizes = [2, 1, 8, 8, 32], strides = [1, 1, 1, 1, 1]} : vector<2x2x12x8x32xf32> to vector<2x1x8x8x32xf32>
    %115 = vector.shape_cast %114 : vector<2x1x8x8x32xf32> to vector<2x8x8x32xf32>
    %116 = vector.shape_cast %115 : vector<2x8x8x32xf32> to vector<128x32xf32>
    %c12 = arith.constant 12 : index
    %c0_46 = arith.constant 0 : index
    %c0_47 = arith.constant 0 : index
    %117 = vector.load %arg4[%c12, %c0_46, %c0_47] : memref<30x32x128xf32, #tpu.memory_space<vmem>>, vector<1x32x128xf32>
    %118 = vector.shape_cast %117 : vector<1x32x128xf32> to vector<32x128xf32>
    %cst_48 = arith.constant dense<0.000000e+00> : vector<128x128xf32>
    %119 = tpu.matmul %116, %118, %cst_48 {dimension_numbers = #tpu.dot_dimension_numbers<[1], [0], [0], [1], [0, 0, 1, 1], [], []>} : vector<128x32xf32>, vector<32x128xf32>, vector<128x128xf32> -> vector<128x128xf32>
    %120 = arith.addf %113, %119 : vector<128x128xf32>
    %121 = vector.extract_strided_slice %22 {offsets = [0, 1, 2, 0, 0], sizes = [2, 1, 8, 8, 32], strides = [1, 1, 1, 1, 1]} : vector<2x2x12x8x32xf32> to vector<2x1x8x8x32xf32>
    %122 = vector.shape_cast %121 : vector<2x1x8x8x32xf32> to vector<2x8x8x32xf32>
    %123 = vector.shape_cast %122 : vector<2x8x8x32xf32> to vector<128x32xf32>
    %c13 = arith.constant 13 : index
    %c0_49 = arith.constant 0 : index
    %c0_50 = arith.constant 0 : index
    %124 = vector.load %arg4[%c13, %c0_49, %c0_50] : memref<30x32x128xf32, #tpu.memory_space<vmem>>, vector<1x32x128xf32>
    %125 = vector.shape_cast %124 : vector<1x32x128xf32> to vector<32x128xf32>
    %cst_51 = arith.constant dense<0.000000e+00> : vector<128x128xf32>
    %126 = tpu.matmul %123, %125, %cst_51 {dimension_numbers = #tpu.dot_dimension_numbers<[1], [0], [0], [1], [0, 0, 1, 1], [], []>} : vector<128x32xf32>, vector<32x128xf32>, vector<128x128xf32> -> vector<128x128xf32>
    %127 = arith.addf %120, %126 : vector<128x128xf32>
    %128 = vector.extract_strided_slice %25 {offsets = [0, 0, 2, 0, 0], sizes = [2, 1, 8, 8, 32], strides = [1, 1, 1, 1, 1]} : vector<2x2x12x8x32xf32> to vector<2x1x8x8x32xf32>
    %129 = vector.shape_cast %128 : vector<2x1x8x8x32xf32> to vector<2x8x8x32xf32>
    %130 = vector.shape_cast %129 : vector<2x8x8x32xf32> to vector<128x32xf32>
    %c14 = arith.constant 14 : index
    %c0_52 = arith.constant 0 : index
    %c0_53 = arith.constant 0 : index
    %131 = vector.load %arg4[%c14, %c0_52, %c0_53] : memref<30x32x128xf32, #tpu.memory_space<vmem>>, vector<1x32x128xf32>
    %132 = vector.shape_cast %131 : vector<1x32x128xf32> to vector<32x128xf32>
    %cst_54 = arith.constant dense<0.000000e+00> : vector<128x128xf32>
    %133 = tpu.matmul %130, %132, %cst_54 {dimension_numbers = #tpu.dot_dimension_numbers<[1], [0], [0], [1], [0, 0, 1, 1], [], []>} : vector<128x32xf32>, vector<32x128xf32>, vector<128x128xf32> -> vector<128x128xf32>
    %134 = arith.addf %127, %133 : vector<128x128xf32>
    %135 = vector.extract_strided_slice %25 {offsets = [0, 1, 2, 0, 0], sizes = [2, 1, 8, 8, 32], strides = [1, 1, 1, 1, 1]} : vector<2x2x12x8x32xf32> to vector<2x1x8x8x32xf32>
    %136 = vector.shape_cast %135 : vector<2x1x8x8x32xf32> to vector<2x8x8x32xf32>
    %137 = vector.shape_cast %136 : vector<2x8x8x32xf32> to vector<128x32xf32>
    %c15 = arith.constant 15 : index
    %c0_55 = arith.constant 0 : index
    %c0_56 = arith.constant 0 : index
    %138 = vector.load %arg4[%c15, %c0_55, %c0_56] : memref<30x32x128xf32, #tpu.memory_space<vmem>>, vector<1x32x128xf32>
    %139 = vector.shape_cast %138 : vector<1x32x128xf32> to vector<32x128xf32>
    %cst_57 = arith.constant dense<0.000000e+00> : vector<128x128xf32>
    %140 = tpu.matmul %137, %139, %cst_57 {dimension_numbers = #tpu.dot_dimension_numbers<[1], [0], [0], [1], [0, 0, 1, 1], [], []>} : vector<128x32xf32>, vector<32x128xf32>, vector<128x128xf32> -> vector<128x128xf32>
    %141 = arith.addf %134, %140 : vector<128x128xf32>
    %142 = vector.extract_strided_slice %28 {offsets = [0, 0, 2, 0, 0], sizes = [2, 1, 8, 8, 32], strides = [1, 1, 1, 1, 1]} : vector<2x2x12x8x32xf32> to vector<2x1x8x8x32xf32>
    %143 = vector.shape_cast %142 : vector<2x1x8x8x32xf32> to vector<2x8x8x32xf32>
    %144 = vector.shape_cast %143 : vector<2x8x8x32xf32> to vector<128x32xf32>
    %c16 = arith.constant 16 : index
    %c0_58 = arith.constant 0 : index
    %c0_59 = arith.constant 0 : index
    %145 = vector.load %arg4[%c16, %c0_58, %c0_59] : memref<30x32x128xf32, #tpu.memory_space<vmem>>, vector<1x32x128xf32>
    %146 = vector.shape_cast %145 : vector<1x32x128xf32> to vector<32x128xf32>
    %cst_60 = arith.constant dense<0.000000e+00> : vector<128x128xf32>
    %147 = tpu.matmul %144, %146, %cst_60 {dimension_numbers = #tpu.dot_dimension_numbers<[1], [0], [0], [1], [0, 0, 1, 1], [], []>} : vector<128x32xf32>, vector<32x128xf32>, vector<128x128xf32> -> vector<128x128xf32>
    %148 = arith.addf %141, %147 : vector<128x128xf32>
    %149 = vector.extract_strided_slice %28 {offsets = [0, 1, 2, 0, 0], sizes = [2, 1, 8, 8, 32], strides = [1, 1, 1, 1, 1]} : vector<2x2x12x8x32xf32> to vector<2x1x8x8x32xf32>
    %150 = vector.shape_cast %149 : vector<2x1x8x8x32xf32> to vector<2x8x8x32xf32>
    %151 = vector.shape_cast %150 : vector<2x8x8x32xf32> to vector<128x32xf32>
    %c17 = arith.constant 17 : index
    %c0_61 = arith.constant 0 : index
    %c0_62 = arith.constant 0 : index
    %152 = vector.load %arg4[%c17, %c0_61, %c0_62] : memref<30x32x128xf32, #tpu.memory_space<vmem>>, vector<1x32x128xf32>
    %153 = vector.shape_cast %152 : vector<1x32x128xf32> to vector<32x128xf32>
    %cst_63 = arith.constant dense<0.000000e+00> : vector<128x128xf32>
    %154 = tpu.matmul %151, %153, %cst_63 {dimension_numbers = #tpu.dot_dimension_numbers<[1], [0], [0], [1], [0, 0, 1, 1], [], []>} : vector<128x32xf32>, vector<32x128xf32>, vector<128x128xf32> -> vector<128x128xf32>
    %155 = arith.addf %148, %154 : vector<128x128xf32>
    %156 = vector.extract_strided_slice %22 {offsets = [0, 0, 3, 0, 0], sizes = [2, 1, 8, 8, 32], strides = [1, 1, 1, 1, 1]} : vector<2x2x12x8x32xf32> to vector<2x1x8x8x32xf32>
    %157 = vector.shape_cast %156 : vector<2x1x8x8x32xf32> to vector<2x8x8x32xf32>
    %158 = vector.shape_cast %157 : vector<2x8x8x32xf32> to vector<128x32xf32>
    %c18 = arith.constant 18 : index
    %c0_64 = arith.constant 0 : index
    %c0_65 = arith.constant 0 : index
    %159 = vector.load %arg4[%c18, %c0_64, %c0_65] : memref<30x32x128xf32, #tpu.memory_space<vmem>>, vector<1x32x128xf32>
    %160 = vector.shape_cast %159 : vector<1x32x128xf32> to vector<32x128xf32>
    %cst_66 = arith.constant dense<0.000000e+00> : vector<128x128xf32>
    %161 = tpu.matmul %158, %160, %cst_66 {dimension_numbers = #tpu.dot_dimension_numbers<[1], [0], [0], [1], [0, 0, 1, 1], [], []>} : vector<128x32xf32>, vector<32x128xf32>, vector<128x128xf32> -> vector<128x128xf32>
    %162 = arith.addf %155, %161 : vector<128x128xf32>
    %163 = vector.extract_strided_slice %22 {offsets = [0, 1, 3, 0, 0], sizes = [2, 1, 8, 8, 32], strides = [1, 1, 1, 1, 1]} : vector<2x2x12x8x32xf32> to vector<2x1x8x8x32xf32>
    %164 = vector.shape_cast %163 : vector<2x1x8x8x32xf32> to vector<2x8x8x32xf32>
    %165 = vector.shape_cast %164 : vector<2x8x8x32xf32> to vector<128x32xf32>
    %c19 = arith.constant 19 : index
    %c0_67 = arith.constant 0 : index
    %c0_68 = arith.constant 0 : index
    %166 = vector.load %arg4[%c19, %c0_67, %c0_68] : memref<30x32x128xf32, #tpu.memory_space<vmem>>, vector<1x32x128xf32>
    %167 = vector.shape_cast %166 : vector<1x32x128xf32> to vector<32x128xf32>
    %cst_69 = arith.constant dense<0.000000e+00> : vector<128x128xf32>
    %168 = tpu.matmul %165, %167, %cst_69 {dimension_numbers = #tpu.dot_dimension_numbers<[1], [0], [0], [1], [0, 0, 1, 1], [], []>} : vector<128x32xf32>, vector<32x128xf32>, vector<128x128xf32> -> vector<128x128xf32>
    %169 = arith.addf %162, %168 : vector<128x128xf32>
    %170 = vector.extract_strided_slice %25 {offsets = [0, 0, 3, 0, 0], sizes = [2, 1, 8, 8, 32], strides = [1, 1, 1, 1, 1]} : vector<2x2x12x8x32xf32> to vector<2x1x8x8x32xf32>
    %171 = vector.shape_cast %170 : vector<2x1x8x8x32xf32> to vector<2x8x8x32xf32>
    %172 = vector.shape_cast %171 : vector<2x8x8x32xf32> to vector<128x32xf32>
    %c20 = arith.constant 20 : index
    %c0_70 = arith.constant 0 : index
    %c0_71 = arith.constant 0 : index
    %173 = vector.load %arg4[%c20, %c0_70, %c0_71] : memref<30x32x128xf32, #tpu.memory_space<vmem>>, vector<1x32x128xf32>
    %174 = vector.shape_cast %173 : vector<1x32x128xf32> to vector<32x128xf32>
    %cst_72 = arith.constant dense<0.000000e+00> : vector<128x128xf32>
    %175 = tpu.matmul %172, %174, %cst_72 {dimension_numbers = #tpu.dot_dimension_numbers<[1], [0], [0], [1], [0, 0, 1, 1], [], []>} : vector<128x32xf32>, vector<32x128xf32>, vector<128x128xf32> -> vector<128x128xf32>
    %176 = arith.addf %169, %175 : vector<128x128xf32>
    %177 = vector.extract_strided_slice %25 {offsets = [0, 1, 3, 0, 0], sizes = [2, 1, 8, 8, 32], strides = [1, 1, 1, 1, 1]} : vector<2x2x12x8x32xf32> to vector<2x1x8x8x32xf32>
    %178 = vector.shape_cast %177 : vector<2x1x8x8x32xf32> to vector<2x8x8x32xf32>
    %179 = vector.shape_cast %178 : vector<2x8x8x32xf32> to vector<128x32xf32>
    %c21 = arith.constant 21 : index
    %c0_73 = arith.constant 0 : index
    %c0_74 = arith.constant 0 : index
    %180 = vector.load %arg4[%c21, %c0_73, %c0_74] : memref<30x32x128xf32, #tpu.memory_space<vmem>>, vector<1x32x128xf32>
    %181 = vector.shape_cast %180 : vector<1x32x128xf32> to vector<32x128xf32>
    %cst_75 = arith.constant dense<0.000000e+00> : vector<128x128xf32>
    %182 = tpu.matmul %179, %181, %cst_75 {dimension_numbers = #tpu.dot_dimension_numbers<[1], [0], [0], [1], [0, 0, 1, 1], [], []>} : vector<128x32xf32>, vector<32x128xf32>, vector<128x128xf32> -> vector<128x128xf32>
    %183 = arith.addf %176, %182 : vector<128x128xf32>
    %184 = vector.extract_strided_slice %28 {offsets = [0, 0, 3, 0, 0], sizes = [2, 1, 8, 8, 32], strides = [1, 1, 1, 1, 1]} : vector<2x2x12x8x32xf32> to vector<2x1x8x8x32xf32>
    %185 = vector.shape_cast %184 : vector<2x1x8x8x32xf32> to vector<2x8x8x32xf32>
    %186 = vector.shape_cast %185 : vector<2x8x8x32xf32> to vector<128x32xf32>
    %c22 = arith.constant 22 : index
    %c0_76 = arith.constant 0 : index
    %c0_77 = arith.constant 0 : index
    %187 = vector.load %arg4[%c22, %c0_76, %c0_77] : memref<30x32x128xf32, #tpu.memory_space<vmem>>, vector<1x32x128xf32>
    %188 = vector.shape_cast %187 : vector<1x32x128xf32> to vector<32x128xf32>
    %cst_78 = arith.constant dense<0.000000e+00> : vector<128x128xf32>
    %189 = tpu.matmul %186, %188, %cst_78 {dimension_numbers = #tpu.dot_dimension_numbers<[1], [0], [0], [1], [0, 0, 1, 1], [], []>} : vector<128x32xf32>, vector<32x128xf32>, vector<128x128xf32> -> vector<128x128xf32>
    %190 = arith.addf %183, %189 : vector<128x128xf32>
    %191 = vector.extract_strided_slice %28 {offsets = [0, 1, 3, 0, 0], sizes = [2, 1, 8, 8, 32], strides = [1, 1, 1, 1, 1]} : vector<2x2x12x8x32xf32> to vector<2x1x8x8x32xf32>
    %192 = vector.shape_cast %191 : vector<2x1x8x8x32xf32> to vector<2x8x8x32xf32>
    %193 = vector.shape_cast %192 : vector<2x8x8x32xf32> to vector<128x32xf32>
    %c23 = arith.constant 23 : index
    %c0_79 = arith.constant 0 : index
    %c0_80 = arith.constant 0 : index
    %194 = vector.load %arg4[%c23, %c0_79, %c0_80] : memref<30x32x128xf32, #tpu.memory_space<vmem>>, vector<1x32x128xf32>
    %195 = vector.shape_cast %194 : vector<1x32x128xf32> to vector<32x128xf32>
    %cst_81 = arith.constant dense<0.000000e+00> : vector<128x128xf32>
    %196 = tpu.matmul %193, %195, %cst_81 {dimension_numbers = #tpu.dot_dimension_numbers<[1], [0], [0], [1], [0, 0, 1, 1], [], []>} : vector<128x32xf32>, vector<32x128xf32>, vector<128x128xf32> -> vector<128x128xf32>
    %197 = arith.addf %190, %196 : vector<128x128xf32>
    %198 = vector.extract_strided_slice %22 {offsets = [0, 0, 4, 0, 0], sizes = [2, 1, 8, 8, 32], strides = [1, 1, 1, 1, 1]} : vector<2x2x12x8x32xf32> to vector<2x1x8x8x32xf32>
    %199 = vector.shape_cast %198 : vector<2x1x8x8x32xf32> to vector<2x8x8x32xf32>
    %200 = vector.shape_cast %199 : vector<2x8x8x32xf32> to vector<128x32xf32>
    %c24 = arith.constant 24 : index
    %c0_82 = arith.constant 0 : index
    %c0_83 = arith.constant 0 : index
    %201 = vector.load %arg4[%c24, %c0_82, %c0_83] : memref<30x32x128xf32, #tpu.memory_space<vmem>>, vector<1x32x128xf32>
    %202 = vector.shape_cast %201 : vector<1x32x128xf32> to vector<32x128xf32>
    %cst_84 = arith.constant dense<0.000000e+00> : vector<128x128xf32>
    %203 = tpu.matmul %200, %202, %cst_84 {dimension_numbers = #tpu.dot_dimension_numbers<[1], [0], [0], [1], [0, 0, 1, 1], [], []>} : vector<128x32xf32>, vector<32x128xf32>, vector<128x128xf32> -> vector<128x128xf32>
    %204 = arith.addf %197, %203 : vector<128x128xf32>
    %205 = vector.extract_strided_slice %22 {offsets = [0, 1, 4, 0, 0], sizes = [2, 1, 8, 8, 32], strides = [1, 1, 1, 1, 1]} : vector<2x2x12x8x32xf32> to vector<2x1x8x8x32xf32>
    %206 = vector.shape_cast %205 : vector<2x1x8x8x32xf32> to vector<2x8x8x32xf32>
    %207 = vector.shape_cast %206 : vector<2x8x8x32xf32> to vector<128x32xf32>
    %c25 = arith.constant 25 : index
    %c0_85 = arith.constant 0 : index
    %c0_86 = arith.constant 0 : index
    %208 = vector.load %arg4[%c25, %c0_85, %c0_86] : memref<30x32x128xf32, #tpu.memory_space<vmem>>, vector<1x32x128xf32>
    %209 = vector.shape_cast %208 : vector<1x32x128xf32> to vector<32x128xf32>
    %cst_87 = arith.constant dense<0.000000e+00> : vector<128x128xf32>
    %210 = tpu.matmul %207, %209, %cst_87 {dimension_numbers = #tpu.dot_dimension_numbers<[1], [0], [0], [1], [0, 0, 1, 1], [], []>} : vector<128x32xf32>, vector<32x128xf32>, vector<128x128xf32> -> vector<128x128xf32>
    %211 = arith.addf %204, %210 : vector<128x128xf32>
    %212 = vector.extract_strided_slice %25 {offsets = [0, 0, 4, 0, 0], sizes = [2, 1, 8, 8, 32], strides = [1, 1, 1, 1, 1]} : vector<2x2x12x8x32xf32> to vector<2x1x8x8x32xf32>
    %213 = vector.shape_cast %212 : vector<2x1x8x8x32xf32> to vector<2x8x8x32xf32>
    %214 = vector.shape_cast %213 : vector<2x8x8x32xf32> to vector<128x32xf32>
    %c26 = arith.constant 26 : index
    %c0_88 = arith.constant 0 : index
    %c0_89 = arith.constant 0 : index
    %215 = vector.load %arg4[%c26, %c0_88, %c0_89] : memref<30x32x128xf32, #tpu.memory_space<vmem>>, vector<1x32x128xf32>
    %216 = vector.shape_cast %215 : vector<1x32x128xf32> to vector<32x128xf32>
    %cst_90 = arith.constant dense<0.000000e+00> : vector<128x128xf32>
    %217 = tpu.matmul %214, %216, %cst_90 {dimension_numbers = #tpu.dot_dimension_numbers<[1], [0], [0], [1], [0, 0, 1, 1], [], []>} : vector<128x32xf32>, vector<32x128xf32>, vector<128x128xf32> -> vector<128x128xf32>
    %218 = arith.addf %211, %217 : vector<128x128xf32>
    %219 = vector.extract_strided_slice %25 {offsets = [0, 1, 4, 0, 0], sizes = [2, 1, 8, 8, 32], strides = [1, 1, 1, 1, 1]} : vector<2x2x12x8x32xf32> to vector<2x1x8x8x32xf32>
    %220 = vector.shape_cast %219 : vector<2x1x8x8x32xf32> to vector<2x8x8x32xf32>
    %221 = vector.shape_cast %220 : vector<2x8x8x32xf32> to vector<128x32xf32>
    %c27 = arith.constant 27 : index
    %c0_91 = arith.constant 0 : index
    %c0_92 = arith.constant 0 : index
    %222 = vector.load %arg4[%c27, %c0_91, %c0_92] : memref<30x32x128xf32, #tpu.memory_space<vmem>>, vector<1x32x128xf32>
    %223 = vector.shape_cast %222 : vector<1x32x128xf32> to vector<32x128xf32>
    %cst_93 = arith.constant dense<0.000000e+00> : vector<128x128xf32>
    %224 = tpu.matmul %221, %223, %cst_93 {dimension_numbers = #tpu.dot_dimension_numbers<[1], [0], [0], [1], [0, 0, 1, 1], [], []>} : vector<128x32xf32>, vector<32x128xf32>, vector<128x128xf32> -> vector<128x128xf32>
    %225 = arith.addf %218, %224 : vector<128x128xf32>
    %226 = vector.extract_strided_slice %28 {offsets = [0, 0, 4, 0, 0], sizes = [2, 1, 8, 8, 32], strides = [1, 1, 1, 1, 1]} : vector<2x2x12x8x32xf32> to vector<2x1x8x8x32xf32>
    %227 = vector.shape_cast %226 : vector<2x1x8x8x32xf32> to vector<2x8x8x32xf32>
    %228 = vector.shape_cast %227 : vector<2x8x8x32xf32> to vector<128x32xf32>
    %c28 = arith.constant 28 : index
    %c0_94 = arith.constant 0 : index
    %c0_95 = arith.constant 0 : index
    %229 = vector.load %arg4[%c28, %c0_94, %c0_95] : memref<30x32x128xf32, #tpu.memory_space<vmem>>, vector<1x32x128xf32>
    %230 = vector.shape_cast %229 : vector<1x32x128xf32> to vector<32x128xf32>
    %cst_96 = arith.constant dense<0.000000e+00> : vector<128x128xf32>
    %231 = tpu.matmul %228, %230, %cst_96 {dimension_numbers = #tpu.dot_dimension_numbers<[1], [0], [0], [1], [0, 0, 1, 1], [], []>} : vector<128x32xf32>, vector<32x128xf32>, vector<128x128xf32> -> vector<128x128xf32>
    %232 = arith.addf %225, %231 : vector<128x128xf32>
    %233 = vector.extract_strided_slice %28 {offsets = [0, 1, 4, 0, 0], sizes = [2, 1, 8, 8, 32], strides = [1, 1, 1, 1, 1]} : vector<2x2x12x8x32xf32> to vector<2x1x8x8x32xf32>
    %234 = vector.shape_cast %233 : vector<2x1x8x8x32xf32> to vector<2x8x8x32xf32>
    %235 = vector.shape_cast %234 : vector<2x8x8x32xf32> to vector<128x32xf32>
    %c29 = arith.constant 29 : index
    %c0_97 = arith.constant 0 : index
    %c0_98 = arith.constant 0 : index
    %236 = vector.load %arg4[%c29, %c0_97, %c0_98] : memref<30x32x128xf32, #tpu.memory_space<vmem>>, vector<1x32x128xf32>
    %237 = vector.shape_cast %236 : vector<1x32x128xf32> to vector<32x128xf32>
    %cst_99 = arith.constant dense<0.000000e+00> : vector<128x128xf32>
    %238 = tpu.matmul %235, %237, %cst_99 {dimension_numbers = #tpu.dot_dimension_numbers<[1], [0], [0], [1], [0, 0, 1, 1], [], []>} : vector<128x32xf32>, vector<32x128xf32>, vector<128x128xf32> -> vector<128x128xf32>
    %239 = arith.addf %232, %238 : vector<128x128xf32>
    %240 = vector.extract_strided_slice %239 {offsets = [0, 0], sizes = [128, 64], strides = [1, 1]} : vector<128x128xf32> to vector<128x64xf32>
    %241 = vector.extract_strided_slice %239 {offsets = [0, 64], sizes = [128, 64], strides = [1, 1]} : vector<128x128xf32> to vector<128x64xf32>
    %242 = arith.maximumf %240, %241 : vector<128x64xf32>
    %243 = vector.shape_cast %242 : vector<128x64xf32> to vector<2x4x2x8x64xf32>
    %244 = vector.extract_strided_slice %243 {offsets = [0, 0, 0, 0, 0], sizes = [2, 4, 1, 8, 64], strides = [1, 1, 1, 1, 1]} : vector<2x4x2x8x64xf32> to vector<2x4x1x8x64xf32>
    %245 = vector.shape_cast %244 : vector<2x4x1x8x64xf32> to vector<2x4x8x64xf32>
    %246 = vector.extract_strided_slice %243 {offsets = [0, 0, 1, 0, 0], sizes = [2, 4, 1, 8, 64], strides = [1, 1, 1, 1, 1]} : vector<2x4x2x8x64xf32> to vector<2x4x1x8x64xf32>
    %247 = vector.shape_cast %246 : vector<2x4x1x8x64xf32> to vector<2x4x8x64xf32>
    %248 = arith.maximumf %245, %247 : vector<2x4x8x64xf32>
    %249 = vector.extract_strided_slice %248 {offsets = [0, 0, 0, 0], sizes = [2, 4, 4, 64], strides = [1, 1, 1, 1]} : vector<2x4x8x64xf32> to vector<2x4x4x64xf32>
    %c0_100 = arith.constant 0 : index
    %c0_101 = arith.constant 0 : index
    %250 = vector.load %arg5[%c0_100, %c0_101] : memref<1x64xf32, #tpu.memory_space<vmem>>, vector<1x64xf32>
    %251 = vector.shape_cast %250 : vector<1x64xf32> to vector<1x1x1x64xf32>
    %252 = vector.broadcast %251 : vector<1x1x1x64xf32> to vector<2x4x4x64xf32>
    %253 = arith.addf %249, %252 : vector<2x4x4x64xf32>
    %cst_102 = arith.constant 0.000000e+00 : f32
    %254 = vector.broadcast %cst_102 : f32 to vector<2x4x4x64xf32>
    %255 = arith.maximumf %253, %254 : vector<2x4x4x64xf32>
    %256 = arith.truncf %255 : vector<2x4x4x64xf32> to vector<2x4x4x64xbf16>
    %c0_103 = arith.constant 0 : index
    %c0_104 = arith.constant 0 : index
    %c0_105 = arith.constant 0 : index
    %c0_106 = arith.constant 0 : index
    %257 = vector.load %arg6[%c0_103, %c0_104, %c0_105, %c0_106] : memref<2x4x4x64xbf16, #tpu.memory_space<vmem>>, vector<2x4x4x64xbf16>
    tpu.vector_store %arg6[%c0_103, %c0_104, %c0_105, %c0_106], %256 {strides = array<i32>} : memref<2x4x4x64xbf16, #tpu.memory_space<vmem>>, vector<2x4x4x64xbf16>,
    return
  }
  func.func @transform_0(%arg0: i32) -> (i32, i32, i32, i32) {
    %c0_i32 = arith.constant 0 : i32
    %c0_i32_0 = arith.constant 0 : i32
    %c0_i32_1 = arith.constant 0 : i32
    %c0_i32_2 = arith.constant 0 : i32
    return %arg0, %c0_i32, %c0_i32_0, %c0_i32_1 : i32, i32, i32, i32
  }
  func.func @transform_1(%arg0: i32) -> (i32, i32) {
    %c0_i32 = arith.constant 0 : i32
    %c0_i32_0 = arith.constant 0 : i32
    %c0_i32_1 = arith.constant 0 : i32
    return %c0_i32, %c0_i32_0 : i32, i32
  }
  func.func @transform_2(%arg0: i32) -> (i32, i32) {
    %c0_i32 = arith.constant 0 : i32
    %c0_i32_0 = arith.constant 0 : i32
    %c0_i32_1 = arith.constant 0 : i32
    return %c0_i32, %c0_i32_0 : i32, i32
  }
  func.func @transform_3(%arg0: i32) -> (i32, i32, i32) {
    %c0_i32 = arith.constant 0 : i32
    %c0_i32_0 = arith.constant 0 : i32
    %c0_i32_1 = arith.constant 0 : i32
    %c0_i32_2 = arith.constant 0 : i32
    return %c0_i32, %c0_i32_0, %c0_i32_1 : i32, i32, i32
  }
  func.func @transform_4(%arg0: i32) -> (i32, i32) {
    %c0_i32 = arith.constant 0 : i32
    %c0_i32_0 = arith.constant 0 : i32
    %c0_i32_1 = arith.constant 0 : i32
    return %c0_i32, %c0_i32_0 : i32, i32
  }
  func.func @transform_5(%arg0: i32) -> (i32, i32, i32, i32) {
    %c0_i32 = arith.constant 0 : i32
    %c0_i32_0 = arith.constant 0 : i32
    %c0_i32_1 = arith.constant 0 : i32
    %c0_i32_2 = arith.constant 0 : i32
    return %arg0, %c0_i32, %c0_i32_0, %c0_i32_1 : i32, i32, i32, i32
  }
}

module attributes {stable_mosaic.version = 11 : i64} {
  func.func @_fc_head_kernel(%arg0: i32, %arg1: memref<8x1024xbf16, #tpu.memory_space<vmem>>, %arg2: memref<1024x512xbf16, #tpu.memory_space<vmem>>, %arg3: memref<1x512xf32, #tpu.memory_space<vmem>>, %arg4: memref<512x128xbf16, #tpu.memory_space<vmem>>, %arg5: memref<1x128xf32, #tpu.memory_space<vmem>>, %arg6: memref<8x128xf32, #tpu.memory_space<vmem>>) attributes {dimension_semantics = [#tpu.dimension_semantics<parallel>], iteration_bounds = array<i64: 1>, scalar_prefetch = 0 : i64, scratch_operands = 0 : i64, tpu.core_type = #tpu.core_type<tc>, window_params = [{transform_indices = @transform_0, window_bounds = array<i64: 8, 1024>}, {pipeline_mode = #tpu.pipeline_mode<synchronous>, transform_indices = @transform_1, window_bounds = array<i64: 1024, 512>}, {pipeline_mode = #tpu.pipeline_mode<synchronous>, transform_indices = @transform_2, window_bounds = array<i64: 1, 512>}, {pipeline_mode = #tpu.pipeline_mode<synchronous>, transform_indices = @transform_3, window_bounds = array<i64: 512, 128>}, {pipeline_mode = #tpu.pipeline_mode<synchronous>, transform_indices = @transform_4, window_bounds = array<i64: 1, 128>}, {transform_indices = @transform_5, window_bounds = array<i64: 8, 128>}]} {
    %c0 = arith.constant 0 : index
    %c0_0 = arith.constant 0 : index
    %0 = vector.load %arg1[%c0, %c0_0] : memref<8x1024xbf16, #tpu.memory_space<vmem>>, vector<8x1024xbf16>
    %c0_1 = arith.constant 0 : index
    %c0_2 = arith.constant 0 : index
    %1 = vector.load %arg2[%c0_1, %c0_2] : memref<1024x512xbf16, #tpu.memory_space<vmem>>, vector<1024x512xbf16>
    %cst = arith.constant dense<0.000000e+00> : vector<8x512xf32>
    %2 = tpu.matmul %0, %1, %cst {dimension_numbers = #tpu.dot_dimension_numbers<[1], [0], [0], [1], [0, 0, 1, 1], [], []>} : vector<8x1024xbf16>, vector<1024x512xbf16>, vector<8x512xf32> -> vector<8x512xf32>
    %c0_3 = arith.constant 0 : index
    %c0_4 = arith.constant 0 : index
    %3 = vector.load %arg3[%c0_3, %c0_4] : memref<1x512xf32, #tpu.memory_space<vmem>>, vector<1x512xf32>
    %4 = vector.broadcast %3 : vector<1x512xf32> to vector<8x512xf32>
    %5 = arith.addf %2, %4 : vector<8x512xf32>
    %cst_5 = arith.constant 0.000000e+00 : f32
    %6 = vector.broadcast %cst_5 : f32 to vector<8x512xf32>
    %7 = arith.maximumf %5, %6 : vector<8x512xf32>
    %8 = arith.truncf %7 : vector<8x512xf32> to vector<8x512xbf16>
    %c0_6 = arith.constant 0 : index
    %c0_7 = arith.constant 0 : index
    %9 = vector.load %arg4[%c0_6, %c0_7] : memref<512x128xbf16, #tpu.memory_space<vmem>>, vector<512x128xbf16>
    %cst_8 = arith.constant dense<0.000000e+00> : vector<8x128xf32>
    %10 = tpu.matmul %8, %9, %cst_8 {dimension_numbers = #tpu.dot_dimension_numbers<[1], [0], [0], [1], [0, 0, 1, 1], [], []>} : vector<8x512xbf16>, vector<512x128xbf16>, vector<8x128xf32> -> vector<8x128xf32>
    %c0_9 = arith.constant 0 : index
    %c0_10 = arith.constant 0 : index
    %11 = vector.load %arg5[%c0_9, %c0_10] : memref<1x128xf32, #tpu.memory_space<vmem>>, vector<1x128xf32>
    %12 = vector.broadcast %11 : vector<1x128xf32> to vector<8x128xf32>
    %13 = arith.addf %10, %12 : vector<8x128xf32>
    %14 = tpu.iota {dimensions = array<i32: 1>} : vector<8x128xi32>
    %c10_i32 = arith.constant 10 : i32
    %15 = vector.broadcast %c10_i32 : i32 to vector<8x128xi32>
    %16 = arith.cmpi slt, %14, %15 : vector<8x128xi32>
    %cst_11 = arith.constant -1.000000e+30 : f32
    %17 = vector.broadcast %cst_11 : f32 to vector<8x128xf32>
    %18 = arith.select %16, %13, %17 : vector<8x128xi1>, vector<8x128xf32>
    %cst_12 = arith.constant dense<0xFF800000> : vector<8xf32>
    %19 = vector.multi_reduction <maximumf>, %18, %cst_12 [1] : vector<8x128xf32> to vector<8xf32>
    %20 = vector.shape_cast %19 : vector<8xf32> to vector<8x1xf32>
    %21 = vector.broadcast %20 : vector<8x1xf32> to vector<8x128xf32>
    %22 = arith.subf %18, %21 : vector<8x128xf32>
    %23 = math.exp %22 : vector<8x128xf32>
    %cst_13 = arith.constant dense<0.000000e+00> : vector<8xf32>
    %24 = vector.multi_reduction <add>, %23, %cst_13 [1] : vector<8x128xf32> to vector<8xf32>
    %25 = vector.shape_cast %24 : vector<8xf32> to vector<8x1xf32>
    %26 = math.log %25 : vector<8x1xf32>
    %27 = vector.broadcast %26 : vector<8x1xf32> to vector<8x128xf32>
    %28 = arith.subf %22, %27 : vector<8x128xf32>
    %c0_14 = arith.constant 0 : index
    %c0_15 = arith.constant 0 : index
    %29 = vector.load %arg6[%c0_14, %c0_15] : memref<8x128xf32, #tpu.memory_space<vmem>>, vector<8x128xf32>
    tpu.vector_store %arg6[%c0_14, %c0_15], %28 {strides = array<i32>} : memref<8x128xf32, #tpu.memory_space<vmem>>, vector<8x128xf32>,
    return
  }
  func.func @transform_0(%arg0: i32) -> (i32, i32) {
    %c0_i32 = arith.constant 0 : i32
    %c0_i32_0 = arith.constant 0 : i32
    return %arg0, %c0_i32 : i32, i32
  }
  func.func @transform_1(%arg0: i32) -> (i32, i32) {
    %c0_i32 = arith.constant 0 : i32
    %c0_i32_0 = arith.constant 0 : i32
    %c0_i32_1 = arith.constant 0 : i32
    return %c0_i32, %c0_i32_0 : i32, i32
  }
  func.func @transform_2(%arg0: i32) -> (i32, i32) {
    %c0_i32 = arith.constant 0 : i32
    %c0_i32_0 = arith.constant 0 : i32
    %c0_i32_1 = arith.constant 0 : i32
    return %c0_i32, %c0_i32_0 : i32, i32
  }
  func.func @transform_3(%arg0: i32) -> (i32, i32) {
    %c0_i32 = arith.constant 0 : i32
    %c0_i32_0 = arith.constant 0 : i32
    %c0_i32_1 = arith.constant 0 : i32
    return %c0_i32, %c0_i32_0 : i32, i32
  }
  func.func @transform_4(%arg0: i32) -> (i32, i32) {
    %c0_i32 = arith.constant 0 : i32
    %c0_i32_0 = arith.constant 0 : i32
    %c0_i32_1 = arith.constant 0 : i32
    return %c0_i32, %c0_i32_0 : i32, i32
  }
  func.func @transform_5(%arg0: i32) -> (i32, i32) {
    %c0_i32 = arith.constant 0 : i32
    %c0_i32_0 = arith.constant 0 : i32
    return %arg0, %c0_i32 : i32, i32
  }
}

</mosaic_0001>

<bundles_post_ra>
// kernel: net_forward.3
= control target key start
LH: loop header
LB: loop body
LE: loop exit
PB: predicated region body
PF: predicated region fallthrough
CT: control target
= control target key end

     0   :  { %s4039_s1 = inlined_call_operand.vmem [shape: bf16[1024,512], index: 1, kind: input, shape index: {}]   ;;  %s4040_s0 = inlined_call_operand.vmem [shape: bf16[8,1024], index: 0, kind: input, shape index: {}]   ;;  %s4041_s3 = inlined_call_operand.vmem [shape: bf16[512,128], index: 3, kind: input, shape index: {}]   ;;  %s4042_s2 = inlined_call_operand.vmem [shape: f32[1,512], index: 2, kind: input, shape index: {}]   ;;  %s4043_s4 = inlined_call_operand.vmem [shape: f32[1,128], index: 4, kind: input, shape index: {}]   ;;  %s4044_s5 = inlined_call_operand.vmem [shape: f32[8,128], index: 5, kind: output, shape index: {}]  }
   0x1   :  { %v2678_v0 = vld [vmem:[%s4039_s1 + $0x4] ss:$16 sps:$4 sm:$0xff]   ;;  %v2680_v1 = vld [vmem:[%s4039_s1 + $0xc] ss:$16 sps:$4 sm:$0xff]   ;;  %v2682_v2 = vld [vmem:[%s4039_s1] ss:$16 sps:$4 sm:$0xff]  }
   0x2   :  { %1611 = vmatprep.subr.bf16.mxu0 %v2678_v0  ;;  %v2683_v3 = vld [vmem:[%s4039_s1 + $0x8] ss:$16 sps:$4 sm:$0xff]   ;;  %1775 = vmatprep.subr.bf16.mxu1 %v2680_v1  ;;  %v2684_v4 = vld [vmem:[%s4039_s1 + $0x24] ss:$16 sps:$4 sm:$0xff]   ;;  %v2686_v5 = vld [vmem:[%s4039_s1 + $0x2c] ss:$16 sps:$4 sm:$0xff]  }
   0x3   :  { %1612 = vmatpush1.bf16.msra.mxu0 %v2682_v2  ;;  %1776 = vmatpush1.bf16.msra.mxu1 %v2683_v3  ;;  %v2688_v6 = vld [vmem:[%s4039_s1 + $0x20] ss:$16 sps:$4 sm:$0xff]   ;;  %v2689_v7 = vld [vmem:[%s4039_s1 + $0x28] ss:$16 sps:$4 sm:$0xff]   ;;  %v2690_v8 = vld [vmem:[%s4039_s1 + $0x44] ss:$16 sps:$4 sm:$0xff]  }
   0x4   :  { %1613 = vmatprep.subr.bf16.mxu0 %v2684_v4  ;;  %1777 = vmatprep.subr.bf16.mxu1 %v2686_v5  ;;  %v2692_v9 = vld [vmem:[%s4039_s1 + $0x4c] ss:$16 sps:$4 sm:$0xff]   ;;  %v2694_v10 = vld [vmem:[%s4039_s1 + $0x40] ss:$16 sps:$4 sm:$0xff]   ;;  %v2695_v11 = vld [vmem:[%s4039_s1 + $0x48] ss:$16 sps:$4 sm:$0xff]  }
   0x5   :  { %v2696_v12 = vld [vmem:[%s4039_s1 + $0x64] ss:$16 sps:$4 sm:$0xff]   ;;  %v2698_v13 = vld [vmem:[%s4039_s1 + $0x6c] ss:$16 sps:$4 sm:$0xff]   ;;  %v2700_v14 = vld [vmem:[%s4039_s1 + $0x60] ss:$16 sps:$4 sm:$0xff]  }
   0x6   :  { %v2701_v15 = vld [vmem:[%s4039_s1 + $0x68] ss:$16 sps:$4 sm:$0xff]   ;;  %v2702_v16 = vld [vmem:[%s4039_s1 + $0x84] ss:$16 sps:$4 sm:$0xff]   ;;  %v2704_v17 = vld [vmem:[%s4039_s1 + $0x8c] ss:$16 sps:$4 sm:$0xff]  }
   0x7   :  { %1614 = vmatpush1.bf16.msra.mxu0 %v2688_v6  ;;  %1778 = vmatpush1.bf16.msra.mxu1 %v2689_v7  ;;  %v2706_v18 = vld [vmem:[%s4039_s1 + $0x80] ss:$16 sps:$4 sm:$0xff]   ;;  %v2707_v19 = vld [vmem:[%s4039_s1 + $0x88] ss:$16 sps:$4 sm:$0xff]   ;;  %v2708_v20 = vld [vmem:[%s4039_s1 + $0xa4] ss:$16 sps:$4 sm:$0xff]  }
   0x8   :  { %1615 = vmatprep.subr.bf16.mxu0 %v2690_v8  ;;  %1779 = vmatprep.subr.bf16.mxu1 %v2692_v9  ;;  %v2710_v21 = vld [vmem:[%s4039_s1 + $0xac] ss:$16 sps:$4 sm:$0xff]   ;;  %v2712_v22 = vld [vmem:[%s4039_s1 + $0xa0] ss:$16 sps:$4 sm:$0xff]   ;;  %v2713_v23 = vld [vmem:[%s4039_s1 + $0xa8] ss:$16 sps:$4 sm:$0xff]  }
   0x9   :  { %v2714_v24 = vld [vmem:[%s4039_s1 + $0xc4] ss:$16 sps:$4 sm:$0xff]   ;;  %v2716_v25 = vld [vmem:[%s4039_s1 + $0xcc] ss:$16 sps:$4 sm:$0xff]   ;;  %v2718_v26 = vld [vmem:[%s4039_s1 + $0xc0] ss:$16 sps:$4 sm:$0xff]  }
   0xa   :  { %v2719_v27 = vld [vmem:[%s4039_s1 + $0xc8] ss:$16 sps:$4 sm:$0xff]   ;;  %v2720_v28 = vld [vmem:[%s4039_s1 + $0xe4] ss:$16 sps:$4 sm:$0xff]   ;;  %v2722_v29 = vld [vmem:[%s4039_s1 + $0xec] ss:$16 sps:$4 sm:$0xff]  }
   0xb   :  { %1616 = vmatpush1.bf16.msra.mxu0 %v2694_v10  ;;  %1780 = vmatpush1.bf16.msra.mxu1 %v2695_v11  ;;  %v2724_v30 = vld [vmem:[%s4039_s1 + $0xe0] ss:$16 sps:$4 sm:$0xff]   ;;  %v2725_v31 = vld [vmem:[%s4039_s1 + $0xe8] ss:$16 sps:$4 sm:$0xff]   ;;  %v2726_v32 = vld [vmem:[%s4039_s1 + $0x104] ss:$16 sps:$4 sm:$0xff]  }
   0xc   :  { %1617 = vmatprep.subr.bf16.mxu0 %v2696_v12  ;;  %1781 = vmatprep.subr.bf16.mxu1 %v2698_v13  ;;  %v2728_v33 = vld [vmem:[%s4039_s1 + $0x10c] ss:$16 sps:$4 sm:$0xff]   ;;  %v2730_v34 = vld [vmem:[%s4039_s1 + $0x100] ss:$16 sps:$4 sm:$0xff]   ;;  %v2731_v35 = vld [vmem:[%s4039_s1 + $0x108] ss:$16 sps:$4 sm:$0xff]  }
   0xd   :  { %v2732_v36 = vld [vmem:[%s4039_s1 + $0x124] ss:$16 sps:$4 sm:$0xff]   ;;  %v2734_v37 = vld [vmem:[%s4039_s1 + $0x12c] ss:$16 sps:$4 sm:$0xff]   ;;  %v2736_v38 = vld [vmem:[%s4039_s1 + $0x120] ss:$16 sps:$4 sm:$0xff]  }
   0xe   :  { %v2737_v39 = vld [vmem:[%s4039_s1 + $0x128] ss:$16 sps:$4 sm:$0xff]   ;;  %v2738_v40 = vld [vmem:[%s4039_s1 + $0x144] ss:$16 sps:$4 sm:$0xff]   ;;  %v2740_v41 = vld [vmem:[%s4039_s1 + $0x14c] ss:$16 sps:$4 sm:$0xff]  }
   0xf   :  { %1618 = vmatpush1.bf16.msra.mxu0 %v2700_v14  ;;  %1782 = vmatpush1.bf16.msra.mxu1 %v2701_v15  ;;  %v2742_v42 = vld [vmem:[%s4039_s1 + $0x140] ss:$16 sps:$4 sm:$0xff]   ;;  %v2743_v43 = vld [vmem:[%s4039_s1 + $0x148] ss:$16 sps:$4 sm:$0xff]   ;;  %v2744_v44 = vld [vmem:[%s4039_s1 + $0x164] ss:$16 sps:$4 sm:$0xff]  }
  0x10   :  { %1619 = vmatprep.subr.bf16.mxu0 %v2702_v16  ;;  %1783 = vmatprep.subr.bf16.mxu1 %v2704_v17  ;;  %v2746_v45 = vld [vmem:[%s4039_s1 + $0x16c] ss:$16 sps:$4 sm:$0xff]   ;;  %v21_v46 = vld [vmem:[%s4040_s0] sm:$0xff]  ;;  %v2749_v49 = vld [vmem:[%s4039_s1 + $0x168] ss:$16 sps:$4 sm:$0xff]  }
  0x11   :  { %v2748_v47 = vld [vmem:[%s4039_s1 + $0x160] ss:$16 sps:$4 sm:$0xff]   ;;  %v2310_v48 = vcombine.high %v21_v46, %v21_v46  ;;  %v2750_v50 = vld [vmem:[%s4039_s1 + $0x184] ss:$16 sps:$4 sm:$0xff]   ;;  %v2752_v51 = vld [vmem:[%s4039_s1 + $0x18c] ss:$16 sps:$4 sm:$0xff]   ;;  %v2309_v4 = vcombine.low %v21_v46, %v21_v46 }
  0x12   :  { %v2754_v52 = vld [vmem:[%s4039_s1 + $0x180] ss:$16 sps:$4 sm:$0xff]   ;;  %v2755_v53 = vld [vmem:[%s4039_s1 + $0x188] ss:$16 sps:$4 sm:$0xff]   ;;  %v2756_v54 = vld [vmem:[%s4039_s1 + $0x1a4] ss:$16 sps:$4 sm:$0xff]  }
  0x13   :  { %1620 = vmatpush1.bf16.msra.mxu0 %v2706_v18  ;;  %1784 = vmatpush1.bf16.msra.mxu1 %v2707_v19  ;;  %v2758_v55 = vld [vmem:[%s4039_s1 + $0x1ac] ss:$16 sps:$4 sm:$0xff]   ;;  %v2760_v56 = vld [vmem:[%s4039_s1 + $0x1a0] ss:$16 sps:$4 sm:$0xff]   ;;  %v2761_v57 = vld [vmem:[%s4039_s1 + $0x1a8] ss:$16 sps:$4 sm:$0xff]  }
  0x14   :  { %1621 = vmatprep.subr.bf16.mxu0 %v2708_v20  ;;  %1785 = vmatprep.subr.bf16.mxu1 %v2710_v21  ;;  %v2762_v58 = vld [vmem:[%s4039_s1 + $0x1c4] ss:$16 sps:$4 sm:$0xff]   ;;  %v2764_v59 = vld [vmem:[%s4039_s1 + $0x1cc] ss:$16 sps:$4 sm:$0xff]   ;;  %v2766_v60 = vld [vmem:[%s4039_s1 + $0x1c0] ss:$16 sps:$4 sm:$0xff]  }
  0x15   :  { %1643 = vmatprep.mubr.bf16.mxu0 %v2310_v48  ;;  %1807 = vmatprep.mubr.bf16.mxu1 %v2310_v48  ;;  %v2767_v61 = vld [vmem:[%s4039_s1 + $0x1c8] ss:$16 sps:$4 sm:$0xff]   ;;  %v2768_v62 = vld [vmem:[%s4039_s1 + $0x1e4] ss:$16 sps:$4 sm:$0xff]   ;;  %v2770_v63 = vld [vmem:[%s4039_s1 + $0x1ec] ss:$16 sps:$4 sm:$0xff]  }
  0x16   :  { %v2772_v0 = vld [vmem:[%s4039_s1 + $0x1e0] ss:$16 sps:$4 sm:$0xff]   ;;  %v2773_v1 = vld [vmem:[%s4039_s1 + $0x1e8] ss:$16 sps:$4 sm:$0xff]   ;;  %v2778_v2 = vld [vmem:[%s4039_s1 + $0x204] ss:$16 sps:$4 sm:$0xff]  }
  0x17   :  { %1622 = vmatpush1.bf16.msra.mxu0 %v2712_v22  ;;  %1786 = vmatpush1.bf16.msra.mxu1 %v2713_v23  ;;  %v2781_v3 = vld [vmem:[%s4039_s1 + $0x20c] ss:$16 sps:$4 sm:$0xff]   ;;  %v2776_v5 = vld [vmem:[%s4039_s1 + $0x200] ss:$16 sps:$4 sm:$0xff]   ;;  %v2779_v6 = vld [vmem:[%s4039_s1 + $0x208] ss:$16 sps:$4 sm:$0xff]  }
  0x18   :  { %1623 = vmatprep.subr.bf16.mxu0 %v2714_v24  ;;  %1787 = vmatprep.subr.bf16.mxu1 %v2716_v25  ;;  %v2784_v7 = vld [vmem:[%s4039_s1 + $0x224] ss:$16 sps:$4 sm:$0xff]   ;;  %v2787_v8 = vld [vmem:[%s4039_s1 + $0x22c] ss:$16 sps:$4 sm:$0xff]   ;;  %v2782_v9 = vld [vmem:[%s4039_s1 + $0x220] ss:$16 sps:$4 sm:$0xff]  }
  0x19   :  { %v2785_v10 = vld [vmem:[%s4039_s1 + $0x228] ss:$16 sps:$4 sm:$0xff]   ;;  %v2790_v11 = vld [vmem:[%s4039_s1 + $0x244] ss:$16 sps:$4 sm:$0xff]   ;;  %v2793_v12 = vld [vmem:[%s4039_s1 + $0x24c] ss:$16 sps:$4 sm:$0xff]  }
  0x1a   :  { %v2788_v13 = vld [vmem:[%s4039_s1 + $0x240] ss:$16 sps:$4 sm:$0xff]   ;;  %v2791_v14 = vld [vmem:[%s4039_s1 + $0x248] ss:$16 sps:$4 sm:$0xff]   ;;  %v2796_v15 = vld [vmem:[%s4039_s1 + $0x264] ss:$16 sps:$4 sm:$0xff]  }
  0x1b   :  { %1624 = vmatpush1.bf16.msra.mxu0 %v2718_v26  ;;  %1788 = vmatpush1.bf16.msra.mxu1 %v2719_v27  ;;  %v2799_v16 = vld [vmem:[%s4039_s1 + $0x26c] ss:$16 sps:$4 sm:$0xff]   ;;  %v2794_v17 = vld [vmem:[%s4039_s1 + $0x260] ss:$16 sps:$4 sm:$0xff]   ;;  %v2797_v18 = vld [vmem:[%s4039_s1 + $0x268] ss:$16 sps:$4 sm:$0xff]  }
  0x1c   :  { %1625 = vmatprep.subr.bf16.mxu0 %v2720_v28  ;;  %1789 = vmatprep.subr.bf16.mxu1 %v2722_v29  ;;  %v2802_v19 = vld [vmem:[%s4039_s1 + $0x284] ss:$16 sps:$4 sm:$0xff]   ;;  %v2805_v20 = vld [vmem:[%s4039_s1 + $0x28c] ss:$16 sps:$4 sm:$0xff]   ;;  %v2800_v21 = vld [vmem:[%s4039_s1 + $0x280] ss:$16 sps:$4 sm:$0xff]  }
  0x1d   :  { %v2803_v22 = vld [vmem:[%s4039_s1 + $0x288] ss:$16 sps:$4 sm:$0xff]   ;;  %v2808_v23 = vld [vmem:[%s4039_s1 + $0x2a4] ss:$16 sps:$4 sm:$0xff]   ;;  %v2811_v24 = vld [vmem:[%s4039_s1 + $0x2ac] ss:$16 sps:$4 sm:$0xff]  }
  0x1e   :  { %v2806_v25 = vld [vmem:[%s4039_s1 + $0x2a0] ss:$16 sps:$4 sm:$0xff]   ;;  %v2809_v26 = vld [vmem:[%s4039_s1 + $0x2a8] ss:$16 sps:$4 sm:$0xff]   ;;  %v2814_v27 = vld [vmem:[%s4039_s1 + $0x2c4] ss:$16 sps:$4 sm:$0xff]  }
  0x1f   :  { %1626 = vmatpush1.bf16.msra.mxu0 %v2724_v30  ;;  %1790 = vmatpush1.bf16.msra.mxu1 %v2725_v31  ;;  %v2817_v28 = vld [vmem:[%s4039_s1 + $0x2cc] ss:$16 sps:$4 sm:$0xff]   ;;  %v2812_v31 = vld [vmem:[%s4039_s1 + $0x2c0] ss:$16 sps:$4 sm:$0xff]   ;;  %v2839_v48 = vld [vmem:[%s4039_s1 + $0x348] ss:$16 sps:$4 sm:$0xff]  }
  0x20   :  { %1627 = vmatprep.subr.bf16.mxu0 %v2726_v32  ;;  %1791 = vmatprep.subr.bf16.mxu1 %v2728_v33  ;;  %v3412_v29 = vld [vmem:[%s4040_s0 + $0x8] sm:$0xff]  ;;  %v2820_v33 = vld [vmem:[%s4039_s1 + $0x2e4] ss:$16 sps:$4 sm:$0xff]  }
  0x21   :  { %v2312_v30 = vcombine.high %v3412_v29, %v3412_v29  ;;  %v2815_v32 = vld [vmem:[%s4039_s1 + $0x2c8] ss:$16 sps:$4 sm:$0xff]   ;;  %v2841_v46 = vld [vmem:[%s4039_s1 + $0x34c] ss:$16 sps:$4 sm:$0xff]  }
  0x23   :  { %1628 = vmatpush1.bf16.msra.mxu0 %v2730_v34  ;;  %1792 = vmatpush1.bf16.msra.mxu1 %v2731_v35  ;;  %v2823_v34 = vld [vmem:[%s4039_s1 + $0x2ec] ss:$16 sps:$4 sm:$0xff]   ;;  %v2818_v35 = vld [vmem:[%s4039_s1 + $0x2e0] ss:$16 sps:$4 sm:$0xff]  }
  0x24   :  { %1629 = vmatprep.subr.bf16.mxu0 %v2732_v36  ;;  %1793 = vmatprep.subr.bf16.mxu1 %v2734_v37  ;;  %v2821_v36 = vld [vmem:[%s4039_s1 + $0x2e8] ss:$16 sps:$4 sm:$0xff]   ;;  %v2826_v37 = vld [vmem:[%s4039_s1 + $0x304] ss:$16 sps:$4 sm:$0xff]  }
  0x27   :  { %1630 = vmatpush1.bf16.msra.mxu0 %v2736_v38  ;;  %1794 = vmatpush1.bf16.msra.mxu1 %v2737_v39  ;;  %v2829_v38 = vld [vmem:[%s4039_s1 + $0x30c] ss:$16 sps:$4 sm:$0xff]   ;;  %v2824_v39 = vld [vmem:[%s4039_s1 + $0x300] ss:$16 sps:$4 sm:$0xff]  }
  0x28   :  { %1631 = vmatprep.subr.bf16.mxu0 %v2738_v40  ;;  %1795 = vmatprep.subr.bf16.mxu1 %v2740_v41  ;;  %v2827_v40 = vld [vmem:[%s4039_s1 + $0x308] ss:$16 sps:$4 sm:$0xff]   ;;  %v2832_v41 = vld [vmem:[%s4039_s1 + $0x324] ss:$16 sps:$4 sm:$0xff]  }
  0x2b   :  { %1632 = vmatpush1.bf16.msra.mxu0 %v2742_v42  ;;  %1796 = vmatpush1.bf16.msra.mxu1 %v2743_v43  ;;  %v2835_v42 = vld [vmem:[%s4039_s1 + $0x32c] ss:$16 sps:$4 sm:$0xff]   ;;  %v2830_v43 = vld [vmem:[%s4039_s1 + $0x320] ss:$16 sps:$4 sm:$0xff]  }
  0x2c   :  { %1633 = vmatprep.subr.bf16.mxu0 %v2744_v44  ;;  %1797 = vmatprep.subr.bf16.mxu1 %v2746_v45  ;;  %v2833_v44 = vld [vmem:[%s4039_s1 + $0x328] ss:$16 sps:$4 sm:$0xff]   ;;  %v2838_v45 = vld [vmem:[%s4039_s1 + $0x344] ss:$16 sps:$4 sm:$0xff]  }
  0x2f   :  { %1634 = vmatpush1.bf16.msra.mxu0 %v2748_v47  ;;  %1798 = vmatpush1.bf16.msra.mxu1 %v2749_v49  ;;  %v2836_v47 = vld [vmem:[%s4039_s1 + $0x340] ss:$16 sps:$4 sm:$0xff]   ;;  %v2844_v49 = vld [vmem:[%s4039_s1 + $0x364] ss:$16 sps:$4 sm:$0xff]  }
  0x30   :  { %1635 = vmatprep.subr.bf16.mxu0 %v2750_v50  ;;  %1799 = vmatprep.subr.bf16.mxu1 %v2752_v51  ;;  %v2847_v50 = vld [vmem:[%s4039_s1 + $0x36c] ss:$16 sps:$4 sm:$0xff]   ;;  %v2842_v51 = vld [vmem:[%s4039_s1 + $0x360] ss:$16 sps:$4 sm:$0xff]  }
  0x33   :  { %1636 = vmatpush1.bf16.msra.mxu0 %v2754_v52  ;;  %1800 = vmatpush1.bf16.msra.mxu1 %v2755_v53  ;;  %v2845_v52 = vld [vmem:[%s4039_s1 + $0x368] ss:$16 sps:$4 sm:$0xff]   ;;  %v2850_v53 = vld [vmem:[%s4039_s1 + $0x384] ss:$16 sps:$4 sm:$0xff]  }
  0x34   :  { %1637 = vmatprep.subr.bf16.mxu0 %v2756_v54  ;;  %1801 = vmatprep.subr.bf16.mxu1 %v2758_v55  ;;  %v2853_v54 = vld [vmem:[%s4039_s1 + $0x38c] ss:$16 sps:$4 sm:$0xff]   ;;  %v2848_v55 = vld [vmem:[%s4039_s1 + $0x380] ss:$16 sps:$4 sm:$0xff]  }
  0x37   :  { %1638 = vmatpush1.bf16.msra.mxu0 %v2760_v56  ;;  %1802 = vmatpush1.bf16.msra.mxu1 %v2761_v57  ;;  %v2851_v56 = vld [vmem:[%s4039_s1 + $0x388] ss:$16 sps:$4 sm:$0xff]   ;;  %v2856_v57 = vld [vmem:[%s4039_s1 + $0x3a4] ss:$16 sps:$4 sm:$0xff]  }
  0x38   :  { %1639 = vmatprep.subr.bf16.mxu0 %v2762_v58  ;;  %1803 = vmatprep.subr.bf16.mxu1 %v2764_v59  ;;  %v2859_v58 = vld [vmem:[%s4039_s1 + $0x3ac] ss:$16 sps:$4 sm:$0xff]   ;;  %v2854_v59 = vld [vmem:[%s4039_s1 + $0x3a0] ss:$16 sps:$4 sm:$0xff]  }
  0x3b   :  { %1640 = vmatpush1.bf16.msra.mxu0 %v2766_v60  ;;  %1804 = vmatpush1.bf16.msra.mxu1 %v2767_v61  ;;  %v2857_v60 = vld [vmem:[%s4039_s1 + $0x3a8] ss:$16 sps:$4 sm:$0xff]   ;;  %v2862_v61 = vld [vmem:[%s4039_s1 + $0x3c4] ss:$16 sps:$4 sm:$0xff]  }
  0x3c   :  { %1641 = vmatprep.subr.bf16.mxu0 %v2768_v62  ;;  %1805 = vmatprep.subr.bf16.mxu1 %v2770_v63  ;;  %v2865_v62 = vld [vmem:[%s4039_s1 + $0x3cc] ss:$16 sps:$4 sm:$0xff]   ;;  %v2860_v63 = vld [vmem:[%s4039_s1 + $0x3c0] ss:$16 sps:$4 sm:$0xff]  }
  0x3f   :  { %1642 = vmatpush1.bf16.msra.mxu0 %v2772_v0  ;;  %1806 = vmatpush1.bf16.msra.mxu1 %v2773_v1  ;;  %v2863_v0 = vld [vmem:[%s4039_s1 + $0x3c8] ss:$16 sps:$4 sm:$0xff]   ;;  %v2868_v1 = vld [vmem:[%s4039_s1 + $0x3e4] ss:$16 sps:$4 sm:$0xff]  }
  0x40   :  { %1652 = vmatprep.subr.bf16.mxu0 %v2778_v2  ;;  %1816 = vmatprep.subr.bf16.mxu1 %v2781_v3  ;;  %v2871_v2 = vld [vmem:[%s4039_s1 + $0x3ec] ss:$16 sps:$4 sm:$0xff]   ;;  %v2866_v3 = vld [vmem:[%s4039_s1 + $0x3e0] ss:$16 sps:$4 sm:$0xff]  }
  0x42   :  { %1644 = vmatmul.mubr.bf16.vlgmr.msra.gmra.mrb[0].mxu0 %v2309_v4  ;;  %1808 = vmatmul.mubr.bf16.vlgmr.msra.gmra.mrb[0].mxu1 %v2309_v4  ;;  %v2869_v4 = vld [vmem:[%s4039_s1 + $0x3e8] ss:$16 sps:$4 sm:$0xff]  }
  0x43   :  { %1653 = vmatpush1.bf16.msra.mxu0 %v2776_v5  ;;  %1817 = vmatpush1.bf16.msra.mxu1 %v2779_v6  ;;  %v2876_v5 = vld [vmem:[%s4039_s1 + $0x404] ss:$16 sps:$4 sm:$0xff]   ;;  %v2879_v6 = vld [vmem:[%s4039_s1 + $0x40c] ss:$16 sps:$4 sm:$0xff]  }
  0x44   :  { %1654 = vmatprep.subr.bf16.mxu0 %v2784_v7  ;;  %1818 = vmatprep.subr.bf16.mxu1 %v2787_v8  ;;  %v2311_v7 = vcombine.low %v3412_v29, %v3412_v29  ;;  %v2874_v8 = vld [vmem:[%s4039_s1 + $0x400] ss:$16 sps:$4 sm:$0xff]   ;;  %v2909_v29 = vld [vmem:[%s4039_s1 + $0x4ac] ss:$16 sps:$4 sm:$0xff]  }
  0x45   :  { %1684 = vmatprep.mubr.bf16.mxu0 %v2312_v30  ;;  %1848 = vmatprep.mubr.bf16.mxu1 %v2312_v30  ;;  %v2904_v30 = vld [vmem:[%s4039_s1 + $0x4a0] ss:$16 sps:$4 sm:$0xff]  }
  0x47   :  { %1655 = vmatpush1.bf16.msra.mxu0 %v2782_v9  ;;  %1819 = vmatpush1.bf16.msra.mxu1 %v2785_v10  ;;  %v2877_v9 = vld [vmem:[%s4039_s1 + $0x408] ss:$16 sps:$4 sm:$0xff]   ;;  %v2882_v10 = vld [vmem:[%s4039_s1 + $0x424] ss:$16 sps:$4 sm:$0xff]  }
  0x48   :  { %1656 = vmatprep.subr.bf16.mxu0 %v2790_v11  ;;  %1820 = vmatprep.subr.bf16.mxu1 %v2793_v12  ;;  %v3550_v11 = vld [vmem:[%s4040_s0 + $0x10] sm:$0xff]  ;;  %v2885_v12 = vld [vmem:[%s4039_s1 + $0x42c] ss:$16 sps:$4 sm:$0xff]  }
  0x4b   :  { %1657 = vmatpush1.bf16.msra.mxu0 %v2788_v13  ;;  %1821 = vmatpush1.bf16.msra.mxu1 %v2791_v14  ;;  %v2314_v13 = vcombine.high %v3550_v11, %v3550_v11  ;;  %v2880_v14 = vld [vmem:[%s4039_s1 + $0x420] ss:$16 sps:$4 sm:$0xff]  }
  0x4c   :  { %1658 = vmatprep.subr.bf16.mxu0 %v2796_v15  ;;  %1822 = vmatprep.subr.bf16.mxu1 %v2799_v16  ;;  %v2883_v15 = vld [vmem:[%s4039_s1 + $0x428] ss:$16 sps:$4 sm:$0xff]   ;;  %v2888_v16 = vld [vmem:[%s4039_s1 + $0x444] ss:$16 sps:$4 sm:$0xff]  }
  0x4f   :  { %1659 = vmatpush1.bf16.msra.mxu0 %v2794_v17  ;;  %1823 = vmatpush1.bf16.msra.mxu1 %v2797_v18  ;;  %v2891_v17 = vld [vmem:[%s4039_s1 + $0x44c] ss:$16 sps:$4 sm:$0xff]   ;;  %v2886_v18 = vld [vmem:[%s4039_s1 + $0x440] ss:$16 sps:$4 sm:$0xff]  }
  0x50   :  { %1660 = vmatprep.subr.bf16.mxu0 %v2802_v19  ;;  %1824 = vmatprep.subr.bf16.mxu1 %v2805_v20  ;;  %v2889_v19 = vld [vmem:[%s4039_s1 + $0x448] ss:$16 sps:$4 sm:$0xff]   ;;  %v2894_v20 = vld [vmem:[%s4039_s1 + $0x464] ss:$16 sps:$4 sm:$0xff]  }
  0x53   :  { %1661 = vmatpush1.bf16.msra.mxu0 %v2800_v21  ;;  %1825 = vmatpush1.bf16.msra.mxu1 %v2803_v22  ;;  %v2897_v21 = vld [vmem:[%s4039_s1 + $0x46c] ss:$16 sps:$4 sm:$0xff]   ;;  %v2892_v22 = vld [vmem:[%s4039_s1 + $0x460] ss:$16 sps:$4 sm:$0xff]  }
  0x54   :  { %1662 = vmatprep.subr.bf16.mxu0 %v2808_v23  ;;  %1826 = vmatprep.subr.bf16.mxu1 %v2811_v24  ;;  %v2895_v23 = vld [vmem:[%s4039_s1 + $0x468] ss:$16 sps:$4 sm:$0xff]   ;;  %v2900_v24 = vld [vmem:[%s4039_s1 + $0x484] ss:$16 sps:$4 sm:$0xff]  }
  0x57   :  { %1663 = vmatpush1.bf16.msra.mxu0 %v2806_v25  ;;  %1827 = vmatpush1.bf16.msra.mxu1 %v2809_v26  ;;  %v2903_v25 = vld [vmem:[%s4039_s1 + $0x48c] ss:$16 sps:$4 sm:$0xff]   ;;  %v2898_v26 = vld [vmem:[%s4039_s1 + $0x480] ss:$16 sps:$4 sm:$0xff]  }
  0x58   :  { %1664 = vmatprep.subr.bf16.mxu0 %v2814_v27  ;;  %1828 = vmatprep.subr.bf16.mxu1 %v2817_v28  ;;  %v2901_v27 = vld [vmem:[%s4039_s1 + $0x488] ss:$16 sps:$4 sm:$0xff]   ;;  %v2906_v28 = vld [vmem:[%s4039_s1 + $0x4a4] ss:$16 sps:$4 sm:$0xff]  }
  0x5b   :  { %1665 = vmatpush1.bf16.msra.mxu0 %v2812_v31  ;;  %1829 = vmatpush1.bf16.msra.mxu1 %v2815_v32  ;;  %v2907_v31 = vld [vmem:[%s4039_s1 + $0x4a8] ss:$16 sps:$4 sm:$0xff]   ;;  %v2912_v32 = vld [vmem:[%s4039_s1 + $0x4c4] ss:$16 sps:$4 sm:$0xff]  }
  0x5c   :  { %1666 = vmatprep.subr.bf16.mxu0 %v2820_v33  ;;  %1830 = vmatprep.subr.bf16.mxu1 %v2823_v34  ;;  %v2915_v33 = vld [vmem:[%s4039_s1 + $0x4cc] ss:$16 sps:$4 sm:$0xff]   ;;  %v2910_v34 = vld [vmem:[%s4039_s1 + $0x4c0] ss:$16 sps:$4 sm:$0xff]  }
  0x5f   :  { %1667 = vmatpush1.bf16.msra.mxu0 %v2818_v35  ;;  %1831 = vmatpush1.bf16.msra.mxu1 %v2821_v36  ;;  %v2913_v35 = vld [vmem:[%s4039_s1 + $0x4c8] ss:$16 sps:$4 sm:$0xff]   ;;  %v2918_v36 = vld [vmem:[%s4039_s1 + $0x4e4] ss:$16 sps:$4 sm:$0xff]  }
  0x60   :  { %1668 = vmatprep.subr.bf16.mxu0 %v2826_v37  ;;  %1832 = vmatprep.subr.bf16.mxu1 %v2829_v38  ;;  %v2921_v37 = vld [vmem:[%s4039_s1 + $0x4ec] ss:$16 sps:$4 sm:$0xff]   ;;  %v2916_v38 = vld [vmem:[%s4039_s1 + $0x4e0] ss:$16 sps:$4 sm:$0xff]  }
  0x63   :  { %1669 = vmatpush1.bf16.msra.mxu0 %v2824_v39  ;;  %1833 = vmatpush1.bf16.msra.mxu1 %v2827_v40  ;;  %v2919_v39 = vld [vmem:[%s4039_s1 + $0x4e8] ss:$16 sps:$4 sm:$0xff]   ;;  %v2924_v40 = vld [vmem:[%s4039_s1 + $0x504] ss:$16 sps:$4 sm:$0xff]  }
  0x64   :  { %1670 = vmatprep.subr.bf16.mxu0 %v2832_v41  ;;  %1834 = vmatprep.subr.bf16.mxu1 %v2835_v42  ;;  %v2927_v41 = vld [vmem:[%s4039_s1 + $0x50c] ss:$16 sps:$4 sm:$0xff]   ;;  %v2922_v42 = vld [vmem:[%s4039_s1 + $0x500] ss:$16 sps:$4 sm:$0xff]  }
  0x67   :  { %1671 = vmatpush1.bf16.msra.mxu0 %v2830_v43  ;;  %1835 = vmatpush1.bf16.msra.mxu1 %v2833_v44  ;;  %v2925_v43 = vld [vmem:[%s4039_s1 + $0x508] ss:$16 sps:$4 sm:$0xff]   ;;  %v2930_v44 = vld [vmem:[%s4039_s1 + $0x524] ss:$16 sps:$4 sm:$0xff]  }
  0x68   :  { %1672 = vmatprep.subr.bf16.mxu0 %v2838_v45  ;;  %1836 = vmatprep.subr.bf16.mxu1 %v2841_v46  ;;  %v2933_v45 = vld [vmem:[%s4039_s1 + $0x52c] ss:$16 sps:$4 sm:$0xff]   ;;  %v2928_v46 = vld [vmem:[%s4039_s1 + $0x520] ss:$16 sps:$4 sm:$0xff]  }
  0x6b   :  { %1673 = vmatpush1.bf16.msra.mxu0 %v2836_v47  ;;  %1837 = vmatpush1.bf16.msra.mxu1 %v2839_v48  ;;  %v2931_v47 = vld [vmem:[%s4039_s1 + $0x528] ss:$16 sps:$4 sm:$0xff]   ;;  %v2936_v48 = vld [vmem:[%s4039_s1 + $0x544] ss:$16 sps:$4 sm:$0xff]  }
  0x6c   :  { %1674 = vmatprep.subr.bf16.mxu0 %v2844_v49  ;;  %1838 = vmatprep.subr.bf16.mxu1 %v2847_v50  ;;  %v2939_v49 = vld [vmem:[%s4039_s1 + $0x54c] ss:$16 sps:$4 sm:$0xff]   ;;  %v2934_v50 = vld [vmem:[%s4039_s1 + $0x540] ss:$16 sps:$4 sm:$0xff]  }
  0x6f   :  { %1675 = vmatpush1.bf16.msra.mxu0 %v2842_v51  ;;  %1839 = vmatpush1.bf16.msra.mxu1 %v2845_v52  ;;  %v2937_v51 = vld [vmem:[%s4039_s1 + $0x548] ss:$16 sps:$4 sm:$0xff]   ;;  %v2942_v52 = vld [vmem:[%s4039_s1 + $0x564] ss:$16 sps:$4 sm:$0xff]  }
  0x70   :  { %1676 = vmatprep.subr.bf16.mxu0 %v2850_v53  ;;  %1840 = vmatprep.subr.bf16.mxu1 %v2853_v54  ;;  %v2945_v53 = vld [vmem:[%s4039_s1 + $0x56c] ss:$16 sps:$4 sm:$0xff]   ;;  %v2940_v54 = vld [vmem:[%s4039_s1 + $0x560] ss:$16 sps:$4 sm:$0xff]  }
  0x73   :  { %1677 = vmatpush1.bf16.msra.mxu0 %v2848_v55  ;;  %1841 = vmatpush1.bf16.msra.mxu1 %v2851_v56  ;;  %v2943_v55 = vld [vmem:[%s4039_s1 + $0x568] ss:$16 sps:$4 sm:$0xff]   ;;  %v2948_v56 = vld [vmem:[%s4039_s1 + $0x584] ss:$16 sps:$4 sm:$0xff]  }
  0x74   :  { %1678 = vmatprep.subr.bf16.mxu0 %v2856_v57  ;;  %1842 = vmatprep.subr.bf16.mxu1 %v2859_v58  ;;  %v2951_v57 = vld [vmem:[%s4039_s1 + $0x58c] ss:$16 sps:$4 sm:$0xff]   ;;  %v2946_v58 = vld [vmem:[%s4039_s1 + $0x580] ss:$16 sps:$4 sm:$0xff]  }
  0x77   :  { %1679 = vmatpush1.bf16.msra.mxu0 %v2854_v59  ;;  %1843 = vmatpush1.bf16.msra.mxu1 %v2857_v60  ;;  %v2949_v59 = vld [vmem:[%s4039_s1 + $0x588] ss:$16 sps:$4 sm:$0xff]   ;;  %v2954_v60 = vld [vmem:[%s4039_s1 + $0x5a4] ss:$16 sps:$4 sm:$0xff]  }
  0x78   :  { %1680 = vmatprep.subr.bf16.mxu0 %v2862_v61  ;;  %1844 = vmatprep.subr.bf16.mxu1 %v2865_v62  ;;  %v2957_v61 = vld [vmem:[%s4039_s1 + $0x5ac] ss:$16 sps:$4 sm:$0xff]   ;;  %v2952_v62 = vld [vmem:[%s4039_s1 + $0x5a0] ss:$16 sps:$4 sm:$0xff]  }
  0x7b   :  { %1681 = vmatpush1.bf16.msra.mxu0 %v2860_v63  ;;  %1845 = vmatpush1.bf16.msra.mxu1 %v2863_v0  ;;  %v2955_v63 = vld [vmem:[%s4039_s1 + $0x5a8] ss:$16 sps:$4 sm:$0xff]   ;;  %v2960_v0 = vld [vmem:[%s4039_s1 + $0x5c4] ss:$16 sps:$4 sm:$0xff]  }
  0x7c   :  { %1682 = vmatprep.subr.bf16.mxu0 %v2868_v1  ;;  %1846 = vmatprep.subr.bf16.mxu1 %v2871_v2  ;;  %v2963_v1 = vld [vmem:[%s4039_s1 + $0x5cc] ss:$16 sps:$4 sm:$0xff]   ;;  %v2958_v2 = vld [vmem:[%s4039_s1 + $0x5c0] ss:$16 sps:$4 sm:$0xff]  }
  0x7f   :  { %1683 = vmatpush1.bf16.msra.mxu0 %v2866_v3  ;;  %1847 = vmatpush1.bf16.msra.mxu1 %v2869_v4  ;;  %v2961_v3 = vld [vmem:[%s4039_s1 + $0x5c8] ss:$16 sps:$4 sm:$0xff]   ;;  %v2966_v4 = vld [vmem:[%s4039_s1 + $0x5e4] ss:$16 sps:$4 sm:$0xff]  }
  0x80   :  { %1693 = vmatprep.subr.bf16.mxu0 %v2876_v5  ;;  %1857 = vmatprep.subr.bf16.mxu1 %v2879_v6  ;;  %v2969_v5 = vld [vmem:[%s4039_s1 + $0x5ec] ss:$16 sps:$4 sm:$0xff]   ;;  %v2964_v6 = vld [vmem:[%s4039_s1 + $0x5e0] ss:$16 sps:$4 sm:$0xff]  }
  0x82   :  { %1685 = vmatmul.mubr.bf16.vlgmr.msra.gmra.mrb[0].mxu0 %v2311_v7  ;;  %1849 = vmatmul.mubr.bf16.vlgmr.msra.gmra.mrb[0].mxu1 %v2311_v7  ;;  %v2967_v7 = vld [vmem:[%s4039_s1 + $0x5e8] ss:$16 sps:$4 sm:$0xff]  }
  0x83   :  { %1694 = vmatpush1.bf16.msra.mxu0 %v2874_v8  ;;  %1858 = vmatpush1.bf16.msra.mxu1 %v2877_v9  ;;  %v2974_v8 = vld [vmem:[%s4039_s1 + $0x604] ss:$16 sps:$4 sm:$0xff]   ;;  %v2977_v9 = vld [vmem:[%s4039_s1 + $0x60c] ss:$16 sps:$4 sm:$0xff]  }
  0x84   :  { %1695 = vmatprep.subr.bf16.mxu0 %v2882_v10  ;;  %1859 = vmatprep.subr.bf16.mxu1 %v2885_v12  ;;  %v2972_v10 = vld [vmem:[%s4039_s1 + $0x600] ss:$16 sps:$4 sm:$0xff]   ;;  %v2975_v12 = vld [vmem:[%s4039_s1 + $0x608] ss:$16 sps:$4 sm:$0xff]  }
  0x85   :  { %1725 = vmatprep.mubr.bf16.mxu0 %v2314_v13  ;;  %1889 = vmatprep.mubr.bf16.mxu1 %v2314_v13  ;;  %v2313_v13 = vcombine.low %v3550_v11, %v3550_v11  ;;  %v2978_v11 = vld [vmem:[%s4039_s1 + $0x620] ss:$16 sps:$4 sm:$0xff]  }
  0x87   :  { %1696 = vmatpush1.bf16.msra.mxu0 %v2880_v14  ;;  %1860 = vmatpush1.bf16.msra.mxu1 %v2883_v15  ;;  %v3748_v14 = vld [vmem:[%s4040_s0 + $0x18] sm:$0xff]  ;;  %v2980_v15 = vld [vmem:[%s4039_s1 + $0x624] ss:$16 sps:$4 sm:$0xff]  }
  0x88   :  { %1697 = vmatprep.subr.bf16.mxu0 %v2888_v16  ;;  %1861 = vmatprep.subr.bf16.mxu1 %v2891_v17  ;;  %v2983_v16 = vld [vmem:[%s4039_s1 + $0x62c] ss:$16 sps:$4 sm:$0xff]   ;;  %v2981_v17 = vld [vmem:[%s4039_s1 + $0x628] ss:$16 sps:$4 sm:$0xff]  }
  0x8b   :  { %1698 = vmatpush1.bf16.msra.mxu0 %v2886_v18  ;;  %1862 = vmatpush1.bf16.msra.mxu1 %v2889_v19  ;;  %v2316_v18 = vcombine.high %v3748_v14, %v3748_v14  ;;  %v2986_v19 = vld [vmem:[%s4039_s1 + $0x644] ss:$16 sps:$4 sm:$0xff]  }
  0x8c   :  { %1699 = vmatprep.subr.bf16.mxu0 %v2894_v20  ;;  %1863 = vmatprep.subr.bf16.mxu1 %v2897_v21  ;;  %v2989_v20 = vld [vmem:[%s4039_s1 + $0x64c] ss:$16 sps:$4 sm:$0xff]   ;;  %v2984_v21 = vld [vmem:[%s4039_s1 + $0x640] ss:$16 sps:$4 sm:$0xff]  }
  0x8f   :  { %1700 = vmatpush1.bf16.msra.mxu0 %v2892_v22  ;;  %1864 = vmatpush1.bf16.msra.mxu1 %v2895_v23  ;;  %v2987_v22 = vld [vmem:[%s4039_s1 + $0x648] ss:$16 sps:$4 sm:$0xff]   ;;  %v2992_v23 = vld [vmem:[%s4039_s1 + $0x664] ss:$16 sps:$4 sm:$0xff]  }
  0x90   :  { %1701 = vmatprep.subr.bf16.mxu0 %v2900_v24  ;;  %1865 = vmatprep.subr.bf16.mxu1 %v2903_v25  ;;  %v2995_v24 = vld [vmem:[%s4039_s1 + $0x66c] ss:$16 sps:$4 sm:$0xff]   ;;  %v2990_v25 = vld [vmem:[%s4039_s1 + $0x660] ss:$16 sps:$4 sm:$0xff]  }
  0x93   :  { %1702 = vmatpush1.bf16.msra.mxu0 %v2898_v26  ;;  %1866 = vmatpush1.bf16.msra.mxu1 %v2901_v27  ;;  %v2993_v26 = vld [vmem:[%s4039_s1 + $0x668] ss:$16 sps:$4 sm:$0xff]   ;;  %v2998_v27 = vld [vmem:[%s4039_s1 + $0x684] ss:$16 sps:$4 sm:$0xff]  }
  0x94   :  { %1703 = vmatprep.subr.bf16.mxu0 %v2906_v28  ;;  %1867 = vmatprep.subr.bf16.mxu1 %v2909_v29  ;;  %v3001_v28 = vld [vmem:[%s4039_s1 + $0x68c] ss:$16 sps:$4 sm:$0xff]   ;;  %v2996_v29 = vld [vmem:[%s4039_s1 + $0x680] ss:$16 sps:$4 sm:$0xff]  }
  0x97   :  { %1704 = vmatpush1.bf16.msra.mxu0 %v2904_v30  ;;  %1868 = vmatpush1.bf16.msra.mxu1 %v2907_v31  ;;  %v2999_v30 = vld [vmem:[%s4039_s1 + $0x688] ss:$16 sps:$4 sm:$0xff]   ;;  %v3004_v31 = vld [vmem:[%s4039_s1 + $0x6a4] ss:$16 sps:$4 sm:$0xff]  }
  0x98   :  { %1705 = vmatprep.subr.bf16.mxu0 %v2912_v32  ;;  %1869 = vmatprep.subr.bf16.mxu1 %v2915_v33  ;;  %v3007_v32 = vld [vmem:[%s4039_s1 + $0x6ac] ss:$16 sps:$4 sm:$0xff]   ;;  %v3002_v33 = vld [vmem:[%s4039_s1 + $0x6a0] ss:$16 sps:$4 sm:$0xff]  }
  0x9b   :  { %1706 = vmatpush1.bf16.msra.mxu0 %v2910_v34  ;;  %1870 = vmatpush1.bf16.msra.mxu1 %v2913_v35  ;;  %v3005_v34 = vld [vmem:[%s4039_s1 + $0x6a8] ss:$16 sps:$4 sm:$0xff]   ;;  %v3010_v35 = vld [vmem:[%s4039_s1 + $0x6c4] ss:$16 sps:$4 sm:$0xff]  }
  0x9c   :  { %1707 = vmatprep.subr.bf16.mxu0 %v2918_v36  ;;  %1871 = vmatprep.subr.bf16.mxu1 %v2921_v37  ;;  %v3013_v36 = vld [vmem:[%s4039_s1 + $0x6cc] ss:$16 sps:$4 sm:$0xff]   ;;  %v3008_v37 = vld [vmem:[%s4039_s1 + $0x6c0] ss:$16 sps:$4 sm:$0xff]  }
  0x9f   :  { %1708 = vmatpush1.bf16.msra.mxu0 %v2916_v38  ;;  %1872 = vmatpush1.bf16.msra.mxu1 %v2919_v39  ;;  %v3011_v38 = vld [vmem:[%s4039_s1 + $0x6c8] ss:$16 sps:$4 sm:$0xff]   ;;  %v3016_v39 = vld [vmem:[%s4039_s1 + $0x6e4] ss:$16 sps:$4 sm:$0xff]  }
  0xa0   :  { %1709 = vmatprep.subr.bf16.mxu0 %v2924_v40  ;;  %1873 = vmatprep.subr.bf16.mxu1 %v2927_v41  ;;  %v3019_v40 = vld [vmem:[%s4039_s1 + $0x6ec] ss:$16 sps:$4 sm:$0xff]   ;;  %v3014_v41 = vld [vmem:[%s4039_s1 + $0x6e0] ss:$16 sps:$4 sm:$0xff]  }
  0xa3   :  { %1710 = vmatpush1.bf16.msra.mxu0 %v2922_v42  ;;  %1874 = vmatpush1.bf16.msra.mxu1 %v2925_v43  ;;  %v3017_v42 = vld [vmem:[%s4039_s1 + $0x6e8] ss:$16 sps:$4 sm:$0xff]   ;;  %v3022_v43 = vld [vmem:[%s4039_s1 + $0x704] ss:$16 sps:$4 sm:$0xff]  }
  0xa4   :  { %1711 = vmatprep.subr.bf16.mxu0 %v2930_v44  ;;  %1875 = vmatprep.subr.bf16.mxu1 %v2933_v45  ;;  %v3025_v44 = vld [vmem:[%s4039_s1 + $0x70c] ss:$16 sps:$4 sm:$0xff]   ;;  %v3020_v45 = vld [vmem:[%s4039_s1 + $0x700] ss:$16 sps:$4 sm:$0xff]  }
  0xa7   :  { %1712 = vmatpush1.bf16.msra.mxu0 %v2928_v46  ;;  %1876 = vmatpush1.bf16.msra.mxu1 %v2931_v47  ;;  %v3023_v46 = vld [vmem:[%s4039_s1 + $0x708] ss:$16 sps:$4 sm:$0xff]   ;;  %v3028_v47 = vld [vmem:[%s4039_s1 + $0x724] ss:$16 sps:$4 sm:$0xff]  }
  0xa8   :  { %1713 = vmatprep.subr.bf16.mxu0 %v2936_v48  ;;  %1877 = vmatprep.subr.bf16.mxu1 %v2939_v49  ;;  %v3031_v48 = vld [vmem:[%s4039_s1 + $0x72c] ss:$16 sps:$4 sm:$0xff]   ;;  %v3026_v49 = vld [vmem:[%s4039_s1 + $0x720] ss:$16 sps:$4 sm:$0xff]  }
  0xab   :  { %1714 = vmatpush1.bf16.msra.mxu0 %v2934_v50  ;;  %1878 = vmatpush1.bf16.msra.mxu1 %v2937_v51  ;;  %v3029_v50 = vld [vmem:[%s4039_s1 + $0x728] ss:$16 sps:$4 sm:$0xff]   ;;  %v3034_v51 = vld [vmem:[%s4039_s1 + $0x744] ss:$16 sps:$4 sm:$0xff]  }
  0xac   :  { %1715 = vmatprep.subr.bf16.mxu0 %v2942_v52  ;;  %1879 = vmatprep.subr.bf16.mxu1 %v2945_v53  ;;  %v3037_v52 = vld [vmem:[%s4039_s1 + $0x74c] ss:$16 sps:$4 sm:$0xff]   ;;  %v3032_v53 = vld [vmem:[%s4039_s1 + $0x740] ss:$16 sps:$4 sm:$0xff]  }
  0xaf   :  { %1716 = vmatpush1.bf16.msra.mxu0 %v2940_v54  ;;  %1880 = vmatpush1.bf16.msra.mxu1 %v2943_v55  ;;  %v3035_v54 = vld [vmem:[%s4039_s1 + $0x748] ss:$16 sps:$4 sm:$0xff]   ;;  %v3040_v55 = vld [vmem:[%s4039_s1 + $0x764] ss:$16 sps:$4 sm:$0xff]  }
  0xb0   :  { %1717 = vmatprep.subr.bf16.mxu0 %v2948_v56  ;;  %1881 = vmatprep.subr.bf16.mxu1 %v2951_v57  ;;  %v3043_v56 = vld [vmem:[%s4039_s1 + $0x76c] ss:$16 sps:$4 sm:$0xff]   ;;  %v3038_v57 = vld [vmem:[%s4039_s1 + $0x760] ss:$16 sps:$4 sm:$0xff]  }
  0xb3   :  { %1718 = vmatpush1.bf16.msra.mxu0 %v2946_v58  ;;  %1882 = vmatpush1.bf16.msra.mxu1 %v2949_v59  ;;  %v3041_v58 = vld [vmem:[%s4039_s1 + $0x768] ss:$16 sps:$4 sm:$0xff]   ;;  %v3046_v59 = vld [vmem:[%s4039_s1 + $0x784] ss:$16 sps:$4 sm:$0xff]  }
  0xb4   :  { %1719 = vmatprep.subr.bf16.mxu0 %v2954_v60  ;;  %1883 = vmatprep.subr.bf16.mxu1 %v2957_v61  ;;  %v3049_v60 = vld [vmem:[%s4039_s1 + $0x78c] ss:$16 sps:$4 sm:$0xff]   ;;  %v3044_v61 = vld [vmem:[%s4039_s1 + $0x780] ss:$16 sps:$4 sm:$0xff]  }
  0xb7   :  { %1720 = vmatpush1.bf16.msra.mxu0 %v2952_v62  ;;  %1884 = vmatpush1.bf16.msra.mxu1 %v2955_v63  ;;  %v3047_v62 = vld [vmem:[%s4039_s1 + $0x788] ss:$16 sps:$4 sm:$0xff]   ;;  %v3052_v63 = vld [vmem:[%s4039_s1 + $0x7a4] ss:$16 sps:$4 sm:$0xff]  }
  0xb8   :  { %1721 = vmatprep.subr.bf16.mxu0 %v2960_v0  ;;  %1885 = vmatprep.subr.bf16.mxu1 %v2963_v1  ;;  %v3055_v0 = vld [vmem:[%s4039_s1 + $0x7ac] ss:$16 sps:$4 sm:$0xff]   ;;  %v3050_v1 = vld [vmem:[%s4039_s1 + $0x7a0] ss:$16 sps:$4 sm:$0xff]  }
  0xbb   :  { %1722 = vmatpush1.bf16.msra.mxu0 %v2958_v2  ;;  %1886 = vmatpush1.bf16.msra.mxu1 %v2961_v3  ;;  %v3053_v2 = vld [vmem:[%s4039_s1 + $0x7a8] ss:$16 sps:$4 sm:$0xff]   ;;  %v3058_v3 = vld [vmem:[%s4039_s1 + $0x7c4] ss:$16 sps:$4 sm:$0xff]  }
  0xbc   :  { %1723 = vmatprep.subr.bf16.mxu0 %v2966_v4  ;;  %1887 = vmatprep.subr.bf16.mxu1 %v2969_v5  ;;  %v3061_v4 = vld [vmem:[%s4039_s1 + $0x7cc] ss:$16 sps:$4 sm:$0xff]   ;;  %v3056_v5 = vld [vmem:[%s4039_s1 + $0x7c0] ss:$16 sps:$4 sm:$0xff]  }
  0xbf   :  { %1724 = vmatpush1.bf16.msra.mxu0 %v2964_v6  ;;  %1888 = vmatpush1.bf16.msra.mxu1 %v2967_v7  ;;  %v3059_v6 = vld [vmem:[%s4039_s1 + $0x7c8] ss:$16 sps:$4 sm:$0xff]   ;;  %v3064_v7 = vld [vmem:[%s4039_s1 + $0x7e4] ss:$16 sps:$4 sm:$0xff]  }
  0xc0   :  { %1734 = vmatprep.subr.bf16.mxu0 %v2974_v8  ;;  %1898 = vmatprep.subr.bf16.mxu1 %v2977_v9  ;;  %v3067_v8 = vld [vmem:[%s4039_s1 + $0x7ec] ss:$16 sps:$4 sm:$0xff]   ;;  %v3062_v9 = vld [vmem:[%s4039_s1 + $0x7e0] ss:$16 sps:$4 sm:$0xff]  }
  0xc2   :  { %1726 = vmatmul.mubr.bf16.vlgmr.msra.gmra.mrb[0].mxu0 %v2313_v13  ;;  %1890 = vmatmul.mubr.bf16.vlgmr.msra.gmra.mrb[0].mxu1 %v2313_v13  ;;  %v3071_v13 = vld [vmem:[%s4041_s3 + $0xc0] sm:$0xff]  }
  0xc3   :  { %1735 = vmatpush1.bf16.msra.mxu0 %v2972_v10  ;;  %1899 = vmatpush1.bf16.msra.mxu1 %v2975_v12  ;;  %v3065_v10 = vld [vmem:[%s4039_s1 + $0x7e8] ss:$16 sps:$4 sm:$0xff]   ;;  %v3070_v12 = vld [vmem:[%s4041_s3 + $0x40] sm:$0xff]  }
  0xc4   :  { %1736 = vmatprep.subr.bf16.mxu0 %v2980_v15  ;;  %1900 = vmatprep.subr.bf16.mxu1 %v2983_v16  ;;  %v2315_v15 = vcombine.low %v3748_v14, %v3748_v14  ;;  %v3072_v16 = vld [vmem:[%s4041_s3] sm:$0xff]   ;;  %v3075_v14 = vld [vmem:[%s4041_s3 + $0xc8] sm:$0xff]  }
  0xc5   :  { %1766 = vmatprep.mubr.bf16.mxu0 %v2316_v18  ;;  %1930 = vmatprep.mubr.bf16.mxu1 %v2316_v18  ;;  %v3076_v18 = vld [vmem:[%s4041_s3 + $0x8] sm:$0xff]  }
  0xc7   :  { %1737 = vmatpush1.bf16.msra.mxu0 %v2978_v11  ;;  %1901 = vmatpush1.bf16.msra.mxu1 %v2981_v17  ;;  %v3073_v11 = vld [vmem:[%s4041_s3 + $0x80] sm:$0xff]   ;;  %v3074_v17 = vld [vmem:[%s4041_s3 + $0x48] sm:$0xff]  }
  0xc8   :  { %1738 = vmatprep.subr.bf16.mxu0 %v2986_v19  ;;  %1902 = vmatprep.subr.bf16.mxu1 %v2989_v20  ;;  %v3077_v19 = vld [vmem:[%s4041_s3 + $0x88] sm:$0xff]   ;;  %v3078_v20 = vld [vmem:[%s4041_s3 + $0x50] sm:$0xff]  }
  0xcb   :  { %1739 = vmatpush1.bf16.msra.mxu0 %v2984_v21  ;;  %1903 = vmatpush1.bf16.msra.mxu1 %v2987_v22  ;;  %v3079_v21 = vld [vmem:[%s4041_s3 + $0xd0] sm:$0xff]  }
  0xcc   :  { %1740 = vmatprep.subr.bf16.mxu0 %v2992_v23  ;;  %1904 = vmatprep.subr.bf16.mxu1 %v2995_v24  ;;  %v3080_v22 = vld [vmem:[%s4041_s3 + $0x10] sm:$0xff]   ;;  %v3082_v24 = vld [vmem:[%s4041_s3 + $0x58] sm:$0xff]  }
  0xcd   :  { %v3081_v23 = vld [vmem:[%s4041_s3 + $0x90] sm:$0xff]  }
  0xcf   :  { %1741 = vmatpush1.bf16.msra.mxu0 %v2990_v25  ;;  %1905 = vmatpush1.bf16.msra.mxu1 %v2993_v26  ;;  %v3083_v25 = vld [vmem:[%s4041_s3 + $0xd8] sm:$0xff]  }
  0xd0   :  { %1742 = vmatprep.subr.bf16.mxu0 %v2998_v27  ;;  %1906 = vmatprep.subr.bf16.mxu1 %v3001_v28  ;;  %v3084_v26 = vld [vmem:[%s4041_s3 + $0x18] sm:$0xff]   ;;  %v3086_v28 = vld [vmem:[%s4041_s3 + $0x60] sm:$0xff]  }
  0xd1   :  { %v3085_v27 = vld [vmem:[%s4041_s3 + $0x98] sm:$0xff]  }
  0xd3   :  { %1743 = vmatpush1.bf16.msra.mxu0 %v2996_v29  ;;  %1907 = vmatpush1.bf16.msra.mxu1 %v2999_v30  ;;  %v3087_v29 = vld [vmem:[%s4041_s3 + $0xe0] sm:$0xff]  }
  0xd4   :  { %1744 = vmatprep.subr.bf16.mxu0 %v3004_v31  ;;  %1908 = vmatprep.subr.bf16.mxu1 %v3007_v32  ;;  %v3088_v30 = vld [vmem:[%s4041_s3 + $0x20] sm:$0xff]   ;;  %v3090_v32 = vld [vmem:[%s4041_s3 + $0x68] sm:$0xff]  }
  0xd5   :  { %v3089_v31 = vld [vmem:[%s4041_s3 + $0xa0] sm:$0xff]  }
  0xd7   :  { %1745 = vmatpush1.bf16.msra.mxu0 %v3002_v33  ;;  %1909 = vmatpush1.bf16.msra.mxu1 %v3005_v34  ;;  %v3091_v33 = vld [vmem:[%s4041_s3 + $0xe8] sm:$0xff]  }
  0xd8   :  { %1746 = vmatprep.subr.bf16.mxu0 %v3010_v35  ;;  %1910 = vmatprep.subr.bf16.mxu1 %v3013_v36  ;;  %v3092_v34 = vld [vmem:[%s4041_s3 + $0x28] sm:$0xff]   ;;  %v3094_v36 = vld [vmem:[%s4041_s3 + $0x70] sm:$0xff]  }
  0xd9   :  { %v3093_v35 = vld [vmem:[%s4041_s3 + $0xa8] sm:$0xff]  }
  0xdb   :  { %1747 = vmatpush1.bf16.msra.mxu0 %v3008_v37  ;;  %1911 = vmatpush1.bf16.msra.mxu1 %v3011_v38  ;;  %v3095_v37 = vld [vmem:[%s4041_s3 + $0xf0] sm:$0xff]  }
  0xdc   :  { %1748 = vmatprep.subr.bf16.mxu0 %v3016_v39  ;;  %1912 = vmatprep.subr.bf16.mxu1 %v3019_v40  ;;  %v3096_v38 = vld [vmem:[%s4041_s3 + $0x30] sm:$0xff]   ;;  %v3098_v40 = vld [vmem:[%s4041_s3 + $0x78] sm:$0xff]  }
  0xdd   :  { %v3097_v39 = vld [vmem:[%s4041_s3 + $0xb0] sm:$0xff]  }
  0xdf   :  { %1749 = vmatpush1.bf16.msra.mxu0 %v3014_v41  ;;  %1913 = vmatpush1.bf16.msra.mxu1 %v3017_v42  ;;  %v3099_v41 = vld [vmem:[%s4041_s3 + $0xf8] sm:$0xff]  }
  0xe0   :  { %1750 = vmatprep.subr.bf16.mxu0 %v3022_v43  ;;  %1914 = vmatprep.subr.bf16.mxu1 %v3025_v44  ;;  %v3100_v42 = vld [vmem:[%s4041_s3 + $0x38] sm:$0xff]   ;;  %v283_v44 = vlaneseq }
  0xe1   :  { %v3101_v43 = vld [vmem:[%s4041_s3 + $0xb8] sm:$0xff]  }
  0xe3   :  { %1751 = vmatpush1.bf16.msra.mxu0 %v3020_v45  ;;  %1915 = vmatpush1.bf16.msra.mxu1 %v3023_v46  ;;  %v284_v45 = vshrl.u32 %v283_v44, 7 }
  0xe4   :  { %1752 = vmatprep.subr.bf16.mxu0 %v3028_v47  ;;  %1916 = vmatprep.subr.bf16.mxu1 %v3031_v48  ;;  %v281_v48 = vld [vmem:[%s4042_s2] sm:$0xf] }
  0xe5   :  { %v285_v46 = vsub.s32 0, %v284_v45  ;;  %v293_v47 = vsub.s32 2, %v284_v45 }
  0xe7   :  { %1753 = vmatpush1.bf16.msra.mxu0 %v3026_v49  ;;  %1917 = vmatpush1.bf16.msra.mxu1 %v3029_v50  ;;  %v289_v49 = vsub.s32 1, %v284_v45  ;;  %v297_v50 = vsub.s32 3, %v284_v45 }
  0xe8   :  { %1754 = vmatprep.subr.bf16.mxu0 %v3034_v51  ;;  %1918 = vmatprep.subr.bf16.mxu1 %v3037_v52  ;;  %v286_v51 = vrot.slane %v281_v48, %v285_v46  ;;  %v294_v52 = vrot.slane %v281_v48, %v293_v47 }
  0xeb   :  { %1755 = vmatpush1.bf16.msra.mxu0 %v3032_v53  ;;  %1919 = vmatpush1.bf16.msra.mxu1 %v3035_v54  ;;  %v290_v53 = vrot.slane %v281_v48, %v289_v49  ;;  %v298_v54 = vrot.slane %v281_v48, %v297_v50 }
  0xec   :  { %1756 = vmatprep.subr.bf16.mxu0 %v3040_v55  ;;  %1920 = vmatprep.subr.bf16.mxu1 %v3043_v56 }
  0xef   :  { %1757 = vmatpush1.bf16.msra.mxu0 %v3038_v57  ;;  %1921 = vmatpush1.bf16.msra.mxu1 %v3041_v58 }
  0xf0   :  { %1758 = vmatprep.subr.bf16.mxu0 %v3046_v59  ;;  %1922 = vmatprep.subr.bf16.mxu1 %v3049_v60 }
  0xf3   :  { %1759 = vmatpush1.bf16.msra.mxu0 %v3044_v61  ;;  %1923 = vmatpush1.bf16.msra.mxu1 %v3047_v62 }
  0xf4   :  { %1760 = vmatprep.subr.bf16.mxu0 %v3052_v63  ;;  %1924 = vmatprep.subr.bf16.mxu1 %v3055_v0 }
  0xf7   :  { %1761 = vmatpush1.bf16.msra.mxu0 %v3050_v1  ;;  %1925 = vmatpush1.bf16.msra.mxu1 %v3053_v2 }
  0xf8   :  { %1762 = vmatprep.subr.bf16.mxu0 %v3058_v3  ;;  %1926 = vmatprep.subr.bf16.mxu1 %v3061_v4 }
  0xfb   :  { %1763 = vmatpush1.bf16.msra.mxu0 %v3056_v5  ;;  %1927 = vmatpush1.bf16.msra.mxu1 %v3059_v6 }
  0xfc   :  { %1764 = vmatprep.subr.bf16.mxu0 %v3064_v7  ;;  %1928 = vmatprep.subr.bf16.mxu1 %v3067_v8 }
  0xff   :  { %1765 = vmatpush1.bf16.msra.mxu0 %v3062_v9  ;;  %1929 = vmatpush1.bf16.msra.mxu1 %v3065_v10 }
 0x100   :  { %2606 = vmatprep.subr.bf16.mxu0 %v3070_v12  ;;  %2628 = vmatprep.subr.bf16.mxu1 %v3071_v13 }
 0x102   :  { %1767 = vmatmul.mubr.bf16.vlgmr.msra.gmra.mrb[0].mxu0 %v2315_v15  ;;  %1931 = vmatmul.mubr.bf16.vlgmr.msra.gmra.mrb[0].mxu1 %v2315_v15  ;;  %v2573_v15 = vld [vmem:[%s4043_s4] ss:$0 sm:$0xff] }
 0x103   :  { %2607 = vmatpush3.bf16.msra.mxu0 %v3072_v16  ;;  %2629 = vmatpush3.bf16.msra.mxu1 %v3073_v11 }
 0x104   :  { %2608 = vmatprep.subr.bf16.mxu0 %v3074_v17  ;;  %2630 = vmatprep.subr.bf16.mxu1 %v3075_v14  ;;  %v2291_v17 = vand.u32 127, %v283_v44 }
 0x106   :  { %vm2292_vm0 = vcmp.lt.s32.totalorder %v2291_v17, 10 }
 0x107   :  { %2609 = vmatpush3.bf16.msra.mxu0 %v3076_v18  ;;  %2631 = vmatpush3.bf16.msra.mxu1 %v3077_v19 }
 0x108   :  { %2610 = vmatprep.subr.bf16.mxu0 %v3078_v20  ;;  %2632 = vmatprep.subr.bf16.mxu1 %v3079_v21 }
 0x10b   :  { %2611 = vmatpush3.bf16.msra.mxu0 %v3080_v22  ;;  %2633 = vmatpush3.bf16.msra.mxu1 %v3081_v23 }
 0x10c   :  { %2612 = vmatprep.subr.bf16.mxu0 %v3082_v24  ;;  %2634 = vmatprep.subr.bf16.mxu1 %v3083_v25 }
 0x10f   :  { %2613 = vmatpush3.bf16.msra.mxu0 %v3084_v26  ;;  %2635 = vmatpush3.bf16.msra.mxu1 %v3085_v27 }
 0x110   :  { %2614 = vmatprep.subr.bf16.mxu0 %v3086_v28  ;;  %2636 = vmatprep.subr.bf16.mxu1 %v3087_v29 }
 0x113   :  { %2615 = vmatpush3.bf16.msra.mxu0 %v3088_v30  ;;  %2637 = vmatpush3.bf16.msra.mxu1 %v3089_v31 }
 0x114   :  { %2616 = vmatprep.subr.bf16.mxu0 %v3090_v32  ;;  %2638 = vmatprep.subr.bf16.mxu1 %v3091_v33 }
 0x117   :  { %2617 = vmatpush3.bf16.msra.mxu0 %v3092_v34  ;;  %2639 = vmatpush3.bf16.msra.mxu1 %v3093_v35 }
 0x118   :  { %2618 = vmatprep.subr.bf16.mxu0 %v3094_v36  ;;  %2640 = vmatprep.subr.bf16.mxu1 %v3095_v37 }
 0x11b   :  { %2619 = vmatpush3.bf16.msra.mxu0 %v3096_v38  ;;  %2641 = vmatpush3.bf16.msra.mxu1 %v3097_v39 }
 0x11c   :  { %2620 = vmatprep.subr.bf16.mxu0 %v3098_v40  ;;  %2642 = vmatprep.subr.bf16.mxu1 %v3099_v41 }
 0x11f   :  { %2621 = vmatpush3.bf16.msra.mxu0 %v3100_v42  ;;  %2643 = vmatpush3.bf16.msra.mxu1 %v3101_v43 }
 0x1d5   :  { %v1768_v55 = vpop.f32.mrb[0].mxu0  ;;  %v1932_v56 = vpop.f32.mrb[0].mxu1 }
 0x1d6   :  { %v2650_v57 = vadd.f32 %v1768_v55, %v286_v51  ;;  %v2652_v58 = vadd.f32 %v1932_v56, %v294_v52  ;;  %v1770_v59 = vpop.f32.mrb[1].mxu0  ;;  %v1934_v60 = vpop.f32.mrb[1].mxu1 }
 0x1d7   :  { %v2651_v61 = vadd.f32 %v1770_v59, %v290_v53  ;;  %v2653_v62 = vadd.f32 %v1934_v60, %v298_v54  ;;  %v1772_v63 = vpop.f32.mrb[2].mxu0  ;;  %v1936_v0 = vpop.f32.mrb[2].mxu1 }
 0x1d8   :  { %v1939_v1 = vmax.f32 %v2650_v57, 0.0  ;;  %v1941_v2 = vmax.f32 %v2652_v58, 0.0  ;;  %v1773_v3 = vpop.f32.mrb[3].mxu0  ;;  %v1937_v4 = vpop.f32.mrb[3].mxu1 }
 0x1d9   :  { %v1940_v5 = vmax.f32 %v2651_v61, 0.0  ;;  %v1942_v6 = vmax.f32 %v2653_v62, 0.0 }
 0x1da   :  { %v1943_v9 = vpack.c.bf16 %v1939_v1, %v1939_v1  ;;  %v1945_v10 = vpack.c.bf16 %v1941_v2, %v1941_v2 }
 0x1db   :  { %v1944_v7 = vpack.c.bf16 %v1940_v5, %v1940_v5  ;;  %v1946_v8 = vpack.c.bf16 %v1942_v6, %v1942_v6 }
 0x1dd   :  { %2242 = vmatprep.mubr.bf16.mxu0 %v1944_v7  ;;  %2282 = vmatprep.mubr.bf16.mxu1 %v1946_v8 }
 0x1de   :  { %2243 = vmatmul.mubr.bf16.vlgmr.msra.gmra.mrb[4].mxu0 %v1943_v9  ;;  %2283 = vmatmul.mubr.bf16.vlgmr.msra.gmra.mrb[4].mxu1 %v1945_v10 }
 0x2b1   :  { %v2622_v12 = vpop.f32.mrb[4].mxu0  ;;  %v2644_v13 = vpop.f32.mrb[4].mxu1 }
 0x2b2   :  { %v2623_v16 = vpop.f32.mrb[5].mxu0  ;;  %v2645_v11 = vpop.f32.mrb[5].mxu1 }
 0x2b3   :  { %v2624_v14 = vadd.f32 %v2623_v16, %v2622_v12  ;;  %v2646_v18 = vadd.f32 %v2645_v11, %v2644_v13  ;;  %v2625_v19 = vpop.f32.mrb[6].mxu0  ;;  %v2647_v20 = vpop.f32.mrb[6].mxu1 }
 0x2b4   :  { %v2626_v21 = vpop.f32.mrb[7].mxu0  ;;  %v2648_v22 = vpop.f32.mrb[7].mxu1 }
 0x2b5   :  { %v2245_v23 = vadd.f32 %v2624_v14, %v2573_v15 }
 0x2b7   :  { %v2285_v24 = vadd.f32 %v2646_v18, %v2245_v23 }
 0x2b9   :  { %v2293_v25 = vsel %vm2292_vm0, %v2285_v24, -1e+30 }
 0x2ba   :  { %2294 = vmax.xlane.f32.xlu0 %v2293_v25 }
 0x347   :  { %v2295_v26 = vpop.xlane.xlu0 %2294 }
 0x348   :  { %v2296_v27 = vsub.f32 %v2293_v25, %v2295_v26 }
 0x34a   :  { %v2297_v28 = vmul.f32 1.442695, %v2296_v27 }
 0x34c   :  { %3102 = vpow2.f32 %v2297_v28 }
 0x356   :  { %v3103_v29 = vpop.eup %3102 }
 0x357   :  { %2299 = vadd.xlane.f32.xlu0 %v3103_v29 }
 0x3e4   :  { %v2300_v30 = vpop.xlane.xlu0 %2299 }
 0x3e5   :  { %3104 = vlog2.f32 %v2300_v30 }
 0x3ef   :  { %v3105_v31 = vpop.eup %3104 }
 0x3f0   :  { %v2302_v32 = vmul.f32 0.6931472, %v3105_v31 }
 0x3f2   :  { %v2303_v33 = vsub.f32 %v2296_v27, %v2302_v32 }
 0x3f4   :  { %2304 = vst [vmem:[%s4044_s5] sm:$0xff] %v2303_v33 }

// kernel: net_forward.2
= control target key start
LH: loop header
LB: loop body
LE: loop exit
PB: predicated region body
PF: predicated region fallthrough
CT: control target
= control target key end

     0   :  { %vm997_vm0 = vcmask 1043456   ;;  %vm998_vm1 = vcmask 1044480   ;;  %vm708_vm2 = vcmask 203776   ;;  %v11306_v1 = vmov 65535   ;;  %s14222_s1 = inlined_call_operand.vmem [shape: bf16[25,32], index: 1, kind: input, shape index: {}]   ;;  %s14223_s0 = inlined_call_operand.vmem [shape: bf16[2,4,192,25], index: 0, kind: input, shape index: {}]   ;;  %s14224_s3 = inlined_call_operand.vmem [shape: f32[30,32,128], index: 3, kind: input, shape index: {}]   ;;  %s14225_s2 = inlined_call_operand.vmem [shape: f32[1,32], index: 2, kind: input, shape index: {}]   ;;  %s14226_s4 = inlined_call_operand.vmem [shape: f32[1,64], index: 4, kind: input, shape index: {}]   ;;  %s14227_s5 = inlined_call_operand.vmem [shape: bf16[2,4,4,64], index: 5, kind: output, shape index: {}]  }
   0x1   :  { %v11206_v0 = vld [vmem:[%s14222_s1] sm:$0xff]   ;;  %v999_v2 = vsel %vm997_vm0, 4294967295, %v11306_v1  ;;  %v11207_v3 = vld [vmem:[%s14222_s1 + $0x8] sm:$0x1f]   ;;  %v11210_v8 = vld [vmem:[%s14223_s0 + $0x10] sm:$0xff]   ;;  %vm2399_vm3 = vcmask 261120  }
   0x2   :  { %9344 = vmatprep.subr.bf16.mxu0 %v11206_v0  ;;  %v1000_v4 = vsel %vm998_vm1, %v999_v2, 0  ;;  %v11208_v5 = vld [vmem:[%s14223_s0] sm:$0xff]   ;;  %v11209_v7 = vld [vmem:[%s14223_s0 + $0x8] sm:$0xff]   ;;  %v11211_v9 = vld [vmem:[%s14223_s0 + $0x18] sm:$0xff]   ;;  %vm7841_vm4 = vcmask 517120  }
   0x3   :  { %9345 = vmatpush3.bf16.msra.mxu0 %v11206_v0  ;;  %v1002_v6 = vand.u32 %v11207_v3, %v1000_v4  ;;  %9348 = vmatprep.mubr.msk.bf16.mxu0 %vm708_vm2, %v11208_v5  ;;  %v11212_v10 = vld [vmem:[%s14223_s0 + $0x20] sm:$0xff]   ;;  %v11213_v11 = vld [vmem:[%s14223_s0 + $0x28] sm:$0xff]   ;;  %v11214_v12 = vld [vmem:[%s14223_s0 + $0x30] sm:$0xff]  }
   0x4   :  { %v11215_v13 = vld [vmem:[%s14223_s0 + $0x38] sm:$0xff]   ;;  %v11216_v14 = vld [vmem:[%s14223_s0 + $0x40] sm:$0xff]   ;;  %v11217_v15 = vld [vmem:[%s14223_s0 + $0x48] sm:$0xff]  }
   0x5   :  { %9346 = vmatprep.subr.bf16.mxu0 %v1002_v6  ;;  %v11218_v16 = vld [vmem:[%s14223_s0 + $0x50] sm:$0xff]   ;;  %v11219_v17 = vld [vmem:[%s14223_s0 + $0x58] sm:$0xff]   ;;  %v11220_v18 = vld [vmem:[%s14223_s0 + $0x60] sm:$0xff]  }
   0x6   :  { %v11221_v19 = vld [vmem:[%s14223_s0 + $0x68] sm:$0xff]   ;;  %v11222_v20 = vld [vmem:[%s14223_s0 + $0x70] sm:$0xff]   ;;  %v11223_v21 = vld [vmem:[%s14223_s0 + $0x78] sm:$0xff]  }
   0x7   :  { %9347 = vmatpush3.bf16.msra.mxu0 %v1002_v6  ;;  %v11224_v22 = vld [vmem:[%s14223_s0 + $0x80] sm:$0xff]   ;;  %v11225_v23 = vld [vmem:[%s14223_s0 + $0x88] sm:$0xff]   ;;  %v11226_v24 = vld [vmem:[%s14223_s0 + $0x90] sm:$0xff]  }
   0x8   :  { %v11227_v25 = vld [vmem:[%s14223_s0 + $0x98] sm:$0xff]   ;;  %v11228_v26 = vld [vmem:[%s14223_s0 + $0xa0] sm:$0xff]   ;;  %v11229_v27 = vld [vmem:[%s14223_s0 + $0xa8] sm:$0xff]  }
   0x9   :  { %v11230_v28 = vld [vmem:[%s14223_s0 + $0xb0] sm:$0xff]   ;;  %v11231_v29 = vld [vmem:[%s14223_s0 + $0xb8] sm:$0xff]   ;;  %v11232_v30 = vld [vmem:[%s14223_s0 + $0xc0] sm:$0xff]  }
   0xa   :  { %9349 = vmatmul.mubr.msk.bf16.vlgmr.msra.gmra.mrb[0].mxu0 %vm708_vm2, %v11209_v7  ;;  %v11233_v31 = vld [vmem:[%s14223_s0 + $0xc8] sm:$0xff]   ;;  %v11234_v32 = vld [vmem:[%s14223_s0 + $0xd0] sm:$0xff]   ;;  %v11235_v33 = vld [vmem:[%s14223_s0 + $0xd8] sm:$0xff]  }
   0xb   :  { %9352 = vmatprep.mubr.msk.bf16.mxu0 %vm708_vm2, %v11210_v8  ;;  %v11236_v34 = vld [vmem:[%s14223_s0 + $0xe0] sm:$0xff]   ;;  %v11237_v35 = vld [vmem:[%s14223_s0 + $0xe8] sm:$0xff]   ;;  %v11238_v36 = vld [vmem:[%s14223_s0 + $0xf0] sm:$0xff]  }
   0xc   :  { %v11239_v37 = vld [vmem:[%s14223_s0 + $0xf8] sm:$0xff]   ;;  %v11240_v38 = vld [vmem:[%s14223_s0 + $0x100] sm:$0xff]   ;;  %v11241_v39 = vld [vmem:[%s14223_s0 + $0x108] sm:$0xff]  }
   0xd   :  { %v11242_v40 = vld [vmem:[%s14223_s0 + $0x110] sm:$0xff]   ;;  %v11243_v41 = vld [vmem:[%s14223_s0 + $0x118] sm:$0xff]   ;;  %v11244_v42 = vld [vmem:[%s14223_s0 + $0x120] sm:$0xff]  }
   0xe   :  { %v11245_v43 = vld [vmem:[%s14223_s0 + $0x128] sm:$0xff]   ;;  %v11246_v44 = vld [vmem:[%s14223_s0 + $0x130] sm:$0xff]   ;;  %v11247_v45 = vld [vmem:[%s14223_s0 + $0x138] sm:$0xff]  }
   0xf   :  { %v11248_v46 = vld [vmem:[%s14223_s0 + $0x140] sm:$0xff]   ;;  %v11249_v47 = vld [vmem:[%s14223_s0 + $0x148] sm:$0xff]   ;;  %v11250_v48 = vld [vmem:[%s14223_s0 + $0x150] sm:$0xff]  }
  0x10   :  { %v11251_v49 = vld [vmem:[%s14223_s0 + $0x158] sm:$0xff]   ;;  %v11252_v50 = vld [vmem:[%s14223_s0 + $0x160] sm:$0xff]   ;;  %v11253_v51 = vld [vmem:[%s14223_s0 + $0x168] sm:$0xff]  }
  0x11   :  { %v11254_v52 = vld [vmem:[%s14223_s0 + $0x170] sm:$0xff]   ;;  %v11255_v53 = vld [vmem:[%s14223_s0 + $0x178] sm:$0xff]   ;;  %v11256_v54 = vld [vmem:[%s14223_s0 + $0x180] sm:$0xff]  }
  0x12   :  { %9353 = vmatmul.mubr.msk.bf16.gmra.mrb[4].mxu0 %vm708_vm2, %v11211_v9  ;;  %v11257_v55 = vld [vmem:[%s14223_s0 + $0x188] sm:$0xff]   ;;  %v11258_v56 = vld [vmem:[%s14223_s0 + $0x190] sm:$0xff]   ;;  %v11259_v57 = vld [vmem:[%s14223_s0 + $0x198] sm:$0xff]  }
  0x13   :  { %9356 = vmatprep.mubr.msk.bf16.mxu0 %vm708_vm2, %v11212_v10  ;;  %v11260_v58 = vld [vmem:[%s14223_s0 + $0x1a0] sm:$0xff]   ;;  %v11261_v59 = vld [vmem:[%s14223_s0 + $0x1a8] sm:$0xff]   ;;  %v11262_v60 = vld [vmem:[%s14223_s0 + $0x1b0] sm:$0xff]  }
  0x14   :  { %v11263_v63 = vld [vmem:[%s14223_s0 + $0x1b8] sm:$0xff]   ;;  %v11264_v1 = vld [vmem:[%s14223_s0 + $0x1c0] sm:$0xff]   ;;  %v11265_v5 = vld [vmem:[%s14223_s0 + $0x1c8] sm:$0xff]  }
  0x15   :  { %v11266_v7 = vld [vmem:[%s14223_s0 + $0x1d0] sm:$0xff]  }
  0x1a   :  { %9357 = vmatmul.mubr.msk.bf16.gmra.mrb[8].mxu0 %vm708_vm2, %v11213_v11  ;;  %v11267_v11 = vld [vmem:[%s14223_s0 + $0x1d8] sm:$0xff]  }
  0x1b   :  { %9360 = vmatprep.mubr.msk.bf16.mxu0 %vm708_vm2, %v11214_v12 }
  0x22   :  { %9361 = vmatmul.mubr.msk.bf16.gmra.mrb[12].mxu0 %vm708_vm2, %v11215_v13  ;;  %v11268_v13 = vld [vmem:[%s14223_s0 + $0x1e0] sm:$0xff]  }
  0x23   :  { %9364 = vmatprep.mubr.msk.bf16.mxu0 %vm708_vm2, %v11216_v14 }
  0x2a   :  { %9365 = vmatmul.mubr.msk.bf16.gmra.mrb[16].mxu0 %vm708_vm2, %v11217_v15 }
  0x2b   :  { %9368 = vmatprep.mubr.msk.bf16.mxu0 %vm708_vm2, %v11218_v16 }
  0x32   :  { %9369 = vmatmul.mubr.msk.bf16.gmra.mrb[20].mxu0 %vm708_vm2, %v11219_v17  ;;  %v11269_v17 = vld [vmem:[%s14223_s0 + $0x1e8] sm:$0xff]  }
  0x33   :  { %9372 = vmatprep.mubr.msk.bf16.mxu0 %vm708_vm2, %v11220_v18 }
  0x3a   :  { %9373 = vmatmul.mubr.msk.bf16.gmra.mrb[24].mxu0 %vm708_vm2, %v11221_v19  ;;  %v11270_v19 = vld [vmem:[%s14223_s0 + $0x1f0] sm:$0xff]  }
  0x3b   :  { %9376 = vmatprep.mubr.msk.bf16.mxu0 %vm708_vm2, %v11222_v20 }
  0x42   :  { %9377 = vmatmul.mubr.msk.bf16.gmra.mrb[28].mxu0 %vm708_vm2, %v11223_v21 }
  0x43   :  { %9380 = vmatprep.mubr.msk.bf16.mxu0 %vm708_vm2, %v11224_v22 }
  0x4a   :  { %9381 = vmatmul.mubr.msk.bf16.gmra.mrb[32].mxu0 %vm708_vm2, %v11225_v23  ;;  %v11271_v23 = vld [vmem:[%s14223_s0 + $0x1f8] sm:$0xff]  }
  0x4b   :  { %9384 = vmatprep.mubr.msk.bf16.mxu0 %vm708_vm2, %v11226_v24 }
  0x52   :  { %9385 = vmatmul.mubr.msk.bf16.gmra.mrb[36].mxu0 %vm708_vm2, %v11227_v25  ;;  %v11272_v25 = vld [vmem:[%s14223_s0 + $0x200] sm:$0xff]  }
  0x53   :  { %9388 = vmatprep.mubr.msk.bf16.mxu0 %vm708_vm2, %v11228_v26 }
  0x5a   :  { %9389 = vmatmul.mubr.msk.bf16.gmra.mrb[40].mxu0 %vm708_vm2, %v11229_v27 }
  0x5b   :  { %9392 = vmatprep.mubr.msk.bf16.mxu0 %vm708_vm2, %v11230_v28 }
  0x62   :  { %9393 = vmatmul.mubr.msk.bf16.gmra.mrb[44].mxu0 %vm708_vm2, %v11231_v29  ;;  %v11273_v29 = vld [vmem:[%s14223_s0 + $0x208] sm:$0xff]  }
  0x63   :  { %9396 = vmatprep.mubr.msk.bf16.mxu0 %vm708_vm2, %v11232_v30  ;;  %v8049_v30 = vld [vmem:[%s14224_s3 + $0x20] sm:$0xff] }
  0x6a   :  { %9397 = vmatmul.mubr.msk.bf16.gmra.mrb[48].mxu0 %vm708_vm2, %v11233_v31  ;;  %v8050_v31 = vld [vmem:[%s14224_s3 + $0x28] sm:$0xff] }
  0x6b   :  { %9400 = vmatprep.mubr.msk.bf16.mxu0 %vm708_vm2, %v11234_v32 }
  0x72   :  { %9401 = vmatmul.mubr.msk.bf16.gmra.mrb[52].mxu0 %vm708_vm2, %v11235_v33  ;;  %v11274_v33 = vld [vmem:[%s14223_s0 + $0x210] sm:$0xff]  }
  0x73   :  { %9404 = vmatprep.mubr.msk.bf16.mxu0 %vm708_vm2, %v11236_v34  ;;  %v10500_v34 = vpack.c.bf16 %v8050_v31, %v8049_v30 }
  0x75   :  { %10501 = vmatprep.subr.bf16.mxu0 %v10500_v34 }
  0x76   :  { %10503 = vmatpush3.bf16.msra.mxu0 %v10500_v34 }
  0x7a   :  { %9405 = vmatmul.mubr.msk.bf16.gmra.mrb[56].mxu0 %vm708_vm2, %v11237_v35 }
  0x7b   :  { %9408 = vmatprep.mubr.msk.bf16.mxu0 %vm708_vm2, %v11238_v36  ;;  %v8225_v36 = vld [vmem:[%s14224_s3 + $0x120] sm:$0xff] }
  0x82   :  { %9409 = vmatmul.mubr.msk.bf16.gmra.mrb[60].mxu0 %vm708_vm2, %v11239_v37  ;;  %v8226_v37 = vld [vmem:[%s14224_s3 + $0x128] sm:$0xff] }
  0x83   :  { %9412 = vmatprep.mubr.msk.bf16.mxu0 %vm708_vm2, %v11240_v38  ;;  %v10572_v38 = vpack.c.bf16 %v8226_v37, %v8225_v36 }
  0x85   :  { %10573 = vmatprep.subr.bf16.mxu1 %v10572_v38 }
  0x86   :  { %10575 = vmatpush3.bf16.msra.mxu1 %v10572_v38  ;;  %v11281_v38 = vld [vmem:[%s14223_s0 + $0x248] sm:$0xff]  }
  0x8a   :  { %9413 = vmatmul.mubr.msk.bf16.gmra.mrb[64].mxu0 %vm708_vm2, %v11241_v39  ;;  %v8051_v39 = vld [vmem:[%s14224_s3 + $0x30] sm:$0xff] }
  0x8b   :  { %9416 = vmatprep.mubr.msk.bf16.mxu0 %vm708_vm2, %v11242_v40  ;;  %v8052_v40 = vld [vmem:[%s14224_s3 + $0x38] sm:$0xff] }
  0x92   :  { %9417 = vmatmul.mubr.msk.bf16.gmra.mrb[68].mxu0 %vm708_vm2, %v11243_v41  ;;  %v10504_v41 = vpack.c.bf16 %v8052_v40, %v8051_v39 }
  0x93   :  { %9420 = vmatprep.mubr.msk.bf16.mxu0 %vm708_vm2, %v11244_v42 }
  0x94   :  { %10505 = vmatprep.subr.bf16.mxu0 %v10504_v41 }
  0x95   :  { %10507 = vmatpush3.bf16.msra.mxu0 %v10504_v41  ;;  %v11282_v41 = vld [vmem:[%s14223_s0 + $0x250] sm:$0xff]  }
  0x9a   :  { %9421 = vmatmul.mubr.msk.bf16.gmra.mrb[72].mxu0 %vm708_vm2, %v11245_v43  ;;  %v8227_v43 = vld [vmem:[%s14224_s3 + $0x130] sm:$0xff] }
  0x9b   :  { %9424 = vmatprep.mubr.msk.bf16.mxu0 %vm708_vm2, %v11246_v44  ;;  %v8228_v44 = vld [vmem:[%s14224_s3 + $0x138] sm:$0xff] }
  0xa2   :  { %9425 = vmatmul.mubr.msk.bf16.gmra.mrb[76].mxu0 %vm708_vm2, %v11247_v45 }
  0xa3   :  { %9428 = vmatprep.mubr.msk.bf16.mxu0 %vm708_vm2, %v11248_v46 }
  0xaa   :  { %9429 = vmatmul.mubr.msk.bf16.gmra.mrb[80].mxu0 %vm708_vm2, %v11249_v47  ;;  %v11275_v47 = vld [vmem:[%s14223_s0 + $0x218] sm:$0xff]  }
  0xab   :  { %9432 = vmatprep.mubr.msk.bf16.mxu0 %vm708_vm2, %v11250_v48  ;;  %v10576_v48 = vpack.c.bf16 %v8228_v44, %v8227_v43 }
  0xad   :  { %10577 = vmatprep.subr.bf16.mxu1 %v10576_v48 }
  0xae   :  { %10579 = vmatpush3.bf16.msra.mxu1 %v10576_v48 }
  0xb2   :  { %9433 = vmatmul.mubr.msk.bf16.gmra.mrb[84].mxu0 %vm708_vm2, %v11251_v49  ;;  %v11292_v49 = vld [vmem:[%s14223_s0 + $0x2a0] sm:$0xff]  }
  0xb3   :  { %9436 = vmatprep.mubr.msk.bf16.mxu0 %vm708_vm2, %v11252_v50 }
  0xba   :  { %9437 = vmatmul.mubr.msk.bf16.gmra.mrb[88].mxu0 %vm708_vm2, %v11253_v51  ;;  %v11276_v51 = vld [vmem:[%s14223_s0 + $0x220] sm:$0xff]  }
  0xbb   :  { %9440 = vmatprep.mubr.msk.bf16.mxu0 %vm708_vm2, %v11254_v52 }
  0xc2   :  { %9441 = vmatmul.mubr.msk.bf16.gmra.mrb[92].mxu0 %vm708_vm2, %v11255_v53 }
  0xc3   :  { %9444 = vmatprep.mubr.msk.bf16.mxu0 %vm708_vm2, %v11256_v54  ;;  %v11291_v54 = vld [vmem:[%s14223_s0 + $0x298] sm:$0xff]  }
  0xca   :  { %9445 = vmatmul.mubr.msk.bf16.gmra.mrb[96].mxu0 %vm708_vm2, %v11257_v55 }
  0xcb   :  { %9448 = vmatprep.mubr.msk.bf16.mxu0 %vm708_vm2, %v11258_v56 }
  0xd2   :  { %9449 = vmatmul.mubr.msk.bf16.gmra.mrb[100].mxu0 %vm708_vm2, %v11259_v57 }
  0xd3   :  { %9452 = vmatprep.mubr.msk.bf16.mxu0 %vm708_vm2, %v11260_v58  ;;  %v11277_v58 = vld [vmem:[%s14223_s0 + $0x228] sm:$0xff]  }
  0xda   :  { %9453 = vmatmul.mubr.msk.bf16.gmra.mrb[104].mxu0 %vm708_vm2, %v11261_v59  ;;  %v11290_v59 = vld [vmem:[%s14223_s0 + $0x290] sm:$0xff]  }
  0xdb   :  { %9456 = vmatprep.mubr.msk.bf16.mxu0 %vm708_vm2, %v11262_v60 }
  0xdd   :  { %v11564_v61 = vpop.f32.mrb[0].mxu0 }
  0xde   :  { %v11566_v62 = vpop.f32.mrb[1].mxu0 }
  0xdf   :  { %v11571_v0 = vpop.f32.mrb[2].mxu0 }
  0xe0   :  { %v11576_v2 = vpop.f32.mrb[3].mxu0 }
  0xe2   :  { %9457 = vmatmul.mubr.msk.bf16.gmra.mrb[108].mxu0 %vm708_vm2, %v11263_v63  ;;  %v11278_v63 = vld [vmem:[%s14223_s0 + $0x230] sm:$0xff]  }
  0xe3   :  { %9460 = vmatprep.mubr.msk.bf16.mxu0 %vm708_vm2, %v11264_v1 }
  0xe5   :  { %v11580_v3 = vpop.f32.mrb[4].mxu0 }
  0xe6   :  { %v11582_v4 = vpop.f32.mrb[5].mxu0 }
  0xe7   :  { %v11587_v6 = vpop.f32.mrb[6].mxu0 }
  0xe8   :  { %v11592_v8 = vpop.f32.mrb[7].mxu0 }
  0xea   :  { %9461 = vmatmul.mubr.msk.bf16.gmra.mrb[112].mxu0 %vm708_vm2, %v11265_v5 }
  0xeb   :  { %9464 = vmatprep.mubr.msk.bf16.mxu0 %vm708_vm2, %v11266_v7 }
  0xed   :  { %v11596_v9 = vpop.f32.mrb[8].mxu0 }
  0xee   :  { %v11598_v10 = vpop.f32.mrb[9].mxu0 }
  0xef   :  { %v11603_v12 = vpop.f32.mrb[10].mxu0 }
  0xf0   :  { %v11608_v14 = vpop.f32.mrb[11].mxu0 }
  0xf2   :  { %9465 = vmatmul.mubr.msk.bf16.gmra.mrb[116].mxu0 %vm708_vm2, %v11267_v11 }
  0xf3   :  { %9468 = vmatprep.mubr.msk.bf16.mxu0 %vm708_vm2, %v11268_v13 }
  0xf5   :  { %v11612_v15 = vpop.f32.mrb[12].mxu0 }
  0xf6   :  { %v11614_v16 = vpop.f32.mrb[13].mxu0 }
  0xf7   :  { %v11619_v18 = vpop.f32.mrb[14].mxu0 }
  0xf8   :  { %v11624_v20 = vpop.f32.mrb[15].mxu0 }
  0xfa   :  { %9469 = vmatmul.mubr.msk.bf16.gmra.mrb[120].mxu0 %vm708_vm2, %v11269_v17 }
  0xfb   :  { %9472 = vmatprep.mubr.msk.bf16.mxu0 %vm708_vm2, %v11270_v19  ;;  %v11279_v19 = vld [vmem:[%s14223_s0 + $0x238] sm:$0xff]  }
  0xfd   :  { %v11628_v21 = vpop.f32.mrb[16].mxu0 }
  0xfe   :  { %v11630_v22 = vpop.f32.mrb[17].mxu0 }
  0xff   :  { %14408 = vst [vmem:[#allocation2_spill] sm:$0xff] %v11630_v22  ;;  %v11635_v24 = vpop.f32.mrb[18].mxu0 }
 0x100   :  { %14409 = vst [vmem:[#allocation3_spill] sm:$0xff] %v11635_v24  ;;  %v11640_v26 = vpop.f32.mrb[19].mxu0 }
 0x101   :  { %14410 = vst [vmem:[#allocation4_spill] sm:$0xff] %v11640_v26 }
 0x102   :  { %9473 = vmatmul.mubr.msk.bf16.gmra.mrb[124].mxu0 %vm708_vm2, %v11271_v23  ;;  %v11287_v23 = vld [vmem:[%s14223_s0 + $0x278] sm:$0xff]  }
 0x103   :  { %9476 = vmatprep.mubr.msk.bf16.mxu0 %vm708_vm2, %v11272_v25 }
 0x105   :  { %v11644_v27 = vpop.f32.mrb[20].mxu0 }
 0x106   :  { %14411 = vst [vmem:[#allocation5_spill] sm:$0xff] %v11644_v27  ;;  %v11646_v28 = vpop.f32.mrb[21].mxu0 }
 0x107   :  { %14412 = vst [vmem:[#allocation6_spill] sm:$0xff] %v11646_v28  ;;  %v11657_v32 = vpop.f32.mrb[22].mxu0 }
 0x108   :  { %14413 = vst [vmem:[#allocation7_spill] sm:$0xff] %v11657_v32  ;;  %v11662_v35 = vpop.f32.mrb[23].mxu0 }
 0x109   :  { %14414 = vst [vmem:[#allocation8_spill] sm:$0xff] %v11662_v35 }
 0x10a   :  { %9477 = vmatmul.mubr.msk.bf16.gmra.mrb[128].mxu0 %vm708_vm2, %v11273_v29  ;;  %v11280_v29 = vld [vmem:[%s14223_s0 + $0x240] sm:$0xff]  }
 0x10b   :  { %9480 = vmatprep.mubr.msk.bf16.mxu0 %vm708_vm2, %v11274_v33 }
 0x10d   :  { %v11678_v42 = vpop.f32.mrb[24].mxu0 }
 0x10e   :  { %v11688_v46 = vpop.f32.mrb[25].mxu0 }
 0x10f   :  { %v11695_v50 = vpop.f32.mrb[26].mxu0 }
 0x110   :  { %v11702_v53 = vpop.f32.mrb[27].mxu0 }
 0x112   :  { %9481 = vmatmul.mubr.msk.bf16.gmra.mrb[132].mxu0 %vm708_vm2, %v11275_v47 }
 0x113   :  { %9484 = vmatprep.mubr.msk.bf16.mxu0 %vm708_vm2, %v11276_v51 }
 0x115   :  { %v11708_v55 = vpop.f32.mrb[28].mxu0 }
 0x116   :  { %v11712_v57 = vpop.f32.mrb[29].mxu0 }
 0x117   :  { %v11719_v60 = vpop.f32.mrb[30].mxu0 }
 0x118   :  { %v11726_v5 = vpop.f32.mrb[31].mxu0 }
 0x11a   :  { %9485 = vmatmul.mubr.msk.bf16.gmra.mrb[136].mxu0 %vm708_vm2, %v11277_v58 }
 0x11b   :  { %9488 = vmatprep.mubr.msk.bf16.mxu0 %vm708_vm2, %v11278_v63  ;;  %v11283_v63 = vld [vmem:[%s14223_s0 + $0x258] sm:$0xff]  }
 0x11d   :  { %v11732_v11 = vpop.f32.mrb[32].mxu0 }
 0x11e   :  { %v11736_v17 = vpop.f32.mrb[33].mxu0 }
 0x11f   :  { %v11743_v25 = vpop.f32.mrb[34].mxu0 }
 0x120   :  { %v11750_v31 = vpop.f32.mrb[35].mxu0 }
 0x122   :  { %9489 = vmatmul.mubr.msk.bf16.gmra.mrb[140].mxu0 %vm708_vm2, %v11279_v19 }
 0x123   :  { %9492 = vmatprep.mubr.msk.bf16.mxu0 %vm708_vm2, %v11280_v29 }
 0x125   :  { %v11756_v34 = vpop.f32.mrb[36].mxu0 }
 0x126   :  { %v11760_v37 = vpop.f32.mrb[37].mxu0 }
 0x127   :  { %v11767_v40 = vpop.f32.mrb[38].mxu0 }
 0x128   :  { %v11774_v44 = vpop.f32.mrb[39].mxu0 }
 0x12a   :  { %9493 = vmatmul.mubr.msk.bf16.gmra.mrb[144].mxu0 %vm708_vm2, %v11281_v38  ;;  %v11284_v38 = vld [vmem:[%s14223_s0 + $0x260] sm:$0xff]  }
 0x12b   :  { %9496 = vmatprep.mubr.msk.bf16.mxu0 %vm708_vm2, %v11282_v41  ;;  %v11285_v41 = vld [vmem:[%s14223_s0 + $0x268] sm:$0xff]  }
 0x12d   :  { %v11780_v48 = vpop.f32.mrb[40].mxu0 }
 0x12e   :  { %v11784_v58 = vpop.f32.mrb[41].mxu0 }
 0x12f   :  { %14415 = vst [vmem:[#allocation9_spill] sm:$0xff] %v11784_v58  ;;  %v11791_v29 = vpop.f32.mrb[42].mxu0 }
 0x130   :  { %14416 = vst [vmem:[#allocation10_spill] sm:$0xff] %v11791_v29  ;;  %v11798_v47 = vpop.f32.mrb[43].mxu0  ;;  %v11298_v29 = vld [vmem:[%s14223_s0 + $0x2d0] sm:$0xff]  }
 0x131   :  { %14417 = vst [vmem:[#allocation11_spill] sm:$0xff] %v11798_v47  ;;  %v11297_v47 = vld [vmem:[%s14223_s0 + $0x2c8] sm:$0xff]  }
 0x132   :  { %9497 = vmatmul.mubr.msk.bf16.gmra.mrb[148].mxu0 %vm708_vm2, %v11283_v63  ;;  %v11286_v63 = vld [vmem:[%s14223_s0 + $0x270] sm:$0xff]  }
 0x133   :  { %9500 = vmatprep.mubr.msk.bf16.mxu0 %vm708_vm2, %v11284_v38  ;;  %v11288_v38 = vld [vmem:[%s14223_s0 + $0x280] sm:$0xff]  }
 0x135   :  { %v11804_v43 = vpop.f32.mrb[44].mxu0 }
 0x136   :  { %14418 = vst [vmem:[#allocation12_spill] sm:$0xff] %v11804_v43  ;;  %v11808_v39 = vpop.f32.mrb[45].mxu0  ;;  %v11296_v43 = vld [vmem:[%s14223_s0 + $0x2c0] sm:$0xff]  }
 0x137   :  { %14419 = vst [vmem:[#allocation13_spill] sm:$0xff] %v11808_v39  ;;  %v11815_v33 = vpop.f32.mrb[46].mxu0  ;;  %v11295_v39 = vld [vmem:[%s14223_s0 + $0x2b8] sm:$0xff]  }
 0x138   :  { %14420 = vst [vmem:[#allocation14_spill] sm:$0xff] %v11815_v33  ;;  %v11822_v51 = vpop.f32.mrb[47].mxu0  ;;  %v11294_v33 = vld [vmem:[%s14223_s0 + $0x2b0] sm:$0xff]  }
 0x139   :  { %14421 = vst [vmem:[#allocation15_spill] sm:$0xff] %v11822_v51  ;;  %v11293_v51 = vld [vmem:[%s14223_s0 + $0x2a8] sm:$0xff]  }
 0x13a   :  { %9501 = vmatmul.mubr.msk.bf16.gmra.mrb[152].mxu0 %vm708_vm2, %v11285_v41 }
 0x13b   :  { %9504 = vmatprep.mubr.msk.bf16.mxu0 %vm708_vm2, %v11286_v63  ;;  %v11289_v63 = vld [vmem:[%s14223_s0 + $0x288] sm:$0xff]  }
 0x13d   :  { %v9398_v30 = vpop.f32.mrb[48].mxu0 }
 0x13e   :  { %v1230_v36 = vpop.f32.mrb[49].mxu0 }
 0x13f   :  { %v9399_v13 = vpop.f32.mrb[50].mxu0 }
 0x140   :  { %v1233_v7 = vpop.f32.mrb[51].mxu0 }
 0x142   :  { %9505 = vmatmul.mubr.msk.bf16.gmra.mrb[156].mxu0 %vm708_vm2, %v11287_v23 }
 0x143   :  { %9508 = vmatprep.mubr.msk.bf16.mxu0 %vm708_vm2, %v11288_v38 }
 0x145   :  { %v11836_v19 = vpop.f32.mrb[52].mxu0 }
 0x146   :  { %v11838_v41 = vpop.f32.mrb[53].mxu0 }
 0x147   :  { %v11843_v1 = vpop.f32.mrb[54].mxu0 }
 0x148   :  { %v11848_v56 = vpop.f32.mrb[55].mxu0 }
 0x14a   :  { %9509 = vmatmul.mubr.msk.bf16.gmra.mrb[160].mxu0 %vm708_vm2, %v11289_v63 }
 0x14b   :  { %9512 = vmatprep.mubr.msk.bf16.mxu0 %vm708_vm2, %v11290_v59 }
 0x14d   :  { %v11852_v23 = vpop.f32.mrb[56].mxu0 }
 0x14e   :  { %v11854_v38 = vpop.f32.mrb[57].mxu0 }
 0x14f   :  { %v11859_v52 = vpop.f32.mrb[58].mxu0 }
 0x150   :  { %v11864_v45 = vpop.f32.mrb[59].mxu0 }
 0x152   :  { %9513 = vmatmul.mubr.msk.bf16.gmra.mrb[164].mxu0 %vm708_vm2, %v11291_v54 }
 0x153   :  { %9516 = vmatprep.mubr.msk.bf16.mxu0 %vm708_vm2, %v11292_v49 }
 0x155   :  { %v11868_v59 = vpop.f32.mrb[60].mxu0 }
 0x156   :  { %v11870_v63 = vpop.f32.mrb[61].mxu0 }
 0x157   :  { %v11875_v35 = vpop.f32.mrb[62].mxu0 }
 0x158   :  { %v11880_v32 = vpop.f32.mrb[63].mxu0 }
 0x15a   :  { %9517 = vmatmul.mubr.msk.bf16.gmra.mrb[168].mxu0 %vm708_vm2, %v11293_v51 }
 0x15b   :  { %9520 = vmatprep.mubr.msk.bf16.mxu0 %vm708_vm2, %v11294_v33 }
 0x15d   :  { %v11884_v49 = vpop.f32.mrb[64].mxu0 }
 0x15e   :  { %v11886_v54 = vpop.f32.mrb[65].mxu0 }
 0x15f   :  { %v11891_v28 = vpop.f32.mrb[66].mxu0 }
 0x160   :  { %14422 = vst [vmem:[#allocation16_spill] sm:$0xff] %v11891_v28  ;;  %v11896_v27 = vpop.f32.mrb[67].mxu0 }
 0x161   :  { %14423 = vst [vmem:[#allocation17_spill] sm:$0xff] %v11896_v27 }
 0x162   :  { %9521 = vmatmul.mubr.msk.bf16.gmra.mrb[172].mxu0 %vm708_vm2, %v11295_v39 }
 0x163   :  { %9524 = vmatprep.mubr.msk.bf16.mxu0 %vm708_vm2, %v11296_v43 }
 0x165   :  { %v11900_v33 = vpop.f32.mrb[68].mxu0 }
 0x166   :  { %14424 = vst [vmem:[#allocation18_spill] sm:$0xff] %v11900_v33  ;;  %v11902_v51 = vpop.f32.mrb[69].mxu0 }
 0x167   :  { %14425 = vst [vmem:[#allocation19_spill] sm:$0xff] %v11902_v51  ;;  %v11907_v26 = vpop.f32.mrb[70].mxu0  ;;  %v11299_v51 = vld [vmem:[%s14223_s0 + $0x2d8] sm:$0xff]  }
 0x168   :  { %14426 = vst [vmem:[#allocation20_spill] sm:$0xff] %v11907_v26  ;;  %v11912_v24 = vpop.f32.mrb[71].mxu0  ;;  %v11300_v26 = vld [vmem:[%s14223_s0 + $0x2e0] sm:$0xff]  }
 0x169   :  { %14427 = vst [vmem:[#allocation21_spill] sm:$0xff] %v11912_v24  ;;  %v14428_v24 = vmax.f32 %v11564_v61, %v11678_v42  ;;  %v14434_v61 = vmax.f32 %v11576_v2, %v11702_v53  ;;  %v14436_v2 = vmax.f32 %v11580_v3, %v11708_v55  ;;  %v14442_v3 = vmax.f32 %v11592_v8, %v11726_v5 }
 0x16a   :  { %9525 = vmatmul.mubr.msk.bf16.gmra.mrb[176].mxu0 %vm708_vm2, %v11297_v47 }
 0x16b   :  { %9528 = vmatprep.mubr.msk.bf16.mxu0 %vm708_vm2, %v11298_v29 }
 0x16d   :  { %v9422_v39 = vpop.f32.mrb[72].mxu0 }
 0x16e   :  { %v1855_v43 = vmax.f32 %v9398_v30, %v9422_v39  ;;  %v1326_v33 = vpop.f32.mrb[73].mxu0  ;;  %v14430_v30 = vmax.f32 %v11566_v62, %v11688_v46  ;;  %v11301_v46 = vld [vmem:[%s14223_s0 + $0x2e8] sm:$0xff]  }
 0x16f   :  { %v1853_v27 = vmax.f32 %v1230_v36, %v1326_v33  ;;  %v9423_v58 = vpop.f32.mrb[74].mxu0  ;;  %v14432_v36 = vmax.f32 %v11571_v0, %v11695_v50 }
 0x170   :  { %v11925_v22 = vmax.f32 %v14428_v24, %v1855_v43  ;;  %v1856_v47 = vmax.f32 %v9399_v13, %v9423_v58  ;;  %v1329_v29 = vpop.f32.mrb[75].mxu0  ;;  %v14438_v13 = vmax.f32 %v11582_v4, %v11712_v57  ;;  %v14444_v43 = vmax.f32 %v11596_v9, %v11732_v11 }
 0x171   :  { %v11930_v39 = vmax.f32 %v14430_v30, %v1853_v27  ;;  %v1854_v28 = vmax.f32 %v1233_v7, %v1329_v29  ;;  %v11302_v7 = vld [vmem:[%s14223_s0 + $0x2f0] sm:$0xff]   ;;  %v14446_v29 = vmax.f32 %v11598_v10, %v11736_v17  ;;  %v14450_v9 = vmax.f32 %v11608_v14, %v11750_v31  ;;  %v12013_v14 = vld [vmem:[%s14225_s2] ss:$0 sm:$0xff] }
 0x172   :  { %14429 = vst [vmem:[#allocation22_spill] sm:$0xff] %v11925_v22  ;;  %v11935_v33 = vmax.f32 %v14432_v36, %v1856_v47  ;;  %9529 = vmatmul.mubr.msk.bf16.gmra.mrb[180].mxu0 %vm708_vm2, %v11299_v51  ;;  %v14448_v36 = vmax.f32 %v11603_v12, %v11743_v25  ;;  %v14453_v31 = vmax.f32 %v11614_v16, %v11760_v37 }
 0x173   :  { %14431 = vst [vmem:[#allocation23_spill] sm:$0xff] %v11930_v39  ;;  %v11941_v24 = vmax.f32 %v14434_v61, %v1854_v28  ;;  %9532 = vmatprep.mubr.msk.bf16.mxu0 %vm708_vm2, %v11300_v26 }
 0x174   :  { %14433 = vst [vmem:[#allocation24_spill] sm:$0xff] %v11935_v33 }
 0x175   :  { %14435 = vst [vmem:[#allocation25_spill] sm:$0xff] %v11941_v24  ;;  %v9426_v42 = vpop.f32.mrb[76].mxu0 }
 0x176   :  { %v1859_v62 = vmax.f32 %v11836_v19, %v9426_v42  ;;  %v1342_v27 = vpop.f32.mrb[77].mxu0 }
 0x177   :  { %v1857_v0 = vmax.f32 %v11838_v41, %v1342_v27  ;;  %v9427_v50 = vpop.f32.mrb[78].mxu0  ;;  %v14440_v41 = vmax.f32 %v11587_v6, %v11719_v60 }
 0x178   :  { %v11955_v28 = vmax.f32 %v14436_v2, %v1859_v62  ;;  %v1860_v26 = vmax.f32 %v11843_v1, %v9427_v50  ;;  %v1345_v53 = vpop.f32.mrb[79].mxu0 }
 0x179   :  { %v11961_v58 = vmax.f32 %v14438_v13, %v1857_v0  ;;  %v1858_v19 = vmax.f32 %v11848_v56, %v1345_v53  ;;  %v11303_v56 = vld [vmem:[%s14223_s0 + $0x2f8] sm:$0xff]   ;;  %v14460_v53 = vmax.f32 %v11628_v21, %v11780_v48 }
 0x17a   :  { %14437 = vst [vmem:[#allocation26_spill] sm:$0xff] %v11955_v28  ;;  %v11967_v51 = vmax.f32 %v14440_v41, %v1860_v26  ;;  %9533 = vmatmul.mubr.msk.bf16.gmra.mrb[184].mxu0 %vm708_vm2, %v11301_v46  ;;  %v14455_v46 = vmax.f32 %v11624_v20, %v11774_v44 }
 0x17b   :  { %14439 = vst [vmem:[#allocation27_spill] sm:$0xff] %v11961_v58  ;;  %v11973_v55 = vmax.f32 %v14442_v3, %v1858_v19  ;;  %9536 = vmatprep.mubr.msk.bf16.mxu0 %vm708_vm2, %v11302_v7  ;;  %v14461_v19 = vld [vmem:[#allocation16_spill] sm:$0xff] }
 0x17c   :  { %14441 = vst [vmem:[#allocation28_spill] sm:$0xff] %v11967_v51 }
 0x17d   :  { %14443 = vst [vmem:[#allocation29_spill] sm:$0xff] %v11973_v55  ;;  %v9430_v1 = vpop.f32.mrb[80].mxu0 }
 0x17e   :  { %v1863_v4 = vmax.f32 %v11852_v23, %v9430_v1  ;;  %v1358_v57 = vpop.f32.mrb[81].mxu0  ;;  %v14462_v1 = vld [vmem:[#allocation2_spill] sm:$0xff] }
 0x17f   :  { %v1861_v6 = vmax.f32 %v11854_v38, %v1358_v57  ;;  %v9431_v60 = vpop.f32.mrb[82].mxu0 }
 0x180   :  { %v11984_v47 = vmax.f32 %v14444_v43, %v1863_v4  ;;  %v1864_v8 = vmax.f32 %v11859_v52, %v9431_v60  ;;  %v1361_v5 = vpop.f32.mrb[83].mxu0  ;;  %v14466_v60 = vld [vmem:[#allocation3_spill] sm:$0xff]  ;;  %v14467_v43 = vld [vmem:[#allocation10_spill] sm:$0xff] }
 0x181   :  { %v11990_v23 = vmax.f32 %v14446_v29, %v1861_v6  ;;  %v1862_v30 = vmax.f32 %v11864_v45, %v1361_v5  ;;  %v14452_v45 = vmax.f32 %v11612_v15, %v11756_v34  ;;  %v14454_v15 = vmax.f32 %v11619_v18, %v11767_v40 }
 0x182   :  { %14445 = vst [vmem:[#allocation30_spill] sm:$0xff] %v11984_v47  ;;  %v11996_v38 = vmax.f32 %v14448_v36, %v1864_v8  ;;  %9537 = vmatmul.mubr.msk.bf16.gmra.mrb[188].mxu0 %vm708_vm2, %v11303_v56  ;;  %v14465_v56 = vld [vmem:[#allocation17_spill] sm:$0xff]  ;;  %v14468_v8 = vmax.f32 %v14466_v60, %v14467_v43  ;;  %v14471_v36 = vld [vmem:[#allocation11_spill] sm:$0xff] }
 0x183   :  { %14447 = vst [vmem:[#allocation31_spill] sm:$0xff] %v11990_v23  ;;  %v12002_v11 = vmax.f32 %v14450_v9, %v1862_v30  ;;  %v14470_v30 = vld [vmem:[#allocation4_spill] sm:$0xff]  ;;  %v14496_v60 = vld [vmem:[#allocation15_spill] sm:$0xff] }
 0x184   :  { %14449 = vst [vmem:[#allocation32_spill] sm:$0xff] %v11996_v38  ;;  %v14472_v9 = vmax.f32 %v14470_v30, %v14471_v36 }
 0x185   :  { %14451 = vst [vmem:[#allocation33_spill] sm:$0xff] %v12002_v11  ;;  %v9434_v52 = vpop.f32.mrb[84].mxu0 }
 0x186   :  { %v1867_v61 = vmax.f32 %v11868_v59, %v9434_v52  ;;  %v1374_v10 = vpop.f32.mrb[85].mxu0 }
 0x187   :  { %v1865_v17 = vmax.f32 %v11870_v63, %v1374_v10  ;;  %v9435_v42 = vpop.f32.mrb[86].mxu0 }
 0x188   :  { %v1915_v12 = vmax.f32 %v14452_v45, %v1867_v61  ;;  %v1868_v25 = vmax.f32 %v11875_v35, %v9435_v42  ;;  %v1377_v62 = vpop.f32.mrb[87].mxu0 }
 0x189   :  { %v1913_v59 = vmax.f32 %v14453_v31, %v1865_v17  ;;  %v1866_v27 = vmax.f32 %v11880_v32, %v1377_v62 }
 0x18a   :  { %v1970_v63 = vadd.f32 %v12013_v14, %v1915_v12  ;;  %v1916_v34 = vmax.f32 %v14454_v15, %v1868_v25  ;;  %v14475_v12 = vld [vmem:[#allocation18_spill] sm:$0xff] }
 0x18b   :  { %v1968_v35 = vadd.f32 %v12013_v14, %v1913_v59  ;;  %v1914_v0 = vmax.f32 %v14455_v46, %v1866_v27  ;;  %v14478_v27 = vld [vmem:[#allocation19_spill] sm:$0xff]  ;;  %v14481_v46 = vld [vmem:[#allocation5_spill] sm:$0xff] }
 0x18c   :  { %v1971_v50 = vadd.f32 %v12013_v14, %v1916_v34  ;;  %v12031_v37 = vmax.f32 %v1970_v63, 0.0 }
 0x18d   :  { %v12028_v7 = vmax.f32 %v1968_v35, 0.0  ;;  %v1969_v16 = vadd.f32 %v12013_v14, %v1914_v0  ;;  %v9438_v32 = vpop.f32.mrb[88].mxu0  ;;  %v14482_v0 = vld [vmem:[#allocation12_spill] sm:$0xff] }
 0x18e   :  { %14457 = vst [vmem:[#allocation35_spill] sm:$0xff] %v12031_v37  ;;  %v1871_v2 = vmax.f32 %v11884_v49, %v9438_v32  ;;  %v1390_v18 = vpop.f32.mrb[89].mxu0  ;;  %v12034_v40 = vmax.f32 %v1971_v50, 0.0  ;;  %v14463_v49 = vld [vmem:[#allocation9_spill] sm:$0xff]  ;;  %v12058_v21 = vrot.slane %v12031_v37, 1  ;;  %v14483_v50 = vmax.f32 %v14481_v46, %v14482_v0  ;;  %v14485_v32 = vld [vmem:[#allocation20_spill] sm:$0xff] }
 0x18f   :  { %14456 = vst [vmem:[#allocation34_spill] sm:$0xff] %v12028_v7  ;;  %v12036_v26 = vmax.f32 %v1969_v16, 0.0  ;;  %v1869_v20 = vmax.f32 %v11886_v54, %v1390_v18  ;;  %v9439_v44 = vpop.f32.mrb[90].mxu0  ;;  %9548 = vmatprep.mubr.msk.f32.mxu0 %vm2399_vm3, %v12028_v7  ;;  %v14464_v4 = vmax.f32 %v14462_v1, %v14463_v49  ;;  %v14491_v1 = vld [vmem:[#allocation7_spill] sm:$0xff]  ;;  %v14492_v49 = vld [vmem:[#allocation14_spill] sm:$0xff] }
 0x190   :  { %14458 = vst [vmem:[#allocation36_spill] sm:$0xff] %v12034_v40  ;;  %v1919_v13 = vmax.f32 %v14460_v53, %v1871_v2  ;;  %v1872_v41 = vmax.f32 %v14461_v19, %v9439_v44  ;;  %v1393_v3 = vpop.f32.mrb[91].mxu0  ;;  %14469 = vst [vmem:[#allocation16_spill] sm:$0xff] %v12058_v21  ;;  %v12069_v61 = vrot.slane %v12034_v40, 1  ;;  %v14487_v44 = vld [vmem:[#allocation13_spill] sm:$0xff] }
 0x191   :  { %14459 = vst [vmem:[#allocation37_spill] sm:$0xff] %v12036_v26  ;;  %v1917_v57 = vmax.f32 %v14464_v4, %v1869_v20  ;;  %v1870_v6 = vmax.f32 %v14465_v56, %v1393_v3  ;;  %9549 = vmatmul.mubr.msk.f32.vlgmr.msra.gmra.mrb[192].mxu0 %vm2399_vm3, %v12036_v26  ;;  %v14242_v54 = vrot.slane %v12036_v26, 1  ;;  %v14486_v20 = vld [vmem:[#allocation6_spill] sm:$0xff]  ;;  %v14489_v19 = vld [vmem:[#allocation21_spill] sm:$0xff]  ;;  %v14493_v4 = vmax.f32 %v14491_v1, %v14492_v49  ;;  %v8246_v1 = vld [vmem:[%s14224_s3 + $0x148] sm:$0xff] }
 0x192   :  { %v1920_v5 = vmax.f32 %v14468_v8, %v1872_v41  ;;  %9551 = vmatprep.mubr.msk.f32.mxu0 %vm2399_vm3, %v12031_v37  ;;  %v1974_v48 = vadd.f32 %v12013_v14, %v1919_v13  ;;  %14473 = vst [vmem:[#allocation2_spill] sm:$0xff] %v12069_v61  ;;  %v14488_v53 = vmax.f32 %v14486_v20, %v14487_v44 }
 0x193   :  { %v1972_v29 = vadd.f32 %v12013_v14, %v1917_v57  ;;  %v1918_v52 = vmax.f32 %v14472_v9, %v1870_v6  ;;  %9836 = vmatprep.mubr.msk.f32.mxu1 %vm2399_vm3, %v14242_v54  ;;  %v14495_v6 = vld [vmem:[#allocation8_spill] sm:$0xff] }
 0x194   :  { %v1975_v10 = vadd.f32 %v12013_v14, %v1920_v5  ;;  %9837 = vmatmul.mubr.msk.f32.vlgmr.msra.gmra.mrb[0].mxu1 %vm2399_vm3, %v12058_v21  ;;  %v12082_v31 = vmax.f32 %v1974_v48, 0.0  ;;  %v14497_v43 = vmax.f32 %v14495_v6, %v14496_v60  ;;  %v8085_v21 = vld [vmem:[%s14224_s3 + $0x40] sm:$0xff] }
 0x195   :  { %v12074_v17 = vmax.f32 %v1972_v29, 0.0  ;;  %v1973_v42 = vadd.f32 %v12013_v14, %v1918_v52  ;;  %v9442_v45 = vpop.f32.mrb[92].mxu0  ;;  %9552 = vmatmul.mubr.msk.f32.gmra.mrb[194].mxu0 %vm2399_vm3, %v12034_v40  ;;  %9839 = vmatprep.mubr.msk.f32.mxu1 %vm2399_vm3, %v12069_v61 }
 0x196   :  { %v1875_v25 = vmax.f32 %v14475_v12, %v9442_v45  ;;  %v1406_v62 = vpop.f32.mrb[93].mxu0  ;;  %14476 = vst [vmem:[#allocation17_spill] sm:$0xff] %v12082_v31  ;;  %v12092_v35 = vmax.f32 %v1975_v10, 0.0  ;;  %v12127_v5 = vrot.slane %v12082_v31, 1 }
 0x197   :  { %14474 = vst [vmem:[#allocation9_spill] sm:$0xff] %v12074_v17  ;;  %v12084_v59 = vmax.f32 %v1973_v42, 0.0  ;;  %v1873_v63 = vmax.f32 %v14478_v27, %v1406_v62  ;;  %v9443_v15 = vpop.f32.mrb[94].mxu0  ;;  %9554 = vmatprep.mubr.msk.f32.mxu0 %vm2399_vm3, %v12074_v17  ;;  %v12090_v34 = vrot.slane %v12074_v17, 1 }
 0x198   :  { %14480 = vst [vmem:[#allocation4_spill] sm:$0xff] %v12092_v35  ;;  %v12097_v16 = vmax.f32 %v14483_v50, %v1875_v25  ;;  %v1876_v2 = vmax.f32 %v14485_v32, %v9443_v15  ;;  %v1409_v18 = vpop.f32.mrb[95].mxu0  ;;  %14499 = vst [vmem:[#allocation12_spill] sm:$0xff] %v12127_v5  ;;  %v12130_v48 = vrot.slane %v12092_v35, 1 }
 0x199   :  { %14477 = vst [vmem:[#allocation3_spill] sm:$0xff] %v12084_v59  ;;  %14479 = vst [vmem:[#allocation10_spill] sm:$0xff] %v12090_v34  ;;  %v1921_v13 = vmax.f32 %v14488_v53, %v1873_v63  ;;  %v1874_v41 = vmax.f32 %v14489_v19, %v1409_v18  ;;  %9555 = vmatmul.mubr.msk.f32.gmra.mrb[196].mxu0 %vm2399_vm3, %v12084_v59  ;;  %9840 = vmatmul.mubr.msk.f32.gmra.mrb[2].mxu1 %vm2399_vm3, %v12090_v34  ;;  %v12109_v3 = vrot.slane %v12084_v59, 1 }
 0x19a   :  { %14484 = vst [vmem:[#allocation11_spill] sm:$0xff] %v12097_v16  ;;  %v12114_v57 = vmax.f32 %v14493_v4, %v1876_v2  ;;  %9557 = vmatprep.mubr.msk.f32.mxu0 %vm2399_vm3, %v12082_v31  ;;  %14500 = vst [vmem:[#allocation20_spill] sm:$0xff] %v12130_v48 }
 0x19b   :  { %14490 = vst [vmem:[#allocation18_spill] sm:$0xff] %v12109_v3  ;;  %v1976_v56 = vadd.f32 %v12013_v14, %v1921_v13  ;;  %v12122_v8 = vmax.f32 %v14497_v43, %v1874_v41  ;;  %9842 = vmatprep.mubr.msk.f32.mxu1 %vm2399_vm3, %v12109_v3  ;;  %v8245_v41 = vld [vmem:[%s14224_s3 + $0x140] sm:$0xff] }
 0x19c   :  { %14494 = vst [vmem:[#allocation19_spill] sm:$0xff] %v12114_v57  ;;  %v10580_v4 = vpack.c.bf16 %v8246_v1, %v8245_v41  ;;  %v2390_v43 = vld [vmem:[%s14224_s3] sm:$0xff]  ;;  %v2391_v57 = vld [vmem:[%s14224_s3 + $0x8] sm:$0xff]  ;;  %v8247_v41 = vld [vmem:[%s14224_s3 + $0x150] sm:$0xff] }
 0x19d   :  { %14498 = vst [vmem:[#allocation5_spill] sm:$0xff] %v12122_v8  ;;  %v12132_v29 = vmax.f32 %v1976_v56, 0.0  ;;  %v12134_v30 = vpop.f32.mrb[96].mxu0  ;;  %9558 = vmatmul.mubr.msk.f32.gmra.mrb[198].mxu0 %vm2399_vm3, %v12092_v35  ;;  %9843 = vmatmul.mubr.msk.f32.gmra.mrb[4].mxu1 %vm2399_vm3, %v12127_v5  ;;  %v2392_v5 = vld [vmem:[%s14224_s3 + $0x10] sm:$0xff] }
 0x19e   :  { %v12140_v36 = vpop.f32.mrb[97].mxu0  ;;  %9845 = vmatprep.mubr.msk.f32.mxu1 %vm2399_vm3, %v12130_v48  ;;  %10581 = vmatprep.subr.bf16.mxu1 %v10580_v4 }
 0x19f   :  { %14501 = vst [vmem:[#allocation6_spill] sm:$0xff] %v12132_v29  ;;  %v12144_v9 = vpop.f32.mrb[98].mxu0  ;;  %v12147_v52 = vrot.slane %v12132_v29, 1  ;;  %10583 = vmatpush3.bf16.msra.mxu1 %v10580_v4  ;;  %v8248_v4 = vld [vmem:[%s14224_s3 + $0x158] sm:$0xff] }
 0x1a0   :  { %v12149_v10 = vpop.f32.mrb[99].mxu0  ;;  %v10584_v11 = vpack.c.bf16 %v8248_v4, %v8247_v41 }
 0x1a1   :  { %14502 = vst [vmem:[#allocation13_spill] sm:$0xff] %v12147_v52  ;;  %9846 = vmatmul.mubr.msk.f32.gmra.mrb[6].mxu1 %vm2399_vm3, %v12147_v52  ;;  %v10508_v52 = vpack.c.bf16 %v2391_v57, %v2390_v43  ;;  %v2393_v57 = vld [vmem:[%s14224_s3 + $0x18] sm:$0xff] }
 0x1a2   :  { %10585 = vmatprep.subr.bf16.mxu1 %v10584_v11  ;;  %v10512_v43 = vpack.c.bf16 %v2393_v57, %v2392_v5  ;;  %v8265_v5 = vld [vmem:[%s14224_s3 + $0x160] sm:$0xff]  ;;  %v8266_v57 = vld [vmem:[%s14224_s3 + $0x168] sm:$0xff] }
 0x1a3   :  { %10509 = vmatprep.subr.bf16.mxu0 %v10508_v52  ;;  %10587 = vmatpush3.bf16.msra.mxu1 %v10584_v11 }
 0x1a4   :  { %10511 = vmatpush3.bf16.msra.mxu0 %v10508_v52 }
 0x1a5   :  { %v12153_v42 = vpop.f32.mrb[100].mxu0  ;;  %10513 = vmatprep.subr.bf16.mxu0 %v10512_v43 }
 0x1a6   :  { %v12155_v45 = vpop.f32.mrb[101].mxu0 }
 0x1a7   :  { %v12157_v12 = vpop.f32.mrb[102].mxu0 }
 0x1a8   :  { %v12159_v25 = vpop.f32.mrb[103].mxu0  ;;  %10515 = vmatpush3.bf16.msra.mxu0 %v10512_v43  ;;  %v12271_v43 = vpack.c.bf16 %v8266_v57, %v8265_v5  ;;  %v8086_v5 = vld [vmem:[%s14224_s3 + $0x48] sm:$0xff] }
 0x1a9   :  { %v12326_v3 = vpack.c.bf16 %v8086_v5, %v8085_v21 }
 0x1aa   :  { %14511 = vst [vmem:[#allocation41_spill] sm:$0xff] %v12271_v43  ;;  %10589 = vmatprep.subr.bf16.mxu1 %v12271_v43 }
 0x1ab   :  { %14520 = vst [vmem:[#allocation50_spill] sm:$0xff] %v12326_v3  ;;  %10517 = vmatprep.subr.bf16.mxu0 %v12326_v3 }
 0x1ad   :  { %v12161_v62 = vpop.f32.mrb[104].mxu0 }
 0x1ae   :  { %v12163_v27 = vpop.f32.mrb[105].mxu0 }
 0x1af   :  { %v12165_v63 = vpop.f32.mrb[106].mxu0 }
 0x1b0   :  { %v12167_v15 = vpop.f32.mrb[107].mxu0 }
 0x1b5   :  { %v12169_v46 = vpop.f32.mrb[108].mxu0 }
 0x1b6   :  { %v12171_v0 = vpop.f32.mrb[109].mxu0 }
 0x1b7   :  { %v12173_v50 = vpop.f32.mrb[110].mxu0 }
 0x1b8   :  { %v12175_v32 = vpop.f32.mrb[111].mxu0 }
 0x1bd   :  { %v12177_v2 = vpop.f32.mrb[112].mxu0 }
 0x1be   :  { %14503 = vst [vmem:[#allocation21_spill] sm:$0xff] %v12177_v2  ;;  %v12179_v18 = vpop.f32.mrb[113].mxu0 }
 0x1bf   :  { %14504 = vst [vmem:[#allocation7_spill] sm:$0xff] %v12179_v18  ;;  %v12181_v20 = vpop.f32.mrb[114].mxu0 }
 0x1c0   :  { %14505 = vst [vmem:[#allocation14_spill] sm:$0xff] %v12181_v20  ;;  %v12183_v44 = vpop.f32.mrb[115].mxu0 }
 0x1c1   :  { %14506 = vst [vmem:[#allocation8_spill] sm:$0xff] %v12183_v44 }
 0x1c5   :  { %v12185_v53 = vpop.f32.mrb[116].mxu0 }
 0x1c6   :  { %14507 = vst [vmem:[#allocation15_spill] sm:$0xff] %v12185_v53  ;;  %v12187_v13 = vpop.f32.mrb[117].mxu0 }
 0x1c7   :  { %14508 = vst [vmem:[#allocation38_spill] sm:$0xff] %v12187_v13  ;;  %v12189_v19 = vpop.f32.mrb[118].mxu0 }
 0x1c8   :  { %14509 = vst [vmem:[#allocation39_spill] sm:$0xff] %v12189_v19  ;;  %v12197_v49 = vpop.f32.mrb[119].mxu0 }
 0x1c9   :  { %14510 = vst [vmem:[#allocation40_spill] sm:$0xff] %v12197_v49 }
 0x1cd   :  { %v12199_v56 = vpop.f32.mrb[120].mxu0 }
 0x1ce   :  { %v12203_v60 = vpop.f32.mrb[121].mxu0 }
 0x1cf   :  { %v12207_v54 = vpop.f32.mrb[122].mxu0 }
 0x1d0   :  { %v12211_v38 = vpop.f32.mrb[123].mxu0 }
 0x1d5   :  { %v12215_v1 = vpop.f32.mrb[124].mxu0 }
 0x1d6   :  { %v12219_v6 = vpop.f32.mrb[125].mxu0 }
 0x1d7   :  { %v12229_v47 = vpop.f32.mrb[126].mxu0 }
 0x1d8   :  { %v12239_v48 = vpop.f32.mrb[127].mxu0 }
 0x1dd   :  { %v12249_v8 = vpop.f32.mrb[128].mxu0 }
 0x1de   :  { %v12253_v4 = vpop.f32.mrb[129].mxu0 }
 0x1df   :  { %v12257_v16 = vpop.f32.mrb[130].mxu0 }
 0x1e0   :  { %v12261_v34 = vpop.f32.mrb[131].mxu0 }
 0x1e5   :  { %v12273_v52 = vpop.f32.mrb[132].mxu0 }
 0x1e6   :  { %v12278_v41 = vpop.f32.mrb[133].mxu0 }
 0x1e7   :  { %v12282_v61 = vpop.f32.mrb[134].mxu0 }
 0x1e8   :  { %v12286_v7 = vpop.f32.mrb[135].mxu0 }
 0x1ed   :  { %v12290_v57 = vpop.f32.mrb[136].mxu0 }
 0x1ee   :  { %14512 = vst [vmem:[#allocation42_spill] sm:$0xff] %v12290_v57  ;;  %v12294_v29 = vpop.f32.mrb[137].mxu0  ;;  %v14527_v57 = vmax.f32 %v12134_v30, %v12199_v56 }
 0x1ef   :  { %14513 = vst [vmem:[#allocation43_spill] sm:$0xff] %v12294_v29  ;;  %v12298_v35 = vpop.f32.mrb[138].mxu0 }
 0x1f0   :  { %14514 = vst [vmem:[#allocation44_spill] sm:$0xff] %v12298_v35  ;;  %v12302_v31 = vpop.f32.mrb[139].mxu0 }
 0x1f1   :  { %14515 = vst [vmem:[#allocation45_spill] sm:$0xff] %v12302_v31 }
 0x1f5   :  { %v12306_v59 = vpop.f32.mrb[140].mxu0 }
 0x1f6   :  { %14516 = vst [vmem:[#allocation46_spill] sm:$0xff] %v12306_v59  ;;  %v12310_v17 = vpop.f32.mrb[141].mxu0 }
 0x1f7   :  { %14517 = vst [vmem:[#allocation47_spill] sm:$0xff] %v12310_v17  ;;  %v12314_v40 = vpop.f32.mrb[142].mxu0 }
 0x1f8   :  { %14518 = vst [vmem:[#allocation48_spill] sm:$0xff] %v12314_v40  ;;  %v12324_v26 = vpop.f32.mrb[143].mxu0 }
 0x1f9   :  { %14519 = vst [vmem:[#allocation49_spill] sm:$0xff] %v12324_v26 }
 0x1fd   :  { %v9494_v23 = vpop.f32.mrb[144].mxu0 }
 0x1fe   :  { %v1614_v43 = vpop.f32.mrb[145].mxu0 }
 0x1ff   :  { %v9495_v51 = vpop.f32.mrb[146].mxu0 }
 0x200   :  { %v1617_v28 = vpop.f32.mrb[147].mxu0 }
 0x205   :  { %v9498_v55 = vpop.f32.mrb[148].mxu0 }
 0x206   :  { %v1630_v58 = vpop.f32.mrb[149].mxu0 }
 0x207   :  { %v9499_v33 = vpop.f32.mrb[150].mxu0 }
 0x208   :  { %v1633_v22 = vpop.f32.mrb[151].mxu0 }
 0x20d   :  { %v9502_v17 = vpop.f32.mrb[152].mxu0 }
 0x20e   :  { %v1646_v13 = vpop.f32.mrb[153].mxu0 }
 0x20f   :  { %v9503_v37 = vpop.f32.mrb[154].mxu0 }
 0x210   :  { %v1649_v40 = vpop.f32.mrb[155].mxu0 }
 0x215   :  { %v9506_v19 = vpop.f32.mrb[156].mxu0 }
 0x216   :  { %v1662_v21 = vpop.f32.mrb[157].mxu0 }
 0x217   :  { %v9507_v5 = vpop.f32.mrb[158].mxu0 }
 0x218   :  { %v1665_v59 = vpop.f32.mrb[159].mxu0 }
 0x21d   :  { %v12331_v53 = vpop.f32.mrb[160].mxu0 }
 0x21e   :  { %v12333_v11 = vpop.f32.mrb[161].mxu0 }
 0x21f   :  { %v12335_v3 = vpop.f32.mrb[162].mxu0 }
 0x220   :  { %14521 = vst [vmem:[#allocation51_spill] sm:$0xff] %v12335_v3  ;;  %v12337_v26 = vpop.f32.mrb[163].mxu0 }
 0x221   :  { %14522 = vst [vmem:[#allocation52_spill] sm:$0xff] %v12337_v26 }
 0x225   :  { %v12339_v49 = vpop.f32.mrb[164].mxu0 }
 0x226   :  { %14523 = vst [vmem:[#allocation53_spill] sm:$0xff] %v12339_v49  ;;  %v12341_v24 = vpop.f32.mrb[165].mxu0  ;;  %v14528_v49 = vmax.f32 %v12140_v36, %v12203_v60 }
 0x227   :  { %14524 = vst [vmem:[#allocation54_spill] sm:$0xff] %v12341_v24  ;;  %v12343_v39 = vpop.f32.mrb[166].mxu0 }
 0x228   :  { %14525 = vst [vmem:[#allocation55_spill] sm:$0xff] %v12343_v39  ;;  %v12345_v31 = vpop.f32.mrb[167].mxu0 }
 0x229   :  { %14526 = vst [vmem:[#allocation56_spill] sm:$0xff] %v12345_v31  ;;  %v14529_v31 = vmax.f32 %v12144_v9, %v12207_v54  ;;  %v14532_v54 = vmax.f32 %v12155_v45, %v12219_v6  ;;  %v14535_v45 = vmax.f32 %v12161_v62, %v12249_v8 }
 0x22d   :  { %v9518_v44 = vpop.f32.mrb[168].mxu0 }
 0x22e   :  { %v1879_v35 = vmax.f32 %v9494_v23, %v9518_v44  ;;  %v1710_v20 = vpop.f32.mrb[169].mxu0 }
 0x22f   :  { %v1877_v29 = vmax.f32 %v1614_v43, %v1710_v20  ;;  %v9519_v18 = vpop.f32.mrb[170].mxu0  ;;  %v14530_v20 = vmax.f32 %v12149_v10, %v12211_v38 }
 0x230   :  { %v12350_v2 = vmax.f32 %v14527_v57, %v1879_v35  ;;  %v1880_v3 = vmax.f32 %v9495_v51, %v9519_v18  ;;  %v1713_v26 = vpop.f32.mrb[171].mxu0 }
 0x231   :  { %v12355_v24 = vmax.f32 %v14528_v49, %v1877_v29  ;;  %v1878_v39 = vmax.f32 %v1617_v28, %v1713_v26  ;;  %v14531_v29 = vmax.f32 %v12153_v42, %v12215_v1 }
 0x232   :  { %v12360_v23 = vmax.f32 %v14529_v31, %v1880_v3 }
 0x233   :  { %v12365_v44 = vmax.f32 %v14530_v20, %v1878_v39  ;;  %v14533_v39 = vmax.f32 %v12157_v12, %v12229_v47  ;;  %v14537_v47 = vmax.f32 %v12163_v27, %v12253_v4  ;;  %v14541_v27 = vmax.f32 %v12169_v46, %v12273_v52 }
 0x235   :  { %v9522_v35 = vpop.f32.mrb[172].mxu0 }
 0x236   :  { %v1883_v30 = vmax.f32 %v9498_v55, %v9522_v35  ;;  %v1726_v51 = vpop.f32.mrb[173].mxu0 }
 0x237   :  { %v1881_v18 = vmax.f32 %v1630_v58, %v1726_v51  ;;  %v9523_v56 = vpop.f32.mrb[174].mxu0  ;;  %v14534_v58 = vmax.f32 %v12159_v25, %v12239_v48  ;;  %v14538_v25 = vmax.f32 %v12165_v63, %v12257_v16  ;;  %v14542_v16 = vmax.f32 %v12171_v0, %v12278_v41 }
 0x238   :  { %v12370_v36 = vmax.f32 %v14531_v29, %v1883_v30  ;;  %v1884_v28 = vmax.f32 %v9499_v33, %v9523_v56  ;;  %v1729_v26 = vpop.f32.mrb[175].mxu0  ;;  %v14544_v30 = vmax.f32 %v12175_v32, %v12286_v7  ;;  %v14545_v32 = vld [vmem:[#allocation21_spill] sm:$0xff]  ;;  %v14546_v29 = vld [vmem:[#allocation42_spill] sm:$0xff] }
 0x239   :  { %v12375_v31 = vmax.f32 %v14532_v54, %v1881_v18  ;;  %v1882_v38 = vmax.f32 %v1633_v22, %v1729_v26  ;;  %v14548_v54 = vld [vmem:[#allocation51_spill] sm:$0xff] }
 0x23a   :  { %v12380_v55 = vmax.f32 %v14533_v39, %v1884_v28  ;;  %v14547_v28 = vmax.f32 %v14545_v32, %v14546_v29  ;;  %v14568_v29 = vld [vmem:[#allocation55_spill] sm:$0xff] }
 0x23b   :  { %v12385_v3 = vmax.f32 %v14534_v58, %v1882_v38  ;;  %v14549_v58 = vld [vmem:[#allocation7_spill] sm:$0xff] }
 0x23d   :  { %v9526_v9 = vpop.f32.mrb[176].mxu0 }
 0x23e   :  { %v1887_v10 = vmax.f32 %v9502_v17, %v9526_v9  ;;  %v1742_v33 = vpop.f32.mrb[177].mxu0 }
 0x23f   :  { %v1885_v42 = vmax.f32 %v1646_v13, %v1742_v33  ;;  %v9527_v49 = vpop.f32.mrb[178].mxu0  ;;  %v14540_v13 = vmax.f32 %v12167_v15, %v12261_v34  ;;  %v14543_v15 = vmax.f32 %v12173_v50, %v12282_v61  ;;  %v14552_v33 = vld [vmem:[#allocation52_spill] sm:$0xff] }
 0x240   :  { %v12390_v6 = vmax.f32 %v14535_v45, %v1887_v10  ;;  %v1888_v22 = vmax.f32 %v9503_v37, %v9527_v49  ;;  %v1745_v60 = vpop.f32.mrb[179].mxu0  ;;  %v14553_v49 = vld [vmem:[#allocation14_spill] sm:$0xff]  ;;  %v14554_v45 = vld [vmem:[#allocation44_spill] sm:$0xff] }
 0x241   :  { %v12395_v12 = vmax.f32 %v14537_v47, %v1885_v42  ;;  %v1886_v48 = vmax.f32 %v1649_v40, %v1745_v60 }
 0x242   :  { %14536 = vst [vmem:[#allocation57_spill] sm:$0xff] %v12390_v6  ;;  %v12400_v17 = vmax.f32 %v14538_v25, %v1888_v22  ;;  %v14555_v22 = vmax.f32 %v14553_v49, %v14554_v45 }
 0x243   :  { %v12405_v1 = vmax.f32 %v14540_v13, %v1886_v48  ;;  %v14556_v13 = vld [vmem:[#allocation8_spill] sm:$0xff] }
 0x244   :  { %14539 = vst [vmem:[#allocation58_spill] sm:$0xff] %v12400_v17 }
 0x245   :  { %v9530_v8 = vpop.f32.mrb[180].mxu0 }
 0x246   :  { %v1891_v62 = vmax.f32 %v9506_v19, %v9530_v8  ;;  %v1758_v37 = vpop.f32.mrb[181].mxu0  ;;  %v14557_v8 = vld [vmem:[#allocation45_spill] sm:$0xff] }
 0x247   :  { %v1889_v43 = vmax.f32 %v1662_v21, %v1758_v37  ;;  %v9531_v57 = vpop.f32.mrb[182].mxu0 }
 0x248   :  { %v1939_v4 = vmax.f32 %v14541_v27, %v1891_v62  ;;  %v1892_v40 = vmax.f32 %v9507_v5, %v9531_v57  ;;  %v1761_v20 = vpop.f32.mrb[183].mxu0  ;;  %v14558_v62 = vmax.f32 %v14556_v13, %v14557_v8  ;;  %v14579_v13 = vld [vmem:[#allocation49_spill] sm:$0xff] }
 0x249   :  { %v1937_v63 = vmax.f32 %v14542_v16, %v1889_v43  ;;  %v1890_v35 = vmax.f32 %v1665_v59, %v1761_v20  ;;  %v14559_v20 = vld [vmem:[#allocation23_spill] sm:$0xff] }
 0x24a   :  { %v1994_v34 = vadd.f32 %v12013_v14, %v1939_v4  ;;  %v1940_v19 = vmax.f32 %v14543_v15, %v1892_v40  ;;  %v1956_v16 = vadd.f32 %v12013_v14, %v14559_v20  ;;  %v14584_v20 = vld [vmem:[#allocation24_spill] sm:$0xff] }
 0x24b   :  { %v1992_v21 = vadd.f32 %v12013_v14, %v1937_v63  ;;  %v1938_v46 = vmax.f32 %v14544_v30, %v1890_v35  ;;  %v14560_v63 = vld [vmem:[#allocation53_spill] sm:$0xff] }
 0x24c   :  { %v1995_v52 = vadd.f32 %v12013_v14, %v1940_v19  ;;  %v12425_v59 = vmax.f32 %v1994_v34, 0.0 }
 0x24d   :  { %v12422_v5 = vmax.f32 %v1992_v21, 0.0  ;;  %v1993_v0 = vadd.f32 %v12013_v14, %v1938_v46  ;;  %v9534_v41 = vpop.f32.mrb[184].mxu0  ;;  %v14561_v21 = vld [vmem:[#allocation54_spill] sm:$0xff] }
 0x24e   :  { %v1895_v51 = vmax.f32 %v12331_v53, %v9534_v41  ;;  %v1774_v18 = vpop.f32.mrb[185].mxu0  ;;  %v12428_v61 = vmax.f32 %v1995_v52, 0.0  ;;  %v14550_v53 = vld [vmem:[#allocation43_spill] sm:$0xff]  ;;  %v12452_v47 = vrot.slane %v12425_v59, 1 }
 0x24f   :  { %v12430_v50 = vmax.f32 %v1993_v0, 0.0  ;;  %v1893_v56 = vmax.f32 %v12333_v11, %v1774_v18  ;;  %v9535_v7 = vpop.f32.mrb[186].mxu0  ;;  %9560 = vmatprep.mubr.msk.f32.mxu0 %vm2399_vm3, %v12422_v5  ;;  %v14551_v9 = vmax.f32 %v14549_v58, %v14550_v53  ;;  %v14562_v0 = vld [vmem:[#allocation25_spill] sm:$0xff]  ;;  %v14564_v18 = vld [vmem:[#allocation15_spill] sm:$0xff]  ;;  %v14572_v53 = vld [vmem:[#allocation56_spill] sm:$0xff] }
 0x250   :  { %v1943_v26 = vmax.f32 %v14547_v28, %v1895_v51  ;;  %v1896_v38 = vmax.f32 %v14548_v54, %v9535_v7  ;;  %v1777_v39 = vpop.f32.mrb[187].mxu0  ;;  %v12463_v43 = vrot.slane %v12428_v61, 1  ;;  %v1957_v41 = vadd.f32 %v12013_v14, %v14562_v0  ;;  %v14569_v54 = vld [vmem:[#allocation38_spill] sm:$0xff] }
 0x251   :  { %v1941_v10 = vmax.f32 %v14551_v9, %v1893_v56  ;;  %v1894_v42 = vmax.f32 %v14552_v33, %v1777_v39  ;;  %9561 = vmatmul.mubr.msk.f32.gmra.mrb[200].mxu0 %vm2399_vm3, %v12430_v50  ;;  %v14295_v11 = vrot.slane %v12430_v50, 1  ;;  %v14565_v56 = vld [vmem:[#allocation46_spill] sm:$0xff]  ;;  %v14573_v33 = vld [vmem:[#allocation39_spill] sm:$0xff] }
 0x252   :  { %v1944_v60 = vmax.f32 %v14555_v22, %v1896_v38  ;;  %9563 = vmatprep.mubr.msk.f32.mxu0 %vm2399_vm3, %v12425_v59  ;;  %v1998_v48 = vadd.f32 %v12013_v14, %v1943_v26  ;;  %v14566_v7 = vmax.f32 %v14564_v18, %v14565_v56  ;;  %v14570_v38 = vld [vmem:[#allocation47_spill] sm:$0xff]  ;;  %v14577_v22 = vld [vmem:[#allocation22_spill] sm:$0xff] }
 0x253   :  { %v1996_v25 = vadd.f32 %v12013_v14, %v1941_v10  ;;  %v1942_v37 = vmax.f32 %v14558_v62, %v1894_v42  ;;  %9848 = vmatprep.mubr.msk.f32.mxu1 %vm2399_vm3, %v14295_v11  ;;  %v14571_v39 = vmax.f32 %v14569_v54, %v14570_v38  ;;  %v14574_v42 = vld [vmem:[#allocation48_spill] sm:$0xff]  ;;  %v14590_v54 = vld [vmem:[#allocation26_spill] sm:$0xff] }
 0x254   :  { %v1999_v57 = vadd.f32 %v12013_v14, %v1944_v60  ;;  %9849 = vmatmul.mubr.msk.f32.gmra.mrb[8].mxu1 %vm2399_vm3, %v12452_v47  ;;  %v12478_v15 = vmax.f32 %v1998_v48, 0.0  ;;  %v14575_v49 = vmax.f32 %v14573_v33, %v14574_v42  ;;  %v1958_v60 = vadd.f32 %v12013_v14, %v14577_v22  ;;  %v14592_v42 = vld [vmem:[#allocation50_spill] sm:$0xff]  ;;  %v8287_v11 = vld [vmem:[%s14224_s3 + $0x190] sm:$0xff] }
 0x255   :  { %v12468_v27 = vmax.f32 %v1996_v25, 0.0  ;;  %v1997_v4 = vadd.f32 %v12013_v14, %v1942_v37  ;;  %v9538_v40 = vpop.f32.mrb[188].mxu0  ;;  %9564 = vmatmul.mubr.msk.f32.gmra.mrb[202].mxu0 %vm2399_vm3, %v12428_v61  ;;  %9851 = vmatprep.mubr.msk.f32.mxu1 %vm2399_vm3, %v12463_v43  ;;  %v14578_v25 = vld [vmem:[#allocation40_spill] sm:$0xff]  ;;  %v1962_v38 = vadd.f32 %v12013_v14, %v14590_v54  ;;  %v8105_v22 = vld [vmem:[%s14224_s3 + $0x60] sm:$0xff] }
 0x256   :  { %v1899_v35 = vmax.f32 %v14560_v63, %v9538_v40  ;;  %v1790_v34 = vpop.f32.mrb[189].mxu0  ;;  %v12490_v51 = vmax.f32 %v1999_v57, 0.0  ;;  %v14580_v8 = vmax.f32 %v14578_v25, %v14579_v13  ;;  %v12527_v37 = vrot.slane %v12478_v15, 1  ;;  %v8285_v25 = vld [vmem:[%s14224_s3 + $0x180] sm:$0xff]  ;;  %v8286_v13 = vld [vmem:[%s14224_s3 + $0x188] sm:$0xff] }
 0x257   :  { %v12480_v19 = vmax.f32 %v1997_v4, 0.0  ;;  %v1897_v30 = vmax.f32 %v14561_v21, %v1790_v34  ;;  %v9539_v46 = vpop.f32.mrb[190].mxu0  ;;  %9566 = vmatprep.mubr.msk.f32.mxu0 %vm2399_vm3, %v12468_v27  ;;  %v12486_v52 = vrot.slane %v12468_v27, 1  ;;  %v12529_v57 = vmax.f32 %v1956_v16, 0.0  ;;  %v8087_v16 = vld [vmem:[%s14224_s3 + $0x50] sm:$0xff]  ;;  %v8088_v34 = vld [vmem:[%s14224_s3 + $0x58] sm:$0xff] }
 0x258   :  { %14563 = vst [vmem:[#allocation21_spill] sm:$0xff] %v12490_v51  ;;  %v12495_v32 = vmax.f32 %v14566_v7, %v1899_v35  ;;  %v1900_v28 = vmax.f32 %v14568_v29, %v9539_v46  ;;  %v1793_v26 = vpop.f32.mrb[191].mxu0  ;;  %14582 = vst [vmem:[#allocation43_spill] sm:$0xff] %v12527_v37  ;;  %v12531_v4 = vmax.f32 %v1957_v41, 0.0  ;;  %v12534_v40 = vrot.slane %v12490_v51, 1  ;;  %v14588_v41 = vld [vmem:[#allocation29_spill] sm:$0xff] }
 0x259   :  { %v1945_v58 = vmax.f32 %v14571_v39, %v1897_v30  ;;  %v1898_v9 = vmax.f32 %v14572_v53, %v1793_v26  ;;  %9567 = vmatmul.mubr.msk.f32.gmra.mrb[204].mxu0 %vm2399_vm3, %v12480_v19  ;;  %9852 = vmatmul.mubr.msk.f32.gmra.mrb[10].mxu1 %vm2399_vm3, %v12486_v52  ;;  %v12507_v10 = vrot.slane %v12480_v19, 1  ;;  %v1959_v63 = vadd.f32 %v12013_v14, %v14584_v20  ;;  %v14586_v30 = vld [vmem:[#allocation27_spill] sm:$0xff]  ;;  %v8267_v7 = vld [vmem:[%s14224_s3 + $0x170] sm:$0xff]  ;;  %v8268_v29 = vld [vmem:[%s14224_s3 + $0x178] sm:$0xff] }
 0x25a   :  { %14567 = vst [vmem:[#allocation42_spill] sm:$0xff] %v12495_v32  ;;  %v12512_v45 = vmax.f32 %v14575_v49, %v1900_v28  ;;  %9569 = vmatprep.mubr.msk.f32.mxu0 %vm2399_vm3, %v12478_v15  ;;  %14583 = vst [vmem:[#allocation52_spill] sm:$0xff] %v12534_v40  ;;  %v12554_v21 = vmax.f32 %v1958_v60, 0.0  ;;  %v1960_v46 = vadd.f32 %v12013_v14, %v14586_v30  ;;  %v14294_v56 = vrot.slane %v12531_v4, 2  ;;  %v8106_v60 = vld [vmem:[%s14224_s3 + $0x68] sm:$0xff]  ;;  %v14593_v20 = vld [vmem:[#allocation41_spill] sm:$0xff] }
 0x25b   :  { %v2000_v48 = vadd.f32 %v12013_v14, %v1945_v58  ;;  %v12522_v62 = vmax.f32 %v14580_v8, %v1898_v9  ;;  %9854 = vmatprep.mubr.msk.f32.mxu1 %vm2399_vm3, %v12507_v10  ;;  %v1961_v18 = vadd.f32 %v12013_v14, %v14588_v41  ;;  %v10520_v28 = vpack.c.bf16 %v8088_v34, %v8087_v16  ;;  %v14591_v58 = vld [vmem:[#allocation28_spill] sm:$0xff]  ;;  %v14594_v16 = vld [vmem:[#allocation31_spill] sm:$0xff] }
 0x25c   :  { %14576 = vst [vmem:[#allocation51_spill] sm:$0xff] %v12512_v45  ;;  %v12570_v26 = vmax.f32 %v1959_v63, 0.0  ;;  %v12583_v39 = vmax.f32 %v1960_v46, 0.0  ;;  %v1963_v53 = vadd.f32 %v12013_v14, %v14591_v58  ;;  %v12588_v9 = vrot.slane %v12554_v21, 2  ;;  %v14609_v32 = vld [vmem:[#allocation35_spill] sm:$0xff] }
 0x25d   :  { %14581 = vst [vmem:[#allocation7_spill] sm:$0xff] %v12522_v62  ;;  %v12538_v35 = vmax.f32 %v2000_v48, 0.0  ;;  %9570 = vmatmul.mubr.msk.f32.gmra.mrb[206].mxu0 %vm2399_vm3, %v12490_v51  ;;  %9855 = vmatmul.mubr.msk.f32.gmra.mrb[12].mxu1 %vm2399_vm3, %v12527_v37  ;;  %v10592_v33 = vpack.c.bf16 %v8268_v29, %v8267_v7  ;;  %v12591_v49 = vmax.f32 %v1961_v18, 0.0  ;;  %v12612_v8 = vmax.f32 %v1962_v38, 0.0 }
 0x25e   :  { %9580 = vmatprep.mubr.msk.f32.mxu0 %vm2399_vm3, %v12529_v57  ;;  %9857 = vmatprep.mubr.msk.f32.mxu1 %vm2399_vm3, %v12534_v40  ;;  %14589 = vst [vmem:[#allocation8_spill] sm:$0xff] %v12570_v26  ;;  %v12604_v48 = vrot.slane %v12570_v26, 2  ;;  %v12617_v63 = vmax.f32 %v1963_v53, 0.0  ;;  %v1964_v34 = vadd.f32 %v12013_v14, %v14594_v16  ;;  %v12624_v30 = vrot.slane %v12583_v39, 2 }
 0x25f   :  { %14585 = vst [vmem:[#allocation14_spill] sm:$0xff] %v12538_v35  ;;  %v12559_v0 = vrot.slane %v12538_v35, 1  ;;  %v12626_v46 = vpack.c.bf16 %v8106_v60, %v8105_v22  ;;  %v1980_v41 = vadd.f32 %v12013_v14, %v12355_v24  ;;  %v1981_v18 = vadd.f32 %v12013_v14, %v12365_v44 }
 0x260   :  { %v12633_v7 = vrot.slane %v12591_v49, 2  ;;  %v12635_v29 = vpack.c.bf16 %v8286_v13, %v8285_v25  ;;  %v12645_v24 = vmax.f32 %v1964_v34, 0.0  ;;  %v1982_v44 = vadd.f32 %v12013_v14, %v12350_v2 }
 0x261   :  { %14587 = vst [vmem:[#allocation44_spill] sm:$0xff] %v12559_v0  ;;  %9581 = vmatmul.mubr.msk.f32.vlgmr.msra.gmra.mrb[192].mxu0 %vm2399_vm3, %v12531_v4  ;;  %9858 = vmatmul.mubr.msk.f32.gmra.mrb[14].mxu1 %vm2399_vm3, %v12559_v0  ;;  %v12653_v54 = vmax.f32 %v1980_v41, 0.0  ;;  %v1983_v38 = vadd.f32 %v12013_v14, %v12360_v23  ;;  %v12657_v58 = vmax.f32 %v1981_v18, 0.0  ;;  %v12660_v53 = vrot.slane %v12617_v63, 2  ;;  %v14615_v0 = vld [vmem:[#allocation9_spill] sm:$0xff] }
 0x262   :  { %9583 = vmatprep.mubr.msk.f32.mxu0 %vm2399_vm3, %v12554_v21  ;;  %9868 = vmatprep.mubr.msk.f32.mxu1 %vm2399_vm3, %v14294_v56  ;;  %14595 = vst [vmem:[#allocation45_spill] sm:$0xff] %v12633_v7  ;;  %v12671_v2 = vmax.f32 %v1982_v44, 0.0  ;;  %v1984_v23 = vadd.f32 %v12013_v14, %v12375_v31  ;;  %v1985_v22 = vadd.f32 %v12013_v14, %v12385_v3  ;;  %v2100_v44 = vrot.slane %v12529_v57, 1 }
 0x263   :  { %10519 = vmatpush3.bf16.msra.mxu0 %v14592_v42  ;;  %14597 = vst [vmem:[#allocation53_spill] sm:$0xff] %v12660_v53  ;;  %v12678_v42 = vmax.f32 %v1983_v38, 0.0  ;;  %v14293_v60 = vrot.slane %v12657_v58, 2  ;;  %v1986_v31 = vadd.f32 %v12013_v14, %v12370_v36  ;;  %v1987_v13 = vadd.f32 %v12013_v14, %v12380_v55 }
 0x264   :  { %10521 = vmatprep.subr.bf16.mxu0 %v10520_v28  ;;  %v12694_v25 = vmax.f32 %v1984_v23, 0.0  ;;  %v12697_v3 = vrot.slane %v12671_v2, 2  ;;  %v1988_v55 = vadd.f32 %v12013_v14, %v12395_v12  ;;  %v8107_v23 = vld [vmem:[%s14224_s3 + $0x70] sm:$0xff]  ;;  %v12781_v17 = vrot.slane %v12570_v26, 1 }
 0x265   :  { %9584 = vmatmul.mubr.msk.f32.gmra.mrb[194].mxu0 %vm2399_vm3, %v12570_v26  ;;  %9869 = vmatmul.mubr.msk.f32.vlgmr.msra.gmra.mrb[0].mxu1 %vm2399_vm3, %v12588_v9  ;;  %v12704_v16 = vrot.slane %v12678_v42, 2  ;;  %v12714_v36 = vmax.f32 %v1986_v31, 0.0  ;;  %v12721_v41 = vmax.f32 %v1987_v13, 0.0  ;;  %v14296_v31 = vrot.slane %v12531_v4, 1 }
 0x266   :  { %10591 = vmatpush3.bf16.msra.mxu1 %v14593_v20  ;;  %9586 = vmatprep.mubr.msk.f32.mxu0 %vm2399_vm3, %v12583_v39  ;;  %v12701_v20 = vmax.f32 %v1985_v22, 0.0  ;;  %v12719_v34 = vrot.slane %v12694_v25, 2  ;;  %v12734_v14 = vmax.f32 %v1988_v55, 0.0  ;;  %v8108_v22 = vld [vmem:[%s14224_s3 + $0x78] sm:$0xff]  ;;  %v12761_v55 = vrot.slane %v12554_v21, 1  ;;  %14608 = vst [vmem:[#allocation48_spill] sm:$0xff] %v12781_v17 }
 0x267   :  { %9871 = vmatprep.mubr.msk.f32.mxu1 %vm2399_vm3, %v12604_v48  ;;  %10593 = vmatprep.subr.bf16.mxu1 %v10592_v33  ;;  %14599 = vst [vmem:[#allocation25_spill] sm:$0xff] %v12704_v16  ;;  %14601 = vst [vmem:[#allocation46_spill] sm:$0xff] %v12721_v41  ;;  %v12737_v12 = vrot.slane %v12714_v36, 2  ;;  %v12741_v38 = vrot.slane %v12721_v41, 2  ;;  %v10528_v45 = vpack.c.bf16 %v8108_v22, %v8107_v23  ;;  %v12784_v6 = vrot.slane %v14609_v32, 2 }
 0x268   :  { %10523 = vmatpush3.bf16.msra.mxu0 %v10520_v28  ;;  %v12650_v28 = vrot.slane %v12612_v8, 2  ;;  %14600 = vst [vmem:[#allocation15_spill] sm:$0xff] %v12719_v34  ;;  %v12724_v18 = vrot.slane %v12701_v20, 2  ;;  %v12758_v13 = vrot.slane %v12734_v14, 2  ;;  %14606 = vst [vmem:[#allocation39_spill] sm:$0xff] %v12761_v55  ;;  %v12788_v22 = vrot.slane %v12583_v39, 1 }
 0x269   :  { %9587 = vmatmul.mubr.msk.f32.gmra.mrb[196].mxu0 %vm2399_vm3, %v12591_v49  ;;  %9872 = vmatmul.mubr.msk.f32.gmra.mrb[2].mxu1 %vm2399_vm3, %v12624_v30  ;;  %14603 = vst [vmem:[#allocation38_spill] sm:$0xff] %v12737_v12  ;;  %14604 = vst [vmem:[#allocation47_spill] sm:$0xff] %v12741_v38  ;;  %v12923_v62 = vrot.slane %v12490_v51, 2 }
 0x26a   :  { %9589 = vmatprep.mubr.msk.f32.mxu0 %vm2399_vm3, %v12612_v8  ;;  %9874 = vmatprep.mubr.msk.f32.mxu1 %vm2399_vm3, %v12633_v7  ;;  %14596 = vst [vmem:[#allocation23_spill] sm:$0xff] %v12650_v28  ;;  %14602 = vst [vmem:[#allocation55_spill] sm:$0xff] %v12724_v18 }
 0x26b   :  { %10595 = vmatpush3.bf16.msra.mxu1 %v10592_v33  ;;  %10525 = vmatprep.subr.bf16.mxu0 %v12626_v46  ;;  %v12676_v33 = vrot.slane %v12645_v24, 2  ;;  %14605 = vst [vmem:[#allocation56_spill] sm:$0xff] %v12758_v13  ;;  %14610 = vst [vmem:[#allocation22_spill] sm:$0xff] %v12784_v6 }
 0x26c   :  { %10597 = vmatprep.subr.bf16.mxu1 %v12635_v29  ;;  %14611 = vst [vmem:[#allocation40_spill] sm:$0xff] %v12788_v22 }
 0x26d   :  { %9590 = vmatmul.mubr.msk.f32.gmra.mrb[198].mxu0 %vm2399_vm3, %v12617_v63  ;;  %9875 = vmatmul.mubr.msk.f32.gmra.mrb[4].mxu1 %vm2399_vm3, %v12650_v28  ;;  %14598 = vst [vmem:[#allocation54_spill] sm:$0xff] %v12676_v33 }
 0x26e   :  { %9592 = vmatprep.mubr.msk.f32.mxu0 %vm2399_vm3, %v12653_v54  ;;  %9877 = vmatprep.mubr.msk.f32.mxu1 %vm2399_vm3, %v12660_v53 }
 0x271   :  { %9593 = vmatmul.mubr.msk.f32.gmra.mrb[200].mxu0 %vm2399_vm3, %v12657_v58  ;;  %9878 = vmatmul.mubr.msk.f32.gmra.mrb[6].mxu1 %vm2399_vm3, %v12676_v33  ;;  %v12815_v33 = vrot.slane %v12591_v49, 1 }
 0x272   :  { %9595 = vmatprep.mubr.msk.f32.mxu0 %vm2399_vm3, %v12671_v2  ;;  %9880 = vmatprep.mubr.msk.f32.mxu1 %vm2399_vm3, %v14293_v60  ;;  %v14607_v60 = vld [vmem:[#allocation37_spill] sm:$0xff] }
 0x273   :  { %v14297_v56 = vrot.slane %v14607_v60, 2  ;;  %14614 = vst [vmem:[#allocation24_spill] sm:$0xff] %v12815_v33  ;;  %v14641_v51 = vrot.slane %v14607_v60, 1 }
 0x275   :  { %9596 = vmatmul.mubr.msk.f32.gmra.mrb[202].mxu0 %vm2399_vm3, %v12678_v42  ;;  %9881 = vmatmul.mubr.msk.f32.gmra.mrb[8].mxu1 %vm2399_vm3, %v12697_v3 }
 0x276   :  { %9598 = vmatprep.mubr.msk.f32.mxu0 %vm2399_vm3, %v12694_v25  ;;  %9883 = vmatprep.mubr.msk.f32.mxu1 %vm2399_vm3, %v12704_v16 }
 0x279   :  { %9599 = vmatmul.mubr.msk.f32.gmra.mrb[204].mxu0 %vm2399_vm3, %v12701_v20  ;;  %9884 = vmatmul.mubr.msk.f32.gmra.mrb[10].mxu1 %vm2399_vm3, %v12719_v34 }
 0x27a   :  { %9601 = vmatprep.mubr.msk.f32.mxu0 %vm2399_vm3, %v12714_v36  ;;  %9886 = vmatprep.mubr.msk.f32.mxu1 %vm2399_vm3, %v12724_v18 }
 0x27d   :  { %9602 = vmatmul.mubr.msk.f32.gmra.mrb[206].mxu0 %vm2399_vm3, %v12721_v41  ;;  %9887 = vmatmul.mubr.msk.f32.gmra.mrb[12].mxu1 %vm2399_vm3, %v12737_v12 }
 0x27e   :  { %9612 = vmatprep.mubr.msk.f32.mxu0 %vm2399_vm3, %v2100_v44  ;;  %9889 = vmatprep.mubr.msk.f32.mxu1 %vm2399_vm3, %v12741_v38  ;;  %v8288_v44 = vld [vmem:[%s14224_s3 + $0x198] sm:$0xff]  ;;  %v14618_v38 = vld [vmem:[#allocation3_spill] sm:$0xff] }
 0x27f   :  { %v10600_v23 = vpack.c.bf16 %v8288_v44, %v8287_v11  ;;  %v14612_v11 = vld [vmem:[#allocation36_spill] sm:$0xff]  ;;  %v8305_v44 = vld [vmem:[%s14224_s3 + $0x1a0] sm:$0xff] }
 0x281   :  { %9613 = vmatmul.mubr.msk.f32.vlgmr.msra.gmra.mrb[192].mxu0 %vm2399_vm3, %v14296_v31  ;;  %9890 = vmatmul.mubr.msk.f32.gmra.mrb[14].mxu1 %vm2399_vm3, %v12758_v13  ;;  %v8125_v31 = vld [vmem:[%s14224_s3 + $0x80] sm:$0xff]  ;;  %v8306_v13 = vld [vmem:[%s14224_s3 + $0x1a8] sm:$0xff] }
 0x282   :  { %9615 = vmatprep.mubr.msk.f32.mxu0 %vm2399_vm3, %v12761_v55  ;;  %9900 = vmatprep.mubr.msk.f32.mxu1 %vm2399_vm3, %v14297_v56  ;;  %v8126_v56 = vld [vmem:[%s14224_s3 + $0x88] sm:$0xff] }
 0x283   :  { %10527 = vmatpush3.bf16.msra.mxu0 %v12626_v46  ;;  %v12801_v46 = vrot.slane %v14612_v11, 2  ;;  %v12820_v55 = vpack.c.bf16 %v8126_v56, %v8125_v31  ;;  %v12839_v56 = vrot.slane %v12617_v63, 1  ;;  %v14621_v31 = vld [vmem:[#allocation17_spill] sm:$0xff] }
 0x284   :  { %10529 = vmatprep.subr.bf16.mxu0 %v10528_v45 }
 0x285   :  { %9616 = vmatmul.mubr.msk.f32.gmra.mrb[194].mxu0 %vm2399_vm3, %v12781_v17  ;;  %9901 = vmatmul.mubr.msk.f32.vlgmr.msra.gmra.mrb[0].mxu1 %vm2399_vm3, %v12784_v6  ;;  %14613 = vst [vmem:[#allocation49_spill] sm:$0xff] %v12801_v46  ;;  %v12818_v17 = vrot.slane %v14615_v0, 2  ;;  %v12823_v6 = vrot.slane %v12612_v8, 1  ;;  %14620 = vst [vmem:[#allocation28_spill] sm:$0xff] %v12839_v56 }
 0x286   :  { %10599 = vmatpush3.bf16.msra.mxu1 %v12635_v29  ;;  %9618 = vmatprep.mubr.msk.f32.mxu0 %vm2399_vm3, %v12788_v22  ;;  %v12826_v29 = vrot.slane %v14618_v38, 2  ;;  %v12828_v22 = vpack.c.bf16 %v8306_v13, %v8305_v44  ;;  %v14623_v13 = vld [vmem:[#allocation4_spill] sm:$0xff] }
 0x287   :  { %9903 = vmatprep.mubr.msk.f32.mxu1 %vm2399_vm3, %v12801_v46  ;;  %14616 = vst [vmem:[#allocation27_spill] sm:$0xff] %v12818_v17  ;;  %10601 = vmatprep.subr.bf16.mxu1 %v10600_v23  ;;  %14617 = vst [vmem:[#allocation29_spill] sm:$0xff] %v12823_v6  ;;  %v12842_v46 = vrot.slane %v14621_v31, 2  ;;  %v12847_v44 = vrot.slane %v14623_v13, 2 }
 0x288   :  { %14619 = vst [vmem:[#allocation26_spill] sm:$0xff] %v12826_v29  ;;  %10531 = vmatpush3.bf16.msra.mxu0 %v10528_v45  ;;  %v2124_v45 = vrot.slane %v12653_v54, 1 }
 0x289   :  { %9619 = vmatmul.mubr.msk.f32.gmra.mrb[196].mxu0 %vm2399_vm3, %v12815_v33  ;;  %9904 = vmatmul.mubr.msk.f32.gmra.mrb[2].mxu1 %vm2399_vm3, %v12818_v17  ;;  %14622 = vst [vmem:[#allocation50_spill] sm:$0xff] %v12842_v46  ;;  %14624 = vst [vmem:[#allocation41_spill] sm:$0xff] %v12847_v44  ;;  %v14329_v17 = vrot.slane %v12430_v50, 2 }
 0x28a   :  { %9621 = vmatprep.mubr.msk.f32.mxu0 %vm2399_vm3, %v12823_v6  ;;  %9906 = vmatprep.mubr.msk.f32.mxu1 %vm2399_vm3, %v12826_v29  ;;  %v14625_v6 = vld [vmem:[#allocation6_spill] sm:$0xff]  ;;  %v12862_v29 = vrot.slane %v12671_v2, 1 }
 0x28b   :  { %10603 = vmatpush3.bf16.msra.mxu1 %v10600_v23  ;;  %10533 = vmatprep.subr.bf16.mxu0 %v12820_v55  ;;  %v14328_v23 = vrot.slane %v12657_v58, 1  ;;  %v12859_v33 = vrot.slane %v14625_v6, 2 }
 0x28c   :  { %10605 = vmatprep.subr.bf16.mxu1 %v12828_v22  ;;  %14627 = vst [vmem:[#allocation37_spill] sm:$0xff] %v12862_v29 }
 0x28d   :  { %9622 = vmatmul.mubr.msk.f32.gmra.mrb[198].mxu0 %vm2399_vm3, %v12839_v56  ;;  %9907 = vmatmul.mubr.msk.f32.gmra.mrb[4].mxu1 %vm2399_vm3, %v12842_v46  ;;  %14626 = vst [vmem:[#allocation31_spill] sm:$0xff] %v12859_v33  ;;  %v12879_v56 = vrot.slane %v12425_v59, 2 }
 0x28e   :  { %9624 = vmatprep.mubr.msk.f32.mxu0 %vm2399_vm3, %v2124_v45  ;;  %9909 = vmatprep.mubr.msk.f32.mxu1 %vm2399_vm3, %v12847_v44  ;;  %v12876_v45 = vrot.slane %v12678_v42, 1  ;;  %v12882_v44 = vrot.slane %v12694_v25, 1 }
 0x28f   :  { %14629 = vst [vmem:[#allocation36_spill] sm:$0xff] %v12879_v56 }
 0x290   :  { %14628 = vst [vmem:[#allocation35_spill] sm:$0xff] %v12876_v45  ;;  %14630 = vst [vmem:[#allocation9_spill] sm:$0xff] %v12882_v44 }
 0x291   :  { %9625 = vmatmul.mubr.msk.f32.gmra.mrb[200].mxu0 %vm2399_vm3, %v14328_v23  ;;  %9910 = vmatmul.mubr.msk.f32.gmra.mrb[6].mxu1 %vm2399_vm3, %v12859_v33  ;;  %v12885_v23 = vrot.slane %v12428_v61, 2  ;;  %v12899_v33 = vrot.slane %v12468_v27, 2 }
 0x292   :  { %9627 = vmatprep.mubr.msk.f32.mxu0 %vm2399_vm3, %v12862_v29  ;;  %9912 = vmatprep.mubr.msk.f32.mxu1 %vm2399_vm3, %v14329_v17  ;;  %v12896_v17 = vrot.slane %v12701_v20, 1  ;;  %v12902_v29 = vrot.slane %v12714_v36, 1 }
 0x293   :  { %14631 = vst [vmem:[#allocation3_spill] sm:$0xff] %v12885_v23  ;;  %14633 = vst [vmem:[#allocation4_spill] sm:$0xff] %v12899_v33 }
 0x294   :  { %14632 = vst [vmem:[#allocation17_spill] sm:$0xff] %v12896_v17  ;;  %14634 = vst [vmem:[#allocation6_spill] sm:$0xff] %v12902_v29 }
 0x295   :  { %9628 = vmatmul.mubr.msk.f32.gmra.mrb[202].mxu0 %vm2399_vm3, %v12876_v45  ;;  %9913 = vmatmul.mubr.msk.f32.gmra.mrb[8].mxu1 %vm2399_vm3, %v12879_v56  ;;  %v12905_v45 = vrot.slane %v12480_v19, 2  ;;  %v14638_v56 = vld [vmem:[#allocation34_spill] sm:$0xff] }
 0x296   :  { %9630 = vmatprep.mubr.msk.f32.mxu0 %vm2399_vm3, %v12882_v44  ;;  %9915 = vmatprep.mubr.msk.f32.mxu1 %vm2399_vm3, %v12885_v23  ;;  %v12916_v44 = vrot.slane %v12721_v41, 1  ;;  %v12919_v23 = vrot.slane %v12478_v15, 2  ;;  %v2112_v46 = vrot.slane %v14638_v56, 1  ;;  %14639 = vst [vmem:[#allocation34_spill] sm:$0xff] %v12923_v62 }
 0x297   :  { %14635 = vst [vmem:[#allocation59_spill] sm:$0xff] %v12905_v45 }
 0x298   :  { %14636 = vst [vmem:[#allocation60_spill] sm:$0xff] %v12916_v44  ;;  %14637 = vst [vmem:[#allocation61_spill] sm:$0xff] %v12919_v23 }
 0x299   :  { %9631 = vmatmul.mubr.msk.f32.gmra.mrb[204].mxu0 %vm2399_vm3, %v12896_v17  ;;  %9916 = vmatmul.mubr.msk.f32.gmra.mrb[10].mxu1 %vm2399_vm3, %v12899_v33  ;;  %v8128_v17 = vld [vmem:[%s14224_s3 + $0x98] sm:$0xff] }
 0x29a   :  { %9633 = vmatprep.mubr.msk.f32.mxu0 %vm2399_vm3, %v12902_v29  ;;  %9918 = vmatprep.mubr.msk.f32.mxu1 %vm2399_vm3, %v12905_v45  ;;  %v8127_v29 = vld [vmem:[%s14224_s3 + $0x90] sm:$0xff]  ;;  %v12939_v45 = vrot.slane %v12538_v35, 2 }
 0x29b   :  { %v10536_v33 = vpack.c.bf16 %v8128_v17, %v8127_v29  ;;  %v8145_v17 = vld [vmem:[%s14224_s3 + $0xa0] sm:$0xff] }
 0x29c   :  { %14640 = vst [vmem:[#allocation62_spill] sm:$0xff] %v12939_v45  ;;  %v14643_v29 = vld [vmem:[#allocation2_spill] sm:$0xff] }
 0x29d   :  { %9634 = vmatmul.mubr.msk.f32.gmra.mrb[206].mxu0 %vm2399_vm3, %v12916_v44  ;;  %9919 = vmatmul.mubr.msk.f32.gmra.mrb[12].mxu1 %vm2399_vm3, %v12919_v23  ;;  %v8307_v44 = vld [vmem:[%s14224_s3 + $0x1b0] sm:$0xff]  ;;  %v8308_v23 = vld [vmem:[%s14224_s3 + $0x1b8] sm:$0xff] }
 0x29e   :  { %9644 = vmatprep.mubr.msk.f32.mxu0 %vm2399_vm3, %v2112_v46  ;;  %9921 = vmatprep.mubr.msk.f32.mxu1 %vm2399_vm3, %v12923_v62  ;;  %v14642_v46 = vld [vmem:[#allocation16_spill] sm:$0xff]  ;;  %v10608_v62 = vpack.c.bf16 %v8308_v23, %v8307_v44  ;;  %v8325_v44 = vld [vmem:[%s14224_s3 + $0x1c0] sm:$0xff] }
 0x29f   :  { %v14644_v23 = vld [vmem:[#allocation10_spill] sm:$0xff] }
 0x2a1   :  { %9645 = vmatmul.mubr.msk.f32.vlgmr.msra.gmra.mrb[192].mxu0 %vm2399_vm3, %v14641_v51  ;;  %9922 = vmatmul.mubr.msk.f32.gmra.mrb[14].mxu1 %vm2399_vm3, %v12939_v45  ;;  %v8146_v51 = vld [vmem:[%s14224_s3 + $0xa8] sm:$0xff] }
 0x2a2   :  { %9647 = vmatprep.mubr.msk.f32.mxu0 %vm2399_vm3, %v14642_v46  ;;  %9932 = vmatprep.mubr.msk.f32.mxu1 %vm2399_vm3, %v12554_v21  ;;  %v10540_v45 = vpack.c.bf16 %v8146_v51, %v8145_v17  ;;  %v14645_v46 = vld [vmem:[#allocation18_spill] sm:$0xff]  ;;  %v14648_v17 = vld [vmem:[#allocation33_spill] sm:$0xff]  ;;  %v2136_v51 = vrot.slane %v12422_v5, 1 }
 0x2a3   :  { %10535 = vmatpush3.bf16.msra.mxu0 %v12820_v55  ;;  %v8326_v55 = vld [vmem:[%s14224_s3 + $0x1c8] sm:$0xff] }
 0x2a4   :  { %10537 = vmatprep.subr.bf16.mxu0 %v10536_v33 }
 0x2a5   :  { %9648 = vmatmul.mubr.msk.f32.gmra.mrb[194].mxu0 %vm2399_vm3, %v14643_v29  ;;  %9933 = vmatmul.mubr.msk.f32.vlgmr.msra.gmra.mrb[0].mxu1 %vm2399_vm3, %v12570_v26  ;;  %v10612_v29 = vpack.c.bf16 %v8326_v55, %v8325_v44  ;;  %v14646_v26 = vld [vmem:[#allocation12_spill] sm:$0xff] }
 0x2a6   :  { %10607 = vmatpush3.bf16.msra.mxu1 %v12828_v22  ;;  %9650 = vmatprep.mubr.msk.f32.mxu0 %vm2399_vm3, %v14644_v23  ;;  %v12989_v22 = vld [vmem:[%s14225_s2] ss:$0 sm:$0xff]  ;;  %v14649_v44 = vld [vmem:[#allocation20_spill] sm:$0xff] }
 0x2a7   :  { %9935 = vmatprep.mubr.msk.f32.mxu1 %vm2399_vm3, %v12583_v39  ;;  %10609 = vmatprep.subr.bf16.mxu1 %v10608_v62  ;;  %14647 = vst [vmem:[#allocation10_spill] sm:$0xff] %v12989_v22 }
 0x2a8   :  { %10539 = vmatpush3.bf16.msra.mxu0 %v10536_v33  ;;  %v1965_v33 = vadd.f32 %v12989_v22, %v14648_v17  ;;  %v14650_v17 = vrot.slane %v12430_v50, 1 }
 0x2a9   :  { %9651 = vmatmul.mubr.msk.f32.gmra.mrb[196].mxu0 %vm2399_vm3, %v14645_v46  ;;  %9936 = vmatmul.mubr.msk.f32.gmra.mrb[2].mxu1 %vm2399_vm3, %v12591_v49 }
 0x2aa   :  { %9653 = vmatprep.mubr.msk.f32.mxu0 %vm2399_vm3, %v14646_v26  ;;  %9938 = vmatprep.mubr.msk.f32.mxu1 %vm2399_vm3, %v12612_v8  ;;  %v13001_v55 = vmax.f32 %v1965_v33, 0.0  ;;  %v2245_v33 = vrot.slane %v12529_v57, 2  ;;  %v8327_v57 = vld [vmem:[%s14224_s3 + $0x1d0] sm:$0xff] }
 0x2ab   :  { %10611 = vmatpush3.bf16.msra.mxu1 %v10608_v62  ;;  %10541 = vmatprep.subr.bf16.mxu0 %v10540_v45  ;;  %v1989_v62 = vadd.f32 %v12989_v22, %v12405_v1 }
 0x2ac   :  { %10613 = vmatprep.subr.bf16.mxu1 %v10612_v29 }
 0x2ad   :  { %9654 = vmatmul.mubr.msk.f32.gmra.mrb[198].mxu0 %vm2399_vm3, %v14649_v44  ;;  %9939 = vmatmul.mubr.msk.f32.gmra.mrb[4].mxu1 %vm2399_vm3, %v12617_v63  ;;  %v13044_v1 = vmax.f32 %v1989_v62, 0.0 }
 0x2ae   :  { %9656 = vmatprep.mubr.msk.f32.mxu0 %vm2399_vm3, %v2136_v51  ;;  %9941 = vmatprep.mubr.msk.f32.mxu1 %vm2399_vm3, %v12645_v24  ;;  %v8147_v51 = vld [vmem:[%s14224_s3 + $0xb0] sm:$0xff] }
 0x2af   :  { %14651 = vst [vmem:[#allocation18_spill] sm:$0xff] %v13044_v1 }
 0x2b1   :  { %9657 = vmatmul.mubr.msk.f32.gmra.mrb[200].mxu0 %vm2399_vm3, %v14650_v17  ;;  %9942 = vmatmul.mubr.msk.f32.gmra.mrb[6].mxu1 %vm2399_vm3, %v13001_v55  ;;  %v8148_v17 = vld [vmem:[%s14224_s3 + $0xb8] sm:$0xff] }
 0x2b2   :  { %9659 = vmatprep.mubr.msk.f32.mxu0 %vm2399_vm3, %v12452_v47  ;;  %9944 = vmatprep.mubr.msk.f32.mxu1 %vm2399_vm3, %v12671_v2 }
 0x2b5   :  { %9660 = vmatmul.mubr.msk.f32.gmra.mrb[202].mxu0 %vm2399_vm3, %v12463_v43  ;;  %9945 = vmatmul.mubr.msk.f32.gmra.mrb[8].mxu1 %vm2399_vm3, %v12678_v42 }
 0x2b6   :  { %9662 = vmatprep.mubr.msk.f32.mxu0 %vm2399_vm3, %v12486_v52  ;;  %9947 = vmatprep.mubr.msk.f32.mxu1 %vm2399_vm3, %v12694_v25 }
 0x2b9   :  { %9663 = vmatmul.mubr.msk.f32.gmra.mrb[204].mxu0 %vm2399_vm3, %v12507_v10  ;;  %9948 = vmatmul.mubr.msk.f32.gmra.mrb[10].mxu1 %vm2399_vm3, %v12701_v20 }
 0x2ba   :  { %9665 = vmatprep.mubr.msk.f32.mxu0 %vm2399_vm3, %v12527_v37  ;;  %9950 = vmatprep.mubr.msk.f32.mxu1 %vm2399_vm3, %v12714_v36  ;;  %v10544_v37 = vpack.c.bf16 %v8148_v17, %v8147_v51 }
 0x2bd   :  { %9666 = vmatmul.mubr.msk.f32.gmra.mrb[206].mxu0 %vm2399_vm3, %v12534_v40  ;;  %9951 = vmatmul.mubr.msk.f32.gmra.mrb[12].mxu1 %vm2399_vm3, %v12721_v41  ;;  %v8328_v40 = vld [vmem:[%s14224_s3 + $0x1d8] sm:$0xff]  ;;  %v14652_v41 = vrot.slane %v12531_v4, 2 }
 0x2be   :  { %9676 = vmatprep.mubr.msk.f32.mxu0 %vm2399_vm3, %v2245_v33  ;;  %9953 = vmatprep.mubr.msk.f32.mxu1 %vm2399_vm3, %v12734_v14  ;;  %v10616_v62 = vpack.c.bf16 %v8328_v40, %v8327_v57  ;;  %v8165_v33 = vld [vmem:[%s14224_s3 + $0xc0] sm:$0xff] }
 0x2bf   :  { %v8345_v40 = vld [vmem:[%s14224_s3 + $0x1e0] sm:$0xff] }
 0x2c1   :  { %9677 = vmatmul.mubr.msk.f32.vlgmr.msra.gmra.mrb[192].mxu0 %vm2399_vm3, %v14652_v41  ;;  %9954 = vmatmul.mubr.msk.f32.gmra.mrb[14].mxu1 %vm2399_vm3, %v13044_v1  ;;  %v8166_v41 = vld [vmem:[%s14224_s3 + $0xc8] sm:$0xff] }
 0x2c2   :  { %9679 = vmatprep.mubr.msk.f32.mxu0 %vm2399_vm3, %v12588_v9  ;;  %9964 = vmatprep.mubr.msk.f32.mxu1 %vm2399_vm3, %v14609_v32  ;;  %v10548_v51 = vpack.c.bf16 %v8166_v41, %v8165_v33  ;;  %v14654_v41 = vrot.slane %v12657_v58, 2 }
 0x2c3   :  { %10543 = vmatpush3.bf16.msra.mxu0 %v10540_v45  ;;  %v8346_v45 = vld [vmem:[%s14224_s3 + $0x1e8] sm:$0xff] }
 0x2c4   :  { %10545 = vmatprep.subr.bf16.mxu0 %v10544_v37  ;;  %v10620_v17 = vpack.c.bf16 %v8346_v45, %v8345_v40  ;;  %v2257_v40 = vrot.slane %v14638_v56, 2  ;;  %v14656_v45 = vld [vmem:[#allocation47_spill] sm:$0xff] }
 0x2c5   :  { %9680 = vmatmul.mubr.msk.f32.gmra.mrb[194].mxu0 %vm2399_vm3, %v12604_v48  ;;  %9965 = vmatmul.mubr.msk.f32.vlgmr.msra.gmra.mrb[0].mxu1 %vm2399_vm3, %v14612_v11 }
 0x2c6   :  { %10615 = vmatpush3.bf16.msra.mxu1 %v10612_v29  ;;  %9682 = vmatprep.mubr.msk.f32.mxu0 %vm2399_vm3, %v12624_v30  ;;  %v14653_v29 = vld [vmem:[#allocation5_spill] sm:$0xff] }
 0x2c7   :  { %9967 = vmatprep.mubr.msk.f32.mxu1 %vm2399_vm3, %v14615_v0  ;;  %10617 = vmatprep.subr.bf16.mxu1 %v10616_v62  ;;  %v1977_v57 = vadd.f32 %v12989_v22, %v14653_v29  ;;  %v14657_v29 = vld [vmem:[#allocation21_spill] sm:$0xff] }
 0x2c8   :  { %10547 = vmatpush3.bf16.msra.mxu0 %v10544_v37  ;;  %v2269_v37 = vrot.slane %v12653_v54, 2  ;;  %v14655_v54 = vld [vmem:[#allocation7_spill] sm:$0xff] }
 0x2c9   :  { %9683 = vmatmul.mubr.msk.f32.gmra.mrb[196].mxu0 %vm2399_vm3, %v12633_v7  ;;  %9968 = vmatmul.mubr.msk.f32.gmra.mrb[2].mxu1 %vm2399_vm3, %v14618_v38  ;;  %v13099_v33 = vmax.f32 %v1977_v57, 0.0  ;;  %v8167_v57 = vld [vmem:[%s14224_s3 + $0xd0] sm:$0xff] }
 0x2ca   :  { %9685 = vmatprep.mubr.msk.f32.mxu0 %vm2399_vm3, %v12650_v28  ;;  %9970 = vmatprep.mubr.msk.f32.mxu1 %vm2399_vm3, %v14621_v31 }
 0x2cb   :  { %10619 = vmatpush3.bf16.msra.mxu1 %v10616_v62  ;;  %10549 = vmatprep.subr.bf16.mxu0 %v10548_v51  ;;  %v2001_v62 = vadd.f32 %v12989_v22, %v14655_v54  ;;  %v8348_v54 = vld [vmem:[%s14224_s3 + $0x1f8] sm:$0xff] }
 0x2cc   :  { %10621 = vmatprep.subr.bf16.mxu1 %v10620_v17 }
 0x2cd   :  { %9686 = vmatmul.mubr.msk.f32.gmra.mrb[198].mxu0 %vm2399_vm3, %v12660_v53  ;;  %9971 = vmatmul.mubr.msk.f32.gmra.mrb[4].mxu1 %vm2399_vm3, %v14623_v13  ;;  %v13142_v56 = vmax.f32 %v2001_v62, 0.0  ;;  %v14660_v62 = vld [vmem:[#allocation39_spill] sm:$0xff] }
 0x2ce   :  { %9688 = vmatprep.mubr.msk.f32.mxu0 %vm2399_vm3, %v2269_v37  ;;  %9973 = vmatprep.mubr.msk.f32.mxu1 %vm2399_vm3, %v14625_v6  ;;  %v8168_v37 = vld [vmem:[%s14224_s3 + $0xd8] sm:$0xff] }
 0x2cf   :  { %v10552_v22 = vpack.c.bf16 %v8168_v37, %v8167_v57  ;;  %v8185_v57 = vld [vmem:[%s14224_s3 + $0xe0] sm:$0xff]  ;;  %v14661_v37 = vld [vmem:[#allocation49_spill] sm:$0xff] }
 0x2d1   :  { %9689 = vmatmul.mubr.msk.f32.gmra.mrb[200].mxu0 %vm2399_vm3, %v14654_v41  ;;  %9974 = vmatmul.mubr.msk.f32.gmra.mrb[6].mxu1 %vm2399_vm3, %v13099_v33  ;;  %v8347_v41 = vld [vmem:[%s14224_s3 + $0x1f0] sm:$0xff] }
 0x2d2   :  { %9691 = vmatprep.mubr.msk.f32.mxu0 %vm2399_vm3, %v12697_v3  ;;  %9976 = vmatprep.mubr.msk.f32.mxu1 %vm2399_vm3, %v12425_v59 }
 0x2d5   :  { %9692 = vmatmul.mubr.msk.f32.gmra.mrb[202].mxu0 %vm2399_vm3, %v12704_v16  ;;  %9977 = vmatmul.mubr.msk.f32.gmra.mrb[8].mxu1 %vm2399_vm3, %v12428_v61 }
 0x2d6   :  { %9694 = vmatprep.mubr.msk.f32.mxu0 %vm2399_vm3, %v12719_v34  ;;  %9979 = vmatprep.mubr.msk.f32.mxu1 %vm2399_vm3, %v12468_v27 }
 0x2d9   :  { %9695 = vmatmul.mubr.msk.f32.gmra.mrb[204].mxu0 %vm2399_vm3, %v12724_v18  ;;  %9980 = vmatmul.mubr.msk.f32.gmra.mrb[10].mxu1 %vm2399_vm3, %v12480_v19  ;;  %v14667_v18 = vld [vmem:[#allocation50_spill] sm:$0xff] }
 0x2da   :  { %9697 = vmatprep.mubr.msk.f32.mxu0 %vm2399_vm3, %v12737_v12  ;;  %9982 = vmatprep.mubr.msk.f32.mxu1 %vm2399_vm3, %v12478_v15  ;;  %v14662_v12 = vld [vmem:[#allocation48_spill] sm:$0xff] }
 0x2dd   :  { %9698 = vmatmul.mubr.msk.f32.gmra.mrb[206].mxu0 %vm2399_vm3, %v14656_v45  ;;  %9983 = vmatmul.mubr.msk.f32.gmra.mrb[12].mxu1 %vm2399_vm3, %v14657_v29  ;;  %v14658_v45 = vrot.slane %v14607_v60, 2  ;;  %v14666_v29 = vld [vmem:[#allocation24_spill] sm:$0xff] }
 0x2de   :  { %9708 = vmatprep.mubr.msk.f32.mxu0 %vm2399_vm3, %v2257_v40  ;;  %9985 = vmatprep.mubr.msk.f32.mxu1 %vm2399_vm3, %v12538_v35  ;;  %v14659_v40 = vld [vmem:[#allocation22_spill] sm:$0xff]  ;;  %v10624_v35 = vpack.c.bf16 %v8348_v54, %v8347_v41  ;;  %v14663_v54 = vld [vmem:[#allocation27_spill] sm:$0xff] }
 0x2df   :  { %v8365_v41 = vld [vmem:[%s14224_s3 + $0x200] sm:$0xff] }
 0x2e1   :  { %9709 = vmatmul.mubr.msk.f32.vlgmr.msra.gmra.mrb[192].mxu0 %vm2399_vm3, %v14658_v45  ;;  %9986 = vmatmul.mubr.msk.f32.gmra.mrb[14].mxu1 %vm2399_vm3, %v13142_v56  ;;  %v8186_v45 = vld [vmem:[%s14224_s3 + $0xe8] sm:$0xff] }
 0x2e2   :  { %9711 = vmatprep.mubr.msk.f32.mxu0 %vm2399_vm3, %v14659_v40  ;;  %9996 = vmatprep.mubr.msk.f32.mxu1 %vm2399_vm3, %v14660_v62  ;;  %v14664_v40 = vld [vmem:[#allocation40_spill] sm:$0xff] }
 0x2e3   :  { %10551 = vmatpush3.bf16.msra.mxu0 %v10548_v51  ;;  %v8366_v51 = vld [vmem:[%s14224_s3 + $0x208] sm:$0xff] }
 0x2e4   :  { %10553 = vmatprep.subr.bf16.mxu0 %v10552_v22  ;;  %v10628_v62 = vpack.c.bf16 %v8366_v51, %v8365_v41  ;;  %v14674_v41 = vld [vmem:[#allocation36_spill] sm:$0xff]  ;;  %v14675_v51 = vld [vmem:[#allocation37_spill] sm:$0xff] }
 0x2e5   :  { %9712 = vmatmul.mubr.msk.f32.gmra.mrb[194].mxu0 %vm2399_vm3, %v14661_v37  ;;  %9997 = vmatmul.mubr.msk.f32.vlgmr.msra.gmra.mrb[0].mxu1 %vm2399_vm3, %v14662_v12  ;;  %v10556_v37 = vpack.c.bf16 %v8186_v45, %v8185_v57  ;;  %v14665_v12 = vld [vmem:[#allocation26_spill] sm:$0xff]  ;;  %v13189_v57 = vrot.slane %v12645_v24, 1  ;;  %v14671_v45 = vld [vmem:[#allocation28_spill] sm:$0xff] }
 0x2e6   :  { %10623 = vmatpush3.bf16.msra.mxu1 %v10620_v17  ;;  %9714 = vmatprep.mubr.msk.f32.mxu0 %vm2399_vm3, %v14663_v54  ;;  %v14668_v17 = vld [vmem:[#allocation29_spill] sm:$0xff]  ;;  %v2281_v54 = vrot.slane %v12422_v5, 2  ;;  %v14673_v5 = vrot.slane %v12430_v50, 2 }
 0x2e7   :  { %9999 = vmatprep.mubr.msk.f32.mxu1 %vm2399_vm3, %v14664_v40  ;;  %10625 = vmatprep.subr.bf16.mxu1 %v10624_v35  ;;  %14669 = vst [vmem:[#allocation12_spill] sm:$0xff] %v13189_v57 }
 0x2e8   :  { %10555 = vmatpush3.bf16.msra.mxu0 %v10552_v22  ;;  %v14670_v22 = vld [vmem:[#allocation41_spill] sm:$0xff] }
 0x2e9   :  { %9715 = vmatmul.mubr.msk.f32.gmra.mrb[196].mxu0 %vm2399_vm3, %v14665_v12  ;;  %10000 = vmatmul.mubr.msk.f32.gmra.mrb[2].mxu1 %vm2399_vm3, %v14666_v29  ;;  %v8205_v12 = vld [vmem:[%s14224_s3 + $0x100] sm:$0xff] }
 0x2ea   :  { %9717 = vmatprep.mubr.msk.f32.mxu0 %vm2399_vm3, %v14667_v18  ;;  %10002 = vmatprep.mubr.msk.f32.mxu1 %vm2399_vm3, %v14668_v17  ;;  %v14679_v18 = vld [vmem:[#allocation9_spill] sm:$0xff] }
 0x2eb   :  { %10627 = vmatpush3.bf16.msra.mxu1 %v10624_v35  ;;  %10557 = vmatprep.subr.bf16.mxu0 %v10556_v37  ;;  %v13199_v35 = vrot.slane %v13001_v55, 1 }
 0x2ec   :  { %10629 = vmatprep.subr.bf16.mxu1 %v10628_v62 }
 0x2ed   :  { %9718 = vmatmul.mubr.msk.f32.gmra.mrb[198].mxu0 %vm2399_vm3, %v14670_v22  ;;  %10003 = vmatmul.mubr.msk.f32.gmra.mrb[4].mxu1 %vm2399_vm3, %v14671_v45  ;;  %14672 = vst [vmem:[#allocation33_spill] sm:$0xff] %v13199_v35  ;;  %v14677_v22 = vld [vmem:[#allocation35_spill] sm:$0xff] }
 0x2ee   :  { %9720 = vmatprep.mubr.msk.f32.mxu0 %vm2399_vm3, %v2281_v54  ;;  %10005 = vmatprep.mubr.msk.f32.mxu1 %vm2399_vm3, %v13189_v57  ;;  %v14676_v54 = vld [vmem:[#allocation3_spill] sm:$0xff]  ;;  %v14678_v57 = vld [vmem:[#allocation4_spill] sm:$0xff] }
 0x2f1   :  { %9721 = vmatmul.mubr.msk.f32.gmra.mrb[200].mxu0 %vm2399_vm3, %v14673_v5  ;;  %10006 = vmatmul.mubr.msk.f32.gmra.mrb[6].mxu1 %vm2399_vm3, %v13199_v35  ;;  %v14680_v5 = vld [vmem:[#allocation59_spill] sm:$0xff]  ;;  %v14681_v35 = vld [vmem:[#allocation17_spill] sm:$0xff] }
 0x2f2   :  { %9723 = vmatprep.mubr.msk.f32.mxu0 %vm2399_vm3, %v14674_v41  ;;  %10008 = vmatprep.mubr.msk.f32.mxu1 %vm2399_vm3, %v14675_v51  ;;  %v14682_v41 = vld [vmem:[#allocation61_spill] sm:$0xff]  ;;  %v14683_v51 = vld [vmem:[#allocation6_spill] sm:$0xff] }
 0x2f5   :  { %9724 = vmatmul.mubr.msk.f32.gmra.mrb[202].mxu0 %vm2399_vm3, %v14676_v54  ;;  %10009 = vmatmul.mubr.msk.f32.gmra.mrb[8].mxu1 %vm2399_vm3, %v14677_v22  ;;  %v13227_v54 = vrot.slane %v12734_v14, 1  ;;  %v14685_v22 = vld [vmem:[#allocation34_spill] sm:$0xff] }
 0x2f6   :  { %9726 = vmatprep.mubr.msk.f32.mxu0 %vm2399_vm3, %v14678_v57  ;;  %10011 = vmatprep.mubr.msk.f32.mxu1 %vm2399_vm3, %v14679_v18  ;;  %v14686_v57 = vld [vmem:[#allocation60_spill] sm:$0xff] }
 0x2f7   :  { %14684 = vst [vmem:[#allocation20_spill] sm:$0xff] %v13227_v54  ;;  %v14687_v18 = vld [vmem:[#allocation8_spill] sm:$0xff] }
 0x2f9   :  { %9727 = vmatmul.mubr.msk.f32.gmra.mrb[204].mxu0 %vm2399_vm3, %v14680_v5  ;;  %10012 = vmatmul.mubr.msk.f32.gmra.mrb[10].mxu1 %vm2399_vm3, %v14681_v35  ;;  %v8187_v5 = vld [vmem:[%s14224_s3 + $0xf0] sm:$0xff] }
 0x2fa   :  { %9729 = vmatprep.mubr.msk.f32.mxu0 %vm2399_vm3, %v14682_v41  ;;  %10014 = vmatprep.mubr.msk.f32.mxu1 %vm2399_vm3, %v14683_v51  ;;  %v8188_v41 = vld [vmem:[%s14224_s3 + $0xf8] sm:$0xff]  ;;  %v13244_v51 = vrot.slane %v13044_v1, 1 }
 0x2fb   :  { %v10560_v35 = vpack.c.bf16 %v8188_v41, %v8187_v5  ;;  %v14689_v41 = vld [vmem:[#allocation2_spill] sm:$0xff]  ;;  %v8208_v5 = vld [vmem:[%s14224_s3 + $0x118] sm:$0xff] }
 0x2fd   :  { %9730 = vmatmul.mubr.msk.f32.gmra.mrb[206].mxu0 %vm2399_vm3, %v14685_v22  ;;  %10015 = vmatmul.mubr.msk.f32.gmra.mrb[12].mxu1 %vm2399_vm3, %v14686_v57  ;;  %v8367_v22 = vld [vmem:[%s14224_s3 + $0x210] sm:$0xff]  ;;  %v8368_v57 = vld [vmem:[%s14224_s3 + $0x218] sm:$0xff] }
 0x2fe   :  { %9740 = vmatprep.mubr.msk.f32.mxu0 %vm2399_vm3, %v12531_v4  ;;  %10017 = vmatprep.mubr.msk.f32.mxu1 %vm2399_vm3, %v13227_v54  ;;  %v14688_v54 = vld [vmem:[#allocation16_spill] sm:$0xff]  ;;  %v10632_v45 = vpack.c.bf16 %v8368_v57, %v8367_v22  ;;  %v8385_v57 = vld [vmem:[%s14224_s3 + $0x220] sm:$0xff] }
 0x301   :  { %9741 = vmatmul.mubr.msk.f32.vlgmr.msra.gmra.mrb[192].mxu0 %vm2399_vm3, %v12554_v21  ;;  %10018 = vmatmul.mubr.msk.f32.gmra.mrb[14].mxu1 %vm2399_vm3, %v13244_v51  ;;  %v8206_v21 = vld [vmem:[%s14224_s3 + $0x108] sm:$0xff] }
 0x302   :  { %9743 = vmatprep.mubr.msk.f32.mxu0 %vm2399_vm3, %v14687_v18  ;;  %10028 = vmatprep.mubr.msk.f32.mxu1 %vm2399_vm3, %v14688_v54  ;;  %v10564_v22 = vpack.c.bf16 %v8206_v21, %v8205_v12  ;;  %v14690_v12 = vld [vmem:[#allocation13_spill] sm:$0xff]  ;;  %v14694_v21 = vld [vmem:[#allocation44_spill] sm:$0xff] }
 0x303   :  { %10559 = vmatpush3.bf16.msra.mxu0 %v10556_v37  ;;  %v8386_v37 = vld [vmem:[%s14224_s3 + $0x228] sm:$0xff] }
 0x304   :  { %10561 = vmatprep.subr.bf16.mxu0 %v10560_v35  ;;  %v10636_v54 = vpack.c.bf16 %v8386_v37, %v8385_v57  ;;  %v13338_v57 = vrot.slane %v13142_v56, 1  ;;  %v8387_v37 = vld [vmem:[%s14224_s3 + $0x230] sm:$0xff] }
 0x305   :  { %9744 = vmatmul.mubr.msk.f32.gmra.mrb[194].mxu0 %vm2399_vm3, %v12583_v39  ;;  %10029 = vmatmul.mubr.msk.f32.vlgmr.msra.gmra.mrb[0].mxu1 %vm2399_vm3, %v14689_v41 }
 0x306   :  { %10631 = vmatpush3.bf16.msra.mxu1 %v10628_v62  ;;  %9746 = vmatprep.mubr.msk.f32.mxu0 %vm2399_vm3, %v12591_v49  ;;  %v13297_v62 = vrot.slane %v13099_v33, 1 }
 0x307   :  { %10031 = vmatprep.mubr.msk.f32.mxu1 %vm2399_vm3, %v14644_v23  ;;  %10633 = vmatprep.subr.bf16.mxu1 %v10632_v45 }
 0x308   :  { %10563 = vmatpush3.bf16.msra.mxu0 %v10560_v35  ;;  %v8207_v35 = vld [vmem:[%s14224_s3 + $0x110] sm:$0xff] }
 0x309   :  { %9747 = vmatmul.mubr.msk.f32.gmra.mrb[196].mxu0 %vm2399_vm3, %v12612_v8  ;;  %10032 = vmatmul.mubr.msk.f32.gmra.mrb[2].mxu1 %vm2399_vm3, %v14645_v46 }
 0x30a   :  { %9749 = vmatprep.mubr.msk.f32.mxu0 %vm2399_vm3, %v12617_v63  ;;  %10034 = vmatprep.mubr.msk.f32.mxu1 %vm2399_vm3, %v14646_v26 }
 0x30b   :  { %10635 = vmatpush3.bf16.msra.mxu1 %v10632_v45  ;;  %10565 = vmatprep.subr.bf16.mxu0 %v10564_v22  ;;  %v14693_v45 = vld [vmem:[#allocation52_spill] sm:$0xff] }
 0x30c   :  { %10637 = vmatprep.subr.bf16.mxu1 %v10636_v54 }
 0x30d   :  { %9750 = vmatmul.mubr.msk.f32.gmra.mrb[198].mxu0 %vm2399_vm3, %v12645_v24  ;;  %10035 = vmatmul.mubr.msk.f32.gmra.mrb[4].mxu1 %vm2399_vm3, %v14649_v44 }
 0x30e   :  { %9752 = vmatprep.mubr.msk.f32.mxu0 %vm2399_vm3, %v12657_v58  ;;  %10037 = vmatprep.mubr.msk.f32.mxu1 %vm2399_vm3, %v14690_v12 }
 0x311   :  { %9753 = vmatmul.mubr.msk.f32.gmra.mrb[200].mxu0 %vm2399_vm3, %v12671_v2  ;;  %10038 = vmatmul.mubr.msk.f32.gmra.mrb[6].mxu1 %vm2399_vm3, %v13297_v62  ;;  %v14691_v2 = vld [vmem:[#allocation46_spill] sm:$0xff] }
 0x312   :  { %9755 = vmatprep.mubr.msk.f32.mxu0 %vm2399_vm3, %v12678_v42  ;;  %10040 = vmatprep.mubr.msk.f32.mxu1 %vm2399_vm3, %v12452_v47  ;;  %v14692_v47 = vld [vmem:[#allocation43_spill] sm:$0xff] }
 0x315   :  { %9756 = vmatmul.mubr.msk.f32.gmra.mrb[202].mxu0 %vm2399_vm3, %v12694_v25  ;;  %10041 = vmatmul.mubr.msk.f32.gmra.mrb[8].mxu1 %vm2399_vm3, %v12463_v43 }
 0x316   :  { %9758 = vmatprep.mubr.msk.f32.mxu0 %vm2399_vm3, %v12701_v20  ;;  %10043 = vmatprep.mubr.msk.f32.mxu1 %vm2399_vm3, %v12486_v52 }
 0x319   :  { %9759 = vmatmul.mubr.msk.f32.gmra.mrb[204].mxu0 %vm2399_vm3, %v12714_v36  ;;  %10044 = vmatmul.mubr.msk.f32.gmra.mrb[10].mxu1 %vm2399_vm3, %v12507_v10 }
 0x31a   :  { %9761 = vmatprep.mubr.msk.f32.mxu0 %vm2399_vm3, %v14691_v2  ;;  %10046 = vmatprep.mubr.msk.f32.mxu1 %vm2399_vm3, %v14692_v47  ;;  %v10568_v47 = vpack.c.bf16 %v8208_v5, %v8207_v35  ;;  %v8406_v35 = vld [vmem:[%s14224_s3 + $0x248] sm:$0xff]  ;;  %v14702_v5 = vrot.slane %v12531_v4, 1  ;;  %v14706_v4 = vld [vmem:[#allocation48_spill] sm:$0xff] }
 0x31d   :  { %9762 = vmatmul.mubr.msk.f32.gmra.mrb[206].mxu0 %vm2399_vm3, %v12734_v14  ;;  %10047 = vmatmul.mubr.msk.f32.gmra.mrb[12].mxu1 %vm2399_vm3, %v14693_v45  ;;  %v8388_v45 = vld [vmem:[%s14224_s3 + $0x238] sm:$0xff] }
 0x31e   :  { %9772 = vmatprep.mubr.msk.f32.mxu0 %vm2399_vm3, %v14607_v60  ;;  %10049 = vmatprep.mubr.msk.f32.mxu1 %vm2399_vm3, %v14694_v21  ;;  %v10640_v60 = vpack.c.bf16 %v8388_v45, %v8387_v37  ;;  %v14701_v45 = vld [vmem:[#allocation47_spill] sm:$0xff]  ;;  %v14703_v37 = vld [vmem:[#allocation56_spill] sm:$0xff] }
 0x321   :  { %9773 = vmatmul.mubr.msk.f32.vlgmr.msra.gmra.mrb[192].mxu0 %vm2399_vm3, %v14609_v32  ;;  %10050 = vmatmul.mubr.msk.f32.gmra.mrb[14].mxu1 %vm2399_vm3, %v13338_v57  ;;  %v8405_v32 = vld [vmem:[%s14224_s3 + $0x240] sm:$0xff] }
 0x322   :  { %9775 = vmatprep.mubr.msk.f32.mxu0 %vm2399_vm3, %v14612_v11  ;;  %10060 = vmatprep.mubr.msk.f32.mxu1 %vm2399_vm3, %v12588_v9  ;;  %v10644_v9 = vpack.c.bf16 %v8406_v35, %v8405_v32  ;;  %v8407_v32 = vld [vmem:[%s14224_s3 + $0x250] sm:$0xff]  ;;  %v8408_v35 = vld [vmem:[%s14224_s3 + $0x258] sm:$0xff] }
 0x323   :  { %10567 = vmatpush3.bf16.msra.mxu0 %v10564_v22  ;;  %v14695_v22 = vld [vmem:[#allocation54_spill] sm:$0xff] }
 0x324   :  { %10569 = vmatprep.subr.bf16.mxu0 %v10568_v47 }
 0x325   :  { %9776 = vmatmul.mubr.msk.f32.gmra.mrb[194].mxu0 %vm2399_vm3, %v14615_v0  ;;  %10061 = vmatmul.mubr.msk.f32.vlgmr.msra.gmra.mrb[0].mxu1 %vm2399_vm3, %v12604_v48 }
 0x326   :  { %10639 = vmatpush3.bf16.msra.mxu1 %v10636_v54  ;;  %9778 = vmatprep.mubr.msk.f32.mxu0 %vm2399_vm3, %v14618_v38  ;;  %v13385_v54 = vrot.slane %v13001_v55, 2 }
 0x327   :  { %10063 = vmatprep.mubr.msk.f32.mxu1 %vm2399_vm3, %v12624_v30  ;;  %10641 = vmatprep.subr.bf16.mxu1 %v10640_v60 }
 0x328   :  { %10571 = vmatpush3.bf16.msra.mxu0 %v10568_v47  ;;  %14696 = vst [vmem:[#allocation5_spill] sm:$0xff] %v13385_v54  ;;  %v14700_v47 = vld [vmem:[#allocation14_spill] sm:$0xff] }
 0x329   :  { %9779 = vmatmul.mubr.msk.f32.gmra.mrb[196].mxu0 %vm2399_vm3, %v14621_v31  ;;  %10064 = vmatmul.mubr.msk.f32.gmra.mrb[2].mxu1 %vm2399_vm3, %v12633_v7 }
 0x32a   :  { %9781 = vmatprep.mubr.msk.f32.mxu0 %vm2399_vm3, %v14623_v13  ;;  %10066 = vmatprep.mubr.msk.f32.mxu1 %vm2399_vm3, %v12650_v28 }
 0x32b   :  { %10643 = vmatpush3.bf16.msra.mxu1 %v10640_v60  ;;  %v13421_v60 = vrot.slane %v13044_v1, 2 }
 0x32c   :  { %10645 = vmatprep.subr.bf16.mxu1 %v10644_v9 }
 0x32d   :  { %9782 = vmatmul.mubr.msk.f32.gmra.mrb[198].mxu0 %vm2399_vm3, %v14625_v6  ;;  %10067 = vmatmul.mubr.msk.f32.gmra.mrb[4].mxu1 %vm2399_vm3, %v12660_v53  ;;  %14704 = vst [vmem:[#allocation7_spill] sm:$0xff] %v13421_v60  ;;  %v8446_v53 = vld [vmem:[%s14224_s3 + $0x288] sm:$0xff] }
 0x32e   :  { %9784 = vmatprep.mubr.msk.f32.mxu0 %vm2399_vm3, %v12430_v50  ;;  %10069 = vmatprep.mubr.msk.f32.mxu1 %vm2399_vm3, %v14695_v22  ;;  %v14698_v50 = vld [vmem:[#allocation21_spill] sm:$0xff]  ;;  %v14731_v22 = vld [vmem:[#allocation62_spill] sm:$0xff] }
 0x331   :  { %9785 = vmatmul.mubr.msk.f32.gmra.mrb[200].mxu0 %vm2399_vm3, %v12425_v59  ;;  %10070 = vmatmul.mubr.msk.f32.gmra.mrb[6].mxu1 %vm2399_vm3, %v13385_v54  ;;  %v14697_v59 = vld [vmem:[#allocation55_spill] sm:$0xff]  ;;  %v14729_v54 = vld [vmem:[#allocation20_spill] sm:$0xff] }
 0x332   :  { %9787 = vmatprep.mubr.msk.f32.mxu0 %vm2399_vm3, %v12428_v61  ;;  %10072 = vmatprep.mubr.msk.f32.mxu1 %vm2399_vm3, %v12697_v3  ;;  %v14699_v3 = vld [vmem:[#allocation38_spill] sm:$0xff] }
 0x335   :  { %9788 = vmatmul.mubr.msk.f32.gmra.mrb[202].mxu0 %vm2399_vm3, %v12468_v27  ;;  %10073 = vmatmul.mubr.msk.f32.gmra.mrb[8].mxu1 %vm2399_vm3, %v12704_v16  ;;  %v14727_v16 = vld [vmem:[#allocation60_spill] sm:$0xff] }
 0x336   :  { %9790 = vmatprep.mubr.msk.f32.mxu0 %vm2399_vm3, %v12480_v19  ;;  %10075 = vmatprep.mubr.msk.f32.mxu1 %vm2399_vm3, %v12719_v34  ;;  %v14718_v34 = vld [vmem:[#allocation37_spill] sm:$0xff] }
 0x339   :  { %9791 = vmatmul.mubr.msk.f32.gmra.mrb[204].mxu0 %vm2399_vm3, %v12478_v15  ;;  %10076 = vmatmul.mubr.msk.f32.gmra.mrb[10].mxu1 %vm2399_vm3, %v14697_v59  ;;  %v14712_v59 = vld [vmem:[#allocation50_spill] sm:$0xff] }
 0x33a   :  { %9793 = vmatprep.mubr.msk.f32.mxu0 %vm2399_vm3, %v14698_v50  ;;  %10078 = vmatprep.mubr.msk.f32.mxu1 %vm2399_vm3, %v14699_v3  ;;  %v14705_v3 = vld [vmem:[#allocation39_spill] sm:$0xff] }
 0x33d   :  { %9794 = vmatmul.mubr.msk.f32.gmra.mrb[206].mxu0 %vm2399_vm3, %v14700_v47  ;;  %10079 = vmatmul.mubr.msk.f32.gmra.mrb[12].mxu1 %vm2399_vm3, %v14701_v45  ;;  %v14708_v45 = vld [vmem:[#allocation49_spill] sm:$0xff] }
 0x33e   :  { %9804 = vmatprep.mubr.msk.f32.mxu0 %vm2399_vm3, %v14702_v5  ;;  %10081 = vmatprep.mubr.msk.f32.mxu1 %vm2399_vm3, %v14703_v37  ;;  %v14707_v5 = vld [vmem:[#allocation22_spill] sm:$0xff]  ;;  %v10648_v37 = vpack.c.bf16 %v8408_v35, %v8407_v32 }
 0x33f   :  { %v14710_v35 = vld [vmem:[#allocation26_spill] sm:$0xff] }
 0x341   :  { %9805 = vmatmul.mubr.msk.f32.vlgmr.msra.gmra.mrb[192].mxu0 %vm2399_vm3, %v14705_v3  ;;  %10082 = vmatmul.mubr.msk.f32.gmra.mrb[14].mxu1 %vm2399_vm3, %v13421_v60  ;;  %v8425_v3 = vld [vmem:[%s14224_s3 + $0x260] sm:$0xff]  ;;  %v8426_v60 = vld [vmem:[%s14224_s3 + $0x268] sm:$0xff] }
 0x342   :  { %9807 = vmatprep.mubr.msk.f32.mxu0 %vm2399_vm3, %v14706_v4  ;;  %10092 = vmatprep.mubr.msk.f32.mxu1 %vm2399_vm3, %v14707_v5  ;;  %v14709_v5 = vld [vmem:[#allocation27_spill] sm:$0xff]  ;;  %v10652_v32 = vpack.c.bf16 %v8426_v60, %v8425_v3  ;;  %v14715_v60 = vrot.slane %v12657_v58, 1  ;;  %v14721_v58 = vld [vmem:[#allocation9_spill] sm:$0xff] }
 0x343   :  { %v14716_v3 = vld [vmem:[#allocation31_spill] sm:$0xff] }
 0x345   :  { %9808 = vmatmul.mubr.msk.f32.gmra.mrb[194].mxu0 %vm2399_vm3, %v14664_v40  ;;  %10093 = vmatmul.mubr.msk.f32.vlgmr.msra.gmra.mrb[0].mxu1 %vm2399_vm3, %v14708_v45  ;;  %v14711_v45 = vld [vmem:[#allocation28_spill] sm:$0xff] }
 0x346   :  { %10647 = vmatpush3.bf16.msra.mxu1 %v10644_v9  ;;  %9810 = vmatprep.mubr.msk.f32.mxu0 %vm2399_vm3, %v14666_v29  ;;  %v14713_v9 = vld [vmem:[#allocation12_spill] sm:$0xff] }
 0x347   :  { %10095 = vmatprep.mubr.msk.f32.mxu1 %vm2399_vm3, %v14709_v5  ;;  %10649 = vmatprep.subr.bf16.mxu1 %v10648_v37  ;;  %v14714_v5 = vld [vmem:[#allocation41_spill] sm:$0xff] }
 0x349   :  { %9811 = vmatmul.mubr.msk.f32.gmra.mrb[196].mxu0 %vm2399_vm3, %v14668_v17  ;;  %10096 = vmatmul.mubr.msk.f32.gmra.mrb[2].mxu1 %vm2399_vm3, %v14710_v35  ;;  %v13469_v35 = vrot.slane %v13099_v33, 2 }
 0x34a   :  { %9813 = vmatprep.mubr.msk.f32.mxu0 %vm2399_vm3, %v14711_v45  ;;  %10098 = vmatprep.mubr.msk.f32.mxu1 %vm2399_vm3, %v14712_v59  ;;  %v14724_v59 = vld [vmem:[#allocation4_spill] sm:$0xff] }
 0x34b   :  { %10651 = vmatpush3.bf16.msra.mxu1 %v10648_v37  ;;  %14717 = vst [vmem:[#allocation40_spill] sm:$0xff] %v13469_v35  ;;  %v14719_v37 = vld [vmem:[#allocation35_spill] sm:$0xff] }
 0x34c   :  { %10653 = vmatprep.subr.bf16.mxu1 %v10652_v32 }
 0x34d   :  { %9814 = vmatmul.mubr.msk.f32.gmra.mrb[198].mxu0 %vm2399_vm3, %v14713_v9  ;;  %10099 = vmatmul.mubr.msk.f32.gmra.mrb[4].mxu1 %vm2399_vm3, %v14714_v5  ;;  %v14720_v5 = vld [vmem:[#allocation36_spill] sm:$0xff] }
 0x34e   :  { %9816 = vmatprep.mubr.msk.f32.mxu0 %vm2399_vm3, %v14715_v60  ;;  %10101 = vmatprep.mubr.msk.f32.mxu1 %vm2399_vm3, %v14716_v3  ;;  %v14722_v60 = vld [vmem:[#allocation3_spill] sm:$0xff]  ;;  %v14723_v3 = vld [vmem:[#allocation17_spill] sm:$0xff] }
 0x351   :  { %9817 = vmatmul.mubr.msk.f32.gmra.mrb[200].mxu0 %vm2399_vm3, %v14718_v34  ;;  %10102 = vmatmul.mubr.msk.f32.gmra.mrb[6].mxu1 %vm2399_vm3, %v13469_v35  ;;  %v14725_v34 = vld [vmem:[#allocation6_spill] sm:$0xff]  ;;  %v14726_v35 = vld [vmem:[#allocation59_spill] sm:$0xff] }
 0x352   :  { %9819 = vmatprep.mubr.msk.f32.mxu0 %vm2399_vm3, %v14719_v37  ;;  %10104 = vmatprep.mubr.msk.f32.mxu1 %vm2399_vm3, %v14720_v5  ;;  %v14728_v5 = vld [vmem:[#allocation61_spill] sm:$0xff] }
 0x355   :  { %9820 = vmatmul.mubr.msk.f32.gmra.mrb[202].mxu0 %vm2399_vm3, %v14721_v58  ;;  %10105 = vmatmul.mubr.msk.f32.gmra.mrb[8].mxu1 %vm2399_vm3, %v14722_v60  ;;  %v14730_v60 = vld [vmem:[#allocation34_spill] sm:$0xff] }
 0x356   :  { %9822 = vmatprep.mubr.msk.f32.mxu0 %vm2399_vm3, %v14723_v3  ;;  %10107 = vmatprep.mubr.msk.f32.mxu1 %vm2399_vm3, %v14724_v59  ;;  %v13502_v59 = vrot.slane %v13142_v56, 2 }
 0x358   :  { %14732 = vst [vmem:[#allocation24_spill] sm:$0xff] %v13502_v59 }
 0x359   :  { %9823 = vmatmul.mubr.msk.f32.gmra.mrb[204].mxu0 %vm2399_vm3, %v14725_v34  ;;  %10108 = vmatmul.mubr.msk.f32.gmra.mrb[10].mxu1 %vm2399_vm3, %v14726_v35  ;;  %v8427_v35 = vld [vmem:[%s14224_s3 + $0x270] sm:$0xff] }
 0x35a   :  { %9825 = vmatprep.mubr.msk.f32.mxu0 %vm2399_vm3, %v14727_v16  ;;  %10110 = vmatprep.mubr.msk.f32.mxu1 %vm2399_vm3, %v14728_v5  ;;  %v8428_v5 = vld [vmem:[%s14224_s3 + $0x278] sm:$0xff] }
 0x35d   :  { %9826 = vmatmul.mubr.msk.f32.gmra.mrb[206].mxu0 %vm2399_vm3, %v14729_v54  ;;  %10111 = vmatmul.mubr.msk.f32.gmra.mrb[12].mxu1 %vm2399_vm3, %v14730_v60  ;;  %v10656_v60 = vpack.c.bf16 %v8428_v5, %v8427_v35  ;;  %v14734_v35 = vld [vmem:[#allocation10_spill] sm:$0xff] }
 0x35e   :  { %10113 = vmatprep.mubr.msk.f32.mxu1 %vm2399_vm3, %v14731_v22  ;;  %v8445_v22 = vld [vmem:[%s14224_s3 + $0x280] sm:$0xff] }
 0x361   :  { %10114 = vmatmul.mubr.msk.f32.gmra.mrb[14].mxu1 %vm2399_vm3, %v13502_v59  ;;  %v10660_v59 = vpack.c.bf16 %v8446_v53, %v8445_v22  ;;  %v14735_v53 = vld [vmem:[#allocation57_spill] sm:$0xff] }
 0x362   :  { %10124 = vmatprep.mubr.msk.f32.mxu1 %vm2399_vm3, %v14687_v18  ;;  %v14733_v18 = vld [vmem:[#allocation30_spill] sm:$0xff]  ;;  %v1990_v22 = vadd.f32 %v14734_v35, %v14735_v53 }
 0x363   :  { %v1966_v5 = vadd.f32 %v14734_v35, %v14733_v18  ;;  %v8448_v18 = vld [vmem:[%s14224_s3 + $0x298] sm:$0xff]  ;;  %v8465_v53 = vld [vmem:[%s14224_s3 + $0x2a0] sm:$0xff] }
 0x365   :  { %10125 = vmatmul.mubr.msk.f32.vlgmr.msra.gmra.mrb[0].mxu1 %vm2399_vm3, %v12583_v39 }
 0x366   :  { %10655 = vmatpush3.bf16.msra.mxu1 %v10652_v32  ;;  %10127 = vmatprep.mubr.msk.f32.mxu1 %vm2399_vm3, %v12591_v49  ;;  %v13534_v32 = vmax.f32 %v1966_v5, 0.0 }
 0x367   :  { %10657 = vmatprep.subr.bf16.mxu1 %v10656_v60 }
 0x369   :  { %10128 = vmatmul.mubr.msk.f32.gmra.mrb[2].mxu1 %vm2399_vm3, %v12612_v8 }
 0x36a   :  { %10130 = vmatprep.mubr.msk.f32.mxu1 %vm2399_vm3, %v12617_v63  ;;  %10659 = vmatpush3.bf16.msra.mxu1 %v10656_v60  ;;  %v8447_v60 = vld [vmem:[%s14224_s3 + $0x290] sm:$0xff] }
 0x36b   :  { %10661 = vmatprep.subr.bf16.mxu1 %v10660_v59  ;;  %v10664_v5 = vpack.c.bf16 %v8448_v18, %v8447_v60  ;;  %v14737_v18 = vld [vmem:[#allocation42_spill] sm:$0xff] }
 0x36d   :  { %10131 = vmatmul.mubr.msk.f32.gmra.mrb[4].mxu1 %vm2399_vm3, %v12645_v24 }
 0x36e   :  { %10133 = vmatprep.mubr.msk.f32.mxu1 %vm2399_vm3, %v13001_v55 }
 0x371   :  { %10134 = vmatmul.mubr.msk.f32.gmra.mrb[6].mxu1 %vm2399_vm3, %v13534_v32 }
 0x372   :  { %10136 = vmatprep.mubr.msk.f32.mxu1 %vm2399_vm3, %v12678_v42  ;;  %v13554_v42 = vmax.f32 %v1990_v22, 0.0  ;;  %v8466_v22 = vld [vmem:[%s14224_s3 + $0x2a8] sm:$0xff] }
 0x375   :  { %10137 = vmatmul.mubr.msk.f32.gmra.mrb[8].mxu1 %vm2399_vm3, %v12694_v25 }
 0x376   :  { %10139 = vmatprep.mubr.msk.f32.mxu1 %vm2399_vm3, %v12701_v20 }
 0x379   :  { %10140 = vmatmul.mubr.msk.f32.gmra.mrb[10].mxu1 %vm2399_vm3, %v12714_v36 }
 0x37a   :  { %10142 = vmatprep.mubr.msk.f32.mxu1 %vm2399_vm3, %v14691_v2 }
 0x37d   :  { %10143 = vmatmul.mubr.msk.f32.gmra.mrb[12].mxu1 %vm2399_vm3, %v12734_v14 }
 0x37e   :  { %10145 = vmatprep.mubr.msk.f32.mxu1 %vm2399_vm3, %v13044_v1  ;;  %v10668_v1 = vpack.c.bf16 %v8466_v22, %v8465_v53  ;;  %v8467_v53 = vld [vmem:[%s14224_s3 + $0x2b0] sm:$0xff]  ;;  %v8468_v22 = vld [vmem:[%s14224_s3 + $0x2b8] sm:$0xff] }
 0x381   :  { %10146 = vmatmul.mubr.msk.f32.gmra.mrb[14].mxu1 %vm2399_vm3, %v13554_v42 }
 0x382   :  { %10156 = vmatprep.mubr.msk.f32.mxu1 %vm2399_vm3, %v14612_v11  ;;  %v14736_v11 = vld [vmem:[#allocation11_spill] sm:$0xff] }
 0x383   :  { %v1978_v60 = vadd.f32 %v14734_v35, %v14736_v11  ;;  %v10672_v11 = vpack.c.bf16 %v8468_v22, %v8467_v53  ;;  %v8487_v53 = vld [vmem:[%s14224_s3 + $0x2d0] sm:$0xff]  ;;  %v8488_v22 = vld [vmem:[%s14224_s3 + $0x2d8] sm:$0xff] }
 0x385   :  { %10157 = vmatmul.mubr.msk.f32.vlgmr.msra.gmra.mrb[0].mxu1 %vm2399_vm3, %v14615_v0 }
 0x386   :  { %10663 = vmatpush3.bf16.msra.mxu1 %v10660_v59  ;;  %10159 = vmatprep.mubr.msk.f32.mxu1 %vm2399_vm3, %v14618_v38  ;;  %v13586_v59 = vmax.f32 %v1978_v60, 0.0  ;;  %v8485_v60 = vld [vmem:[%s14224_s3 + $0x2c0] sm:$0xff] }
 0x387   :  { %10665 = vmatprep.subr.bf16.mxu1 %v10664_v5 }
 0x389   :  { %10160 = vmatmul.mubr.msk.f32.gmra.mrb[2].mxu1 %vm2399_vm3, %v14621_v31 }
 0x38a   :  { %10162 = vmatprep.mubr.msk.f32.mxu1 %vm2399_vm3, %v14623_v13  ;;  %10667 = vmatpush3.bf16.msra.mxu1 %v10664_v5  ;;  %v2002_v5 = vadd.f32 %v14734_v35, %v14737_v18  ;;  %v8486_v18 = vld [vmem:[%s14224_s3 + $0x2c8] sm:$0xff] }
 0x38b   :  { %10669 = vmatprep.subr.bf16.mxu1 %v10668_v1 }
 0x38d   :  { %10163 = vmatmul.mubr.msk.f32.gmra.mrb[4].mxu1 %vm2399_vm3, %v14625_v6 }
 0x38e   :  { %10165 = vmatprep.mubr.msk.f32.mxu1 %vm2399_vm3, %v13099_v33 }
 0x391   :  { %10166 = vmatmul.mubr.msk.f32.gmra.mrb[6].mxu1 %vm2399_vm3, %v13586_v59 }
 0x392   :  { %10168 = vmatprep.mubr.msk.f32.mxu1 %vm2399_vm3, %v12428_v61  ;;  %v13606_v61 = vmax.f32 %v2002_v5, 0.0  ;;  %v10676_v5 = vpack.c.bf16 %v8486_v18, %v8485_v60  ;;  %v8505_v60 = vld [vmem:[%s14224_s3 + $0x2e0] sm:$0xff]  ;;  %v8506_v18 = vld [vmem:[%s14224_s3 + $0x2e8] sm:$0xff] }
 0x395   :  { %10169 = vmatmul.mubr.msk.f32.gmra.mrb[8].mxu1 %vm2399_vm3, %v12468_v27 }
 0x396   :  { %10171 = vmatprep.mubr.msk.f32.mxu1 %vm2399_vm3, %v12480_v19 }
 0x399   :  { %10172 = vmatmul.mubr.msk.f32.gmra.mrb[10].mxu1 %vm2399_vm3, %v12478_v15 }
 0x39a   :  { %10174 = vmatprep.mubr.msk.f32.mxu1 %vm2399_vm3, %v14698_v50 }
 0x39d   :  { %10175 = vmatmul.mubr.msk.f32.gmra.mrb[12].mxu1 %vm2399_vm3, %v14700_v47 }
 0x39e   :  { %10177 = vmatprep.mubr.msk.f32.mxu1 %vm2399_vm3, %v13142_v56 }
 0x3a1   :  { %10178 = vmatmul.mubr.msk.f32.gmra.mrb[14].mxu1 %vm2399_vm3, %v13606_v61 }
 0x3a2   :  { %10188 = vmatprep.mubr.msk.f32.mxu1 %vm2399_vm3, %v14706_v4  ;;  %v14738_v4 = vld [vmem:[#allocation33_spill] sm:$0xff] }
 0x3a5   :  { %10189 = vmatmul.mubr.msk.f32.vlgmr.msra.gmra.mrb[0].mxu1 %vm2399_vm3, %v14664_v40 }
 0x3a6   :  { %10671 = vmatpush3.bf16.msra.mxu1 %v10668_v1  ;;  %10191 = vmatprep.mubr.msk.f32.mxu1 %vm2399_vm3, %v14666_v29  ;;  %v14401_v1 = vrot.slane %v13534_v32, 1 }
 0x3a7   :  { %10673 = vmatprep.subr.bf16.mxu1 %v10672_v11 }
 0x3a9   :  { %10192 = vmatmul.mubr.msk.f32.gmra.mrb[2].mxu1 %vm2399_vm3, %v14668_v17 }
 0x3aa   :  { %10194 = vmatprep.mubr.msk.f32.mxu1 %vm2399_vm3, %v14711_v45  ;;  %10675 = vmatpush3.bf16.msra.mxu1 %v10672_v11  ;;  %v10680_v11 = vpack.c.bf16 %v8488_v22, %v8487_v53  ;;  %v14740_v53 = vld [vmem:[#allocation52_spill] sm:$0xff] }
 0x3ab   :  { %10677 = vmatprep.subr.bf16.mxu1 %v10676_v5  ;;  %v8507_v22 = vld [vmem:[%s14224_s3 + $0x2f0] sm:$0xff] }
 0x3ad   :  { %10195 = vmatmul.mubr.msk.f32.gmra.mrb[4].mxu1 %vm2399_vm3, %v14713_v9 }
 0x3ae   :  { %10197 = vmatprep.mubr.msk.f32.mxu1 %vm2399_vm3, %v14738_v4 }
 0x3b1   :  { %10198 = vmatmul.mubr.msk.f32.gmra.mrb[6].mxu1 %vm2399_vm3, %v14401_v1  ;;  %v14747_v1 = vld [vmem:[#allocation38_spill] sm:$0xff] }
 0x3b2   :  { %10200 = vmatprep.mubr.msk.f32.mxu1 %vm2399_vm3, %v14719_v37  ;;  %v14398_v37 = vrot.slane %v13554_v42, 1 }
 0x3b5   :  { %10201 = vmatmul.mubr.msk.f32.gmra.mrb[8].mxu1 %vm2399_vm3, %v14721_v58 }
 0x3b6   :  { %10203 = vmatprep.mubr.msk.f32.mxu1 %vm2399_vm3, %v14723_v3 }
 0x3b9   :  { %10204 = vmatmul.mubr.msk.f32.gmra.mrb[10].mxu1 %vm2399_vm3, %v14725_v34 }
 0x3ba   :  { %10206 = vmatprep.mubr.msk.f32.mxu1 %vm2399_vm3, %v14727_v16 }
 0x3bd   :  { %10207 = vmatmul.mubr.msk.f32.gmra.mrb[12].mxu1 %vm2399_vm3, %v14729_v54 }
 0x3be   :  { %10209 = vmatprep.mubr.msk.f32.mxu1 %vm2399_vm3, %v13244_v51 }
 0x3c1   :  { %10210 = vmatmul.mubr.msk.f32.gmra.mrb[14].mxu1 %vm2399_vm3, %v14398_v37  ;;  %v10684_v37 = vpack.c.bf16 %v8506_v18, %v8505_v60  ;;  %v8525_v18 = vld [vmem:[%s14224_s3 + $0x300] sm:$0xff] }
 0x3c2   :  { %10220 = vmatprep.mubr.msk.f32.mxu1 %vm2399_vm3, %v14689_v41  ;;  %v14399_v41 = vrot.slane %v13586_v59, 1 }
 0x3c5   :  { %10221 = vmatmul.mubr.msk.f32.vlgmr.msra.gmra.mrb[0].mxu1 %vm2399_vm3, %v14644_v23 }
 0x3c6   :  { %10679 = vmatpush3.bf16.msra.mxu1 %v10676_v5  ;;  %10223 = vmatprep.mubr.msk.f32.mxu1 %vm2399_vm3, %v14645_v46  ;;  %v14739_v5 = vld [vmem:[#allocation43_spill] sm:$0xff] }
 0x3c7   :  { %10681 = vmatprep.subr.bf16.mxu1 %v10680_v11 }
 0x3c9   :  { %10224 = vmatmul.mubr.msk.f32.gmra.mrb[2].mxu1 %vm2399_vm3, %v14646_v26 }
 0x3ca   :  { %10226 = vmatprep.mubr.msk.f32.mxu1 %vm2399_vm3, %v14649_v44  ;;  %10683 = vmatpush3.bf16.msra.mxu1 %v10680_v11  ;;  %v8508_v11 = vld [vmem:[%s14224_s3 + $0x2f8] sm:$0xff] }
 0x3cb   :  { %10685 = vmatprep.subr.bf16.mxu1 %v10684_v37  ;;  %v10688_v60 = vpack.c.bf16 %v8508_v11, %v8507_v22  ;;  %v14742_v22 = vld [vmem:[#allocation54_spill] sm:$0xff]  ;;  %v14743_v11 = vld [vmem:[#allocation5_spill] sm:$0xff] }
 0x3cd   :  { %10227 = vmatmul.mubr.msk.f32.gmra.mrb[4].mxu1 %vm2399_vm3, %v14690_v12 }
 0x3ce   :  { %10229 = vmatprep.mubr.msk.f32.mxu1 %vm2399_vm3, %v13297_v62 }
 0x3d1   :  { %10230 = vmatmul.mubr.msk.f32.gmra.mrb[6].mxu1 %vm2399_vm3, %v14399_v41  ;;  %v8526_v41 = vld [vmem:[%s14224_s3 + $0x308] sm:$0xff] }
 0x3d2   :  { %10232 = vmatprep.mubr.msk.f32.mxu1 %vm2399_vm3, %v12463_v43  ;;  %v14400_v43 = vrot.slane %v13606_v61, 1 }
 0x3d5   :  { %10233 = vmatmul.mubr.msk.f32.gmra.mrb[8].mxu1 %vm2399_vm3, %v12486_v52 }
 0x3d6   :  { %10235 = vmatprep.mubr.msk.f32.mxu1 %vm2399_vm3, %v12507_v10 }
 0x3d9   :  { %10236 = vmatmul.mubr.msk.f32.gmra.mrb[10].mxu1 %vm2399_vm3, %v14739_v5 }
 0x3da   :  { %10238 = vmatprep.mubr.msk.f32.mxu1 %vm2399_vm3, %v14740_v53 }
 0x3dd   :  { %10239 = vmatmul.mubr.msk.f32.gmra.mrb[12].mxu1 %vm2399_vm3, %v14694_v21 }
 0x3de   :  { %10241 = vmatprep.mubr.msk.f32.mxu1 %vm2399_vm3, %v13338_v57 }
 0x3e1   :  { %10242 = vmatmul.mubr.msk.f32.gmra.mrb[14].mxu1 %vm2399_vm3, %v14400_v43  ;;  %v10692_v43 = vpack.c.bf16 %v8526_v41, %v8525_v18  ;;  %v14744_v41 = vld [vmem:[#allocation25_spill] sm:$0xff]  ;;  %v14745_v18 = vld [vmem:[#allocation15_spill] sm:$0xff] }
 0x3e2   :  { %10252 = vmatprep.mubr.msk.f32.mxu1 %vm2399_vm3, %v12604_v48  ;;  %v14741_v48 = vld [vmem:[#allocation53_spill] sm:$0xff] }
 0x3e5   :  { %10253 = vmatmul.mubr.msk.f32.vlgmr.msra.gmra.mrb[0].mxu1 %vm2399_vm3, %v12624_v30 }
 0x3e6   :  { %10687 = vmatpush3.bf16.msra.mxu1 %v10684_v37  ;;  %10255 = vmatprep.mubr.msk.f32.mxu1 %vm2399_vm3, %v12633_v7  ;;  %v14402_v37 = vrot.slane %v13534_v32, 2  ;;  %v14754_v7 = vld [vmem:[#allocation50_spill] sm:$0xff] }
 0x3e7   :  { %10689 = vmatprep.subr.bf16.mxu1 %v10688_v60 }
 0x3e9   :  { %10256 = vmatmul.mubr.msk.f32.gmra.mrb[2].mxu1 %vm2399_vm3, %v12650_v28  ;;  %v14753_v28 = vld [vmem:[#allocation26_spill] sm:$0xff] }
 0x3ea   :  { %10258 = vmatprep.mubr.msk.f32.mxu1 %vm2399_vm3, %v14741_v48  ;;  %10691 = vmatpush3.bf16.msra.mxu1 %v10688_v60  ;;  %v14746_v60 = vld [vmem:[#allocation55_spill] sm:$0xff] }
 0x3eb   :  { %10693 = vmatprep.subr.bf16.mxu1 %v10692_v43  ;;  %v14750_v48 = vld [vmem:[#allocation7_spill] sm:$0xff] }
 0x3ed   :  { %10259 = vmatmul.mubr.msk.f32.gmra.mrb[4].mxu1 %vm2399_vm3, %v14742_v22  ;;  %v14748_v22 = vld [vmem:[#allocation47_spill] sm:$0xff] }
 0x3ee   :  { %10261 = vmatprep.mubr.msk.f32.mxu1 %vm2399_vm3, %v14743_v11  ;;  %v14749_v11 = vld [vmem:[#allocation56_spill] sm:$0xff] }
 0x3f1   :  { %10262 = vmatmul.mubr.msk.f32.gmra.mrb[6].mxu1 %vm2399_vm3, %v14402_v37  ;;  %v8527_v37 = vld [vmem:[%s14224_s3 + $0x310] sm:$0xff] }
 0x3f2   :  { %10264 = vmatprep.mubr.msk.f32.mxu1 %vm2399_vm3, %v14744_v41  ;;  %v14404_v41 = vrot.slane %v13554_v42, 2 }
 0x3f5   :  { %10265 = vmatmul.mubr.msk.f32.gmra.mrb[8].mxu1 %vm2399_vm3, %v14745_v18  ;;  %v14752_v18 = vld [vmem:[#allocation27_spill] sm:$0xff] }
 0x3f6   :  { %10267 = vmatprep.mubr.msk.f32.mxu1 %vm2399_vm3, %v14746_v60  ;;  %v8528_v60 = vld [vmem:[%s14224_s3 + $0x318] sm:$0xff] }
 0x3f9   :  { %10268 = vmatmul.mubr.msk.f32.gmra.mrb[10].mxu1 %vm2399_vm3, %v14747_v1  ;;  %v8546_v1 = vld [vmem:[%s14224_s3 + $0x328] sm:$0xff] }
 0x3fa   :  { %10270 = vmatprep.mubr.msk.f32.mxu1 %vm2399_vm3, %v14748_v22  ;;  %v14751_v22 = vld [vmem:[#allocation49_spill] sm:$0xff] }
 0x3fd   :  { %10271 = vmatmul.mubr.msk.f32.gmra.mrb[12].mxu1 %vm2399_vm3, %v14749_v11  ;;  %v10696_v11 = vpack.c.bf16 %v8528_v60, %v8527_v37  ;;  %v14756_v37 = vld [vmem:[#allocation31_spill] sm:$0xff]  ;;  %v14757_v60 = vld [vmem:[#allocation40_spill] sm:$0xff] }
 0x3fe   :  { %10273 = vmatprep.mubr.msk.f32.mxu1 %vm2399_vm3, %v14750_v48  ;;  %v8545_v48 = vld [vmem:[%s14224_s3 + $0x320] sm:$0xff] }
 0x401   :  { %10274 = vmatmul.mubr.msk.f32.gmra.mrb[14].mxu1 %vm2399_vm3, %v14404_v41  ;;  %v10700_v41 = vpack.c.bf16 %v8546_v1, %v8545_v48  ;;  %v14758_v1 = vld [vmem:[#allocation3_spill] sm:$0xff] }
 0x402   :  { %10284 = vmatprep.mubr.msk.f32.mxu1 %vm2399_vm3, %v14751_v22  ;;  %v14755_v22 = vld [vmem:[#allocation41_spill] sm:$0xff] }
 0x405   :  { %10285 = vmatmul.mubr.msk.f32.vlgmr.msra.gmra.mrb[0].mxu1 %vm2399_vm3, %v14752_v18 }
 0x406   :  { %10695 = vmatpush3.bf16.msra.mxu1 %v10692_v43  ;;  %10287 = vmatprep.mubr.msk.f32.mxu1 %vm2399_vm3, %v14753_v28  ;;  %v14406_v43 = vrot.slane %v13586_v59, 2  ;;  %v14765_v28 = vld [vmem:[#allocation61_spill] sm:$0xff] }
 0x407   :  { %10697 = vmatprep.subr.bf16.mxu1 %v10696_v11 }
 0x409   :  { %10288 = vmatmul.mubr.msk.f32.gmra.mrb[2].mxu1 %vm2399_vm3, %v14754_v7 }
 0x40a   :  { %10290 = vmatprep.mubr.msk.f32.mxu1 %vm2399_vm3, %v14755_v22  ;;  %10699 = vmatpush3.bf16.msra.mxu1 %v10696_v11  ;;  %v14761_v11 = vld [vmem:[#allocation4_spill] sm:$0xff] }
 0x40b   :  { %10701 = vmatprep.subr.bf16.mxu1 %v10700_v41 }
 0x40d   :  { %10291 = vmatmul.mubr.msk.f32.gmra.mrb[4].mxu1 %vm2399_vm3, %v14756_v37  ;;  %v14762_v37 = vld [vmem:[#allocation59_spill] sm:$0xff] }
 0x40e   :  { %10293 = vmatprep.mubr.msk.f32.mxu1 %vm2399_vm3, %v14757_v60 }
 0x411   :  { %10294 = vmatmul.mubr.msk.f32.gmra.mrb[6].mxu1 %vm2399_vm3, %v14406_v43  ;;  %v14766_v43 = vld [vmem:[#allocation34_spill] sm:$0xff] }
 0x412   :  { %10296 = vmatprep.mubr.msk.f32.mxu1 %vm2399_vm3, %v14758_v1 }
 0x414   :  { %v13786_v48 = vpop.f32.mrb[192].mxu0 }
 0x415   :  { %14759 = vst [vmem:[#allocation29_spill] sm:$0xff] %v13786_v48  ;;  %v13788_v22 = vpop.f32.mrb[193].mxu0  ;;  %10297 = vmatmul.mubr.msk.f32.gmra.mrb[8].mxu1 %vm2399_vm3, %v14761_v11  ;;  %v14770_v11 = vld [vmem:[#allocation24_spill] sm:$0xff] }
 0x416   :  { %14760 = vst [vmem:[#allocation8_spill] sm:$0xff] %v13788_v22  ;;  %10299 = vmatprep.mubr.msk.f32.mxu1 %vm2399_vm3, %v14762_v37  ;;  %v14769_v22 = vld [vmem:[#allocation62_spill] sm:$0xff] }
 0x418   :  { %v13794_v60 = vpop.f32.mrb[194].mxu0 }
 0x419   :  { %14763 = vst [vmem:[#allocation16_spill] sm:$0xff] %v13794_v60  ;;  %v13796_v7 = vpop.f32.mrb[195].mxu0  ;;  %10300 = vmatmul.mubr.msk.f32.gmra.mrb[10].mxu1 %vm2399_vm3, %v14765_v28  ;;  %v14407_v60 = vrot.slane %v13606_v61, 2 }
 0x41a   :  { %14764 = vst [vmem:[#allocation2_spill] sm:$0xff] %v13796_v7  ;;  %10302 = vmatprep.mubr.msk.f32.mxu1 %vm2399_vm3, %v14766_v43  ;;  %v8547_v7 = vld [vmem:[%s14224_s3 + $0x330] sm:$0xff] }
 0x41c   :  { %v13802_v1 = vpop.f32.mrb[196].mxu0 }
 0x41d   :  { %14767 = vst [vmem:[#allocation13_spill] sm:$0xff] %v13802_v1  ;;  %v13804_v48 = vpop.f32.mrb[197].mxu0  ;;  %10303 = vmatmul.mubr.msk.f32.gmra.mrb[12].mxu1 %vm2399_vm3, %v14769_v22  ;;  %v8548_v1 = vld [vmem:[%s14224_s3 + $0x338] sm:$0xff]  ;;  %v8566_v22 = vld [vmem:[%s14224_s3 + $0x348] sm:$0xff] }
 0x41e   :  { %14768 = vst [vmem:[#allocation46_spill] sm:$0xff] %v13804_v48  ;;  %10305 = vmatprep.mubr.msk.f32.mxu1 %vm2399_vm3, %v14770_v11  ;;  %v10704_v48 = vpack.c.bf16 %v8548_v1, %v8547_v7 }
 0x420   :  { %v13811_v37 = vpop.f32.mrb[198].mxu0 }
 0x421   :  { %14771 = vst [vmem:[#allocation44_spill] sm:$0xff] %v13811_v37  ;;  %v13819_v43 = vpop.f32.mrb[199].mxu0  ;;  %10306 = vmatmul.mubr.msk.f32.gmra.mrb[14].mxu1 %vm2399_vm3, %v14407_v60  ;;  %v8565_v37 = vld [vmem:[%s14224_s3 + $0x340] sm:$0xff]  ;;  %v14772_v60 = vld [vmem:[#allocation32_spill] sm:$0xff] }
 0x422   :  { %10316 = vmatprep.mubr.msk.f32.mxu1 %vm2399_vm3, %v12583_v39  ;;  %v10708_v39 = vpack.c.bf16 %v8566_v22, %v8565_v37 }
 0x424   :  { %v13826_v11 = vpop.f32.mrb[200].mxu0 }
 0x425   :  { %v13834_v28 = vpop.f32.mrb[201].mxu0  ;;  %10317 = vmatmul.mubr.msk.f32.vlgmr.msra.gmra.mrb[0].mxu1 %vm2399_vm3, %v12591_v49  ;;  %v1967_v49 = vadd.f32 %v14734_v35, %v14772_v60  ;;  %v14774_v60 = vld [vmem:[#allocation18_spill] sm:$0xff] }
 0x426   :  { %10703 = vmatpush3.bf16.msra.mxu1 %v10700_v41  ;;  %10319 = vmatprep.mubr.msk.f32.mxu1 %vm2399_vm3, %v12612_v8 }
 0x427   :  { %10705 = vmatprep.subr.bf16.mxu1 %v10704_v48  ;;  %v13858_v22 = vmax.f32 %v1967_v49, 0.0  ;;  %v14775_v49 = vld [vmem:[#allocation19_spill] sm:$0xff] }
 0x428   :  { %v13840_v7 = vpop.f32.mrb[202].mxu0 }
 0x429   :  { %v13842_v1 = vpop.f32.mrb[203].mxu0  ;;  %10320 = vmatmul.mubr.msk.f32.gmra.mrb[2].mxu1 %vm2399_vm3, %v12617_v63 }
 0x42a   :  { %10322 = vmatprep.mubr.msk.f32.mxu1 %vm2399_vm3, %v12645_v24  ;;  %10707 = vmatpush3.bf16.msra.mxu1 %v10704_v48 }
 0x42b   :  { %10709 = vmatprep.subr.bf16.mxu1 %v10708_v39 }
 0x42c   :  { %v13850_v41 = vpop.f32.mrb[204].mxu0 }
 0x42d   :  { %v13852_v8 = vpop.f32.mrb[205].mxu0  ;;  %10323 = vmatmul.mubr.msk.f32.gmra.mrb[4].mxu1 %vm2399_vm3, %v13001_v55  ;;  %v14773_v55 = vld [vmem:[#allocation58_spill] sm:$0xff] }
 0x42e   :  { %10325 = vmatprep.mubr.msk.f32.mxu1 %vm2399_vm3, %v13534_v32  ;;  %v1991_v37 = vadd.f32 %v14734_v35, %v14773_v55  ;;  %v8586_v35 = vld [vmem:[%s14224_s3 + $0x368] sm:$0xff] }
 0x430   :  { %v13860_v63 = vpop.f32.mrb[206].mxu0 }
 0x431   :  { %v13862_v24 = vpop.f32.mrb[207].mxu0  ;;  %10326 = vmatmul.mubr.msk.f32.gmra.mrb[6].mxu1 %vm2399_vm3, %v13858_v22 }
 0x432   :  { %10328 = vmatprep.mubr.msk.f32.mxu1 %vm2399_vm3, %v12694_v25  ;;  %v13882_v25 = vmax.f32 %v1991_v37, 0.0  ;;  %v14790_v37 = vld [vmem:[#allocation47_spill] sm:$0xff] }
 0x435   :  { %10329 = vmatmul.mubr.msk.f32.gmra.mrb[8].mxu1 %vm2399_vm3, %v12701_v20  ;;  %v8567_v20 = vld [vmem:[%s14224_s3 + $0x350] sm:$0xff] }
 0x436   :  { %10331 = vmatprep.mubr.msk.f32.mxu1 %vm2399_vm3, %v12714_v36  ;;  %v8568_v36 = vld [vmem:[%s14224_s3 + $0x358] sm:$0xff] }
 0x439   :  { %10332 = vmatmul.mubr.msk.f32.gmra.mrb[10].mxu1 %vm2399_vm3, %v14691_v2  ;;  %v8585_v2 = vld [vmem:[%s14224_s3 + $0x360] sm:$0xff] }
 0x43a   :  { %10334 = vmatprep.mubr.msk.f32.mxu1 %vm2399_vm3, %v12734_v14  ;;  %v10712_v14 = vpack.c.bf16 %v8568_v36, %v8567_v20  ;;  %v10716_v48 = vpack.c.bf16 %v8586_v35, %v8585_v2  ;;  %v2280_v20 = vrot.slane %v13882_v25, 2  ;;  %v14794_v36 = vld [vmem:[#allocation26_spill] sm:$0xff]  ;;  %v14796_v2 = vld [vmem:[#allocation41_spill] sm:$0xff]  ;;  %v14797_v35 = vld [vmem:[#allocation31_spill] sm:$0xff] }
 0x43d   :  { %10335 = vmatmul.mubr.msk.f32.gmra.mrb[12].mxu1 %vm2399_vm3, %v14774_v60  ;;  %v14791_v60 = vld [vmem:[#allocation56_spill] sm:$0xff] }
 0x43e   :  { %10337 = vmatprep.mubr.msk.f32.mxu1 %vm2399_vm3, %v13554_v42 }
 0x441   :  { %10338 = vmatmul.mubr.msk.f32.gmra.mrb[14].mxu1 %vm2399_vm3, %v13882_v25 }
 0x442   :  { %10348 = vmatprep.mubr.msk.f32.mxu1 %vm2399_vm3, %v14615_v0  ;;  %v11305_v0 = vld [vmem:[%s14225_s2] ss:$0 sm:$0xff] }
 0x443   :  { %v1979_v55 = vadd.f32 %v11305_v0, %v14775_v49  ;;  %v14802_v49 = vld [vmem:[#allocation61_spill] sm:$0xff] }
 0x445   :  { %10349 = vmatmul.mubr.msk.f32.vlgmr.msra.gmra.mrb[0].mxu1 %vm2399_vm3, %v14618_v38  ;;  %v13916_v38 = vmax.f32 %v1979_v55, 0.0  ;;  %v14803_v55 = vld [vmem:[#allocation34_spill] sm:$0xff] }
 0x446   :  { %10711 = vmatpush3.bf16.msra.mxu1 %v10708_v39  ;;  %10351 = vmatprep.mubr.msk.f32.mxu1 %vm2399_vm3, %v14621_v31  ;;  %v14789_v39 = vld [vmem:[#allocation38_spill] sm:$0xff] }
 0x447   :  { %10713 = vmatprep.subr.bf16.mxu1 %v10712_v14 }
 0x449   :  { %10352 = vmatmul.mubr.msk.f32.gmra.mrb[2].mxu1 %vm2399_vm3, %v14623_v13 }
 0x44a   :  { %10354 = vmatprep.mubr.msk.f32.mxu1 %vm2399_vm3, %v14625_v6  ;;  %10715 = vmatpush3.bf16.msra.mxu1 %v10712_v14  ;;  %v14776_v6 = vld [vmem:[#allocation51_spill] sm:$0xff]  ;;  %v14795_v14 = vld [vmem:[#allocation50_spill] sm:$0xff] }
 0x44b   :  { %10717 = vmatprep.subr.bf16.mxu1 %v10716_v48  ;;  %v2003_v31 = vadd.f32 %v11305_v0, %v14776_v6  ;;  %v14801_v0 = vld [vmem:[#allocation59_spill] sm:$0xff]  ;;  %v14804_v6 = vld [vmem:[#allocation62_spill] sm:$0xff] }
 0x44d   :  { %10355 = vmatmul.mubr.msk.f32.gmra.mrb[4].mxu1 %vm2399_vm3, %v13099_v33  ;;  %v8605_v33 = vld [vmem:[%s14224_s3 + $0x380] sm:$0xff] }
 0x44e   :  { %10357 = vmatprep.mubr.msk.f32.mxu1 %vm2399_vm3, %v13586_v59 }
 0x451   :  { %10358 = vmatmul.mubr.msk.f32.gmra.mrb[6].mxu1 %vm2399_vm3, %v13916_v38 }
 0x452   :  { %10360 = vmatprep.mubr.msk.f32.mxu1 %vm2399_vm3, %v12468_v27  ;;  %v13935_v27 = vmax.f32 %v2003_v31, 0.0 }
 0x454   :  { %v2292_v31 = vrot.slane %v13935_v27, 2 }
 0x455   :  { %10361 = vmatmul.mubr.msk.f32.gmra.mrb[8].mxu1 %vm2399_vm3, %v12480_v19  ;;  %v8588_v19 = vld [vmem:[%s14224_s3 + $0x378] sm:$0xff] }
 0x456   :  { %10363 = vmatprep.mubr.msk.f32.mxu1 %vm2399_vm3, %v12478_v15  ;;  %v8587_v15 = vld [vmem:[%s14224_s3 + $0x370] sm:$0xff] }
 0x457   :  { %v10720_v13 = vpack.c.bf16 %v8588_v19, %v8587_v15  ;;  %v14807_v19 = vld [vmem:[#allocation29_spill] sm:$0xff] }
 0x459   :  { %10364 = vmatmul.mubr.msk.f32.gmra.mrb[10].mxu1 %vm2399_vm3, %v14698_v50 }
 0x45a   :  { %10366 = vmatprep.mubr.msk.f32.mxu1 %vm2399_vm3, %v14700_v47  ;;  %v2135_v47 = vrot.slane %v13882_v25, 1  ;;  %v14799_v25 = vrot.slane %v13586_v59, 2 }
 0x45d   :  { %10367 = vmatmul.mubr.msk.f32.gmra.mrb[12].mxu1 %vm2399_vm3, %v13142_v56  ;;  %v8606_v56 = vld [vmem:[%s14224_s3 + $0x388] sm:$0xff] }
 0x45e   :  { %10369 = vmatprep.mubr.msk.f32.mxu1 %vm2399_vm3, %v13606_v61  ;;  %v10724_v50 = vpack.c.bf16 %v8606_v56, %v8605_v33  ;;  %v14808_v56 = vld [vmem:[#allocation8_spill] sm:$0xff] }
 0x461   :  { %10370 = vmatmul.mubr.msk.f32.gmra.mrb[14].mxu1 %vm2399_vm3, %v13935_v27 }
 0x462   :  { %10380 = vmatprep.mubr.msk.f32.mxu1 %vm2399_vm3, %v14664_v40  ;;  %v14777_v40 = vrot.slane %v13534_v32, 1 }
 0x465   :  { %10381 = vmatmul.mubr.msk.f32.vlgmr.msra.gmra.mrb[0].mxu1 %vm2399_vm3, %v14666_v29  ;;  %v2111_v29 = vrot.slane %v13858_v22, 1 }
 0x466   :  { %10719 = vmatpush3.bf16.msra.mxu1 %v10716_v48  ;;  %10383 = vmatprep.mubr.msk.f32.mxu1 %vm2399_vm3, %v14668_v17  ;;  %v14778_v17 = vrot.slane %v13554_v42, 1  ;;  %v14800_v48 = vld [vmem:[#allocation4_spill] sm:$0xff] }
 0x467   :  { %10721 = vmatprep.subr.bf16.mxu1 %v10720_v13 }
 0x469   :  { %10384 = vmatmul.mubr.msk.f32.gmra.mrb[2].mxu1 %vm2399_vm3, %v14711_v45  ;;  %v8607_v45 = vld [vmem:[%s14224_s3 + $0x390] sm:$0xff] }
 0x46a   :  { %10386 = vmatprep.mubr.msk.f32.mxu1 %vm2399_vm3, %v14713_v9  ;;  %10723 = vmatpush3.bf16.msra.mxu1 %v10720_v13  ;;  %v8626_v9 = vld [vmem:[%s14224_s3 + $0x3a8] sm:$0xff] }
 0x46b   :  { %10725 = vmatprep.subr.bf16.mxu1 %v10724_v50 }
 0x46d   :  { %10387 = vmatmul.mubr.msk.f32.gmra.mrb[4].mxu1 %vm2399_vm3, %v14738_v4  ;;  %v2256_v4 = vrot.slane %v13858_v22, 2  ;;  %v14793_v22 = vrot.slane %v13554_v42, 2  ;;  %v14798_v42 = vld [vmem:[#allocation40_spill] sm:$0xff] }
 0x46e   :  { %10389 = vmatprep.mubr.msk.f32.mxu1 %vm2399_vm3, %v14777_v40 }
 0x471   :  { %10390 = vmatmul.mubr.msk.f32.gmra.mrb[6].mxu1 %vm2399_vm3, %v2111_v29  ;;  %v14809_v29 = vld [vmem:[#allocation16_spill] sm:$0xff] }
 0x472   :  { %10392 = vmatprep.mubr.msk.f32.mxu1 %vm2399_vm3, %v14721_v58  ;;  %v14784_v58 = vld [vmem:[#allocation54_spill] sm:$0xff] }
 0x475   :  { %10393 = vmatmul.mubr.msk.f32.gmra.mrb[8].mxu1 %vm2399_vm3, %v14723_v3 }
 0x476   :  { %10395 = vmatprep.mubr.msk.f32.mxu1 %vm2399_vm3, %v14725_v34  ;;  %v14785_v34 = vld [vmem:[#allocation5_spill] sm:$0xff] }
 0x479   :  { %10396 = vmatmul.mubr.msk.f32.gmra.mrb[10].mxu1 %vm2399_vm3, %v14727_v16  ;;  %v8608_v16 = vld [vmem:[%s14224_s3 + $0x398] sm:$0xff] }
 0x47a   :  { %10398 = vmatprep.mubr.msk.f32.mxu1 %vm2399_vm3, %v14729_v54  ;;  %v8625_v54 = vld [vmem:[%s14224_s3 + $0x3a0] sm:$0xff] }
 0x47b   :  { %v10732_v3 = vpack.c.bf16 %v8626_v9, %v8625_v54  ;;  %v14812_v9 = vld [vmem:[#allocation46_spill] sm:$0xff] }
 0x47d   :  { %10399 = vmatmul.mubr.msk.f32.gmra.mrb[12].mxu1 %vm2399_vm3, %v13244_v51  ;;  %v10728_v51 = vpack.c.bf16 %v8608_v16, %v8607_v45  ;;  %v14811_v16 = vld [vmem:[#allocation13_spill] sm:$0xff] }
 0x47e   :  { %10401 = vmatprep.mubr.msk.f32.mxu1 %vm2399_vm3, %v14778_v17 }
 0x481   :  { %10402 = vmatmul.mubr.msk.f32.gmra.mrb[14].mxu1 %vm2399_vm3, %v2135_v47 }
 0x482   :  { %10412 = vmatprep.mubr.msk.f32.mxu1 %vm2399_vm3, %v14644_v23  ;;  %v14779_v23 = vrot.slane %v13586_v59, 1  ;;  %v14805_v59 = vld [vmem:[#allocation24_spill] sm:$0xff] }
 0x485   :  { %10413 = vmatmul.mubr.msk.f32.vlgmr.msra.gmra.mrb[0].mxu1 %vm2399_vm3, %v14645_v46  ;;  %v2123_v46 = vrot.slane %v13916_v38, 1 }
 0x486   :  { %10727 = vmatpush3.bf16.msra.mxu1 %v10724_v50  ;;  %10415 = vmatprep.mubr.msk.f32.mxu1 %vm2399_vm3, %v14646_v26  ;;  %v14780_v26 = vrot.slane %v13606_v61, 1 }
 0x487   :  { %10729 = vmatprep.subr.bf16.mxu1 %v10728_v51 }
 0x489   :  { %10416 = vmatmul.mubr.msk.f32.gmra.mrb[2].mxu1 %vm2399_vm3, %v14649_v44  ;;  %v8628_v44 = vld [vmem:[%s14224_s3 + $0x3b8] sm:$0xff] }
 0x48a   :  { %10418 = vmatprep.mubr.msk.f32.mxu1 %vm2399_vm3, %v14690_v12  ;;  %10731 = vmatpush3.bf16.msra.mxu1 %v10728_v51 }
 0x48b   :  { %10733 = vmatprep.subr.bf16.mxu1 %v10732_v3 }
 0x48d   :  { %10419 = vmatmul.mubr.msk.f32.gmra.mrb[4].mxu1 %vm2399_vm3, %v13297_v62  ;;  %v14781_v62 = vld [vmem:[#allocation45_spill] sm:$0xff] }
 0x48e   :  { %10421 = vmatprep.mubr.msk.f32.mxu1 %vm2399_vm3, %v14779_v23 }
 0x491   :  { %10422 = vmatmul.mubr.msk.f32.gmra.mrb[6].mxu1 %vm2399_vm3, %v2123_v46  ;;  %v14813_v46 = vld [vmem:[#allocation44_spill] sm:$0xff] }
 0x492   :  { %10424 = vmatprep.mubr.msk.f32.mxu1 %vm2399_vm3, %v12486_v52  ;;  %v2147_v52 = vrot.slane %v13935_v27, 1 }
 0x495   :  { %10425 = vmatmul.mubr.msk.f32.gmra.mrb[8].mxu1 %vm2399_vm3, %v12507_v10  ;;  %v8627_v10 = vld [vmem:[%s14224_s3 + $0x3b0] sm:$0xff]  ;;  %s11307_s3 = smov 64  }
 0x496   :  { %10427 = vmatprep.mubr.msk.f32.mxu1 %vm2399_vm3, %v14739_v5  ;;  %v10736_v12 = vpack.c.bf16 %v8628_v44, %v8627_v10  ;;  %v14787_v5 = vld [vmem:[#allocation15_spill] sm:$0xff] }
 0x499   :  { %10428 = vmatmul.mubr.msk.f32.gmra.mrb[10].mxu1 %vm2399_vm3, %v14740_v53  ;;  %v14788_v53 = vld [vmem:[#allocation55_spill] sm:$0xff] }
 0x49a   :  { %10430 = vmatprep.mubr.msk.f32.mxu1 %vm2399_vm3, %v14694_v21  ;;  %v14782_v21 = vld [vmem:[#allocation23_spill] sm:$0xff] }
 0x49d   :  { %10431 = vmatmul.mubr.msk.f32.gmra.mrb[12].mxu1 %vm2399_vm3, %v13338_v57  ;;  %v14783_v57 = vld [vmem:[#allocation53_spill] sm:$0xff] }
 0x49e   :  { %10433 = vmatprep.mubr.msk.f32.mxu1 %vm2399_vm3, %v14780_v26 }
 0x4a1   :  { %10434 = vmatmul.mubr.msk.f32.gmra.mrb[14].mxu1 %vm2399_vm3, %v2147_v52 }
 0x4a2   :  { %10444 = vmatprep.mubr.msk.f32.mxu1 %vm2399_vm3, %v12624_v30  ;;  %v14786_v30 = vrot.slane %v13534_v32, 2  ;;  %v14792_v32 = vld [vmem:[#allocation7_spill] sm:$0xff] }
 0x4a5   :  { %10445 = vmatmul.mubr.msk.f32.vlgmr.msra.gmra.mrb[0].mxu1 %vm2399_vm3, %v14781_v62 }
 0x4a6   :  { %10735 = vmatpush3.bf16.msra.mxu1 %v10732_v3  ;;  %10447 = vmatprep.mubr.msk.f32.mxu1 %vm2399_vm3, %v14782_v21 }
 0x4a7   :  { %10737 = vmatprep.subr.bf16.mxu1 %v10736_v12 }
 0x4a9   :  { %10448 = vmatmul.mubr.msk.f32.gmra.mrb[2].mxu1 %vm2399_vm3, %v14783_v57 }
 0x4aa   :  { %10450 = vmatprep.mubr.msk.f32.mxu1 %vm2399_vm3, %v14784_v58  ;;  %10739 = vmatpush3.bf16.msra.mxu1 %v10736_v12 }
 0x4ad   :  { %10451 = vmatmul.mubr.msk.f32.gmra.mrb[4].mxu1 %vm2399_vm3, %v14785_v34 }
 0x4ae   :  { %10453 = vmatprep.mubr.msk.f32.mxu1 %vm2399_vm3, %v14786_v30 }
 0x4b1   :  { %10454 = vmatmul.mubr.msk.f32.gmra.mrb[6].mxu1 %vm2399_vm3, %v2256_v4 }
 0x4b2   :  { %10456 = vmatprep.mubr.msk.f32.mxu1 %vm2399_vm3, %v14787_v5 }
 0x4b5   :  { %10457 = vmatmul.mubr.msk.f32.gmra.mrb[8].mxu1 %vm2399_vm3, %v14788_v53 }
 0x4b6   :  { %10459 = vmatprep.mubr.msk.f32.mxu1 %vm2399_vm3, %v14789_v39 }
 0x4b9   :  { %10460 = vmatmul.mubr.msk.f32.gmra.mrb[10].mxu1 %vm2399_vm3, %v14790_v37 }
 0x4ba   :  { %10462 = vmatprep.mubr.msk.f32.mxu1 %vm2399_vm3, %v14791_v60 }
 0x4bd   :  { %10463 = vmatmul.mubr.msk.f32.gmra.mrb[12].mxu1 %vm2399_vm3, %v14792_v32 }
 0x4be   :  { %10465 = vmatprep.mubr.msk.f32.mxu1 %vm2399_vm3, %v14793_v22 }
 0x4c1   :  { %10466 = vmatmul.mubr.msk.f32.gmra.mrb[14].mxu1 %vm2399_vm3, %v2280_v20 }
 0x4c2   :  { %10476 = vmatprep.mubr.msk.f32.mxu1 %vm2399_vm3, %v14752_v18  ;;  %v2268_v18 = vrot.slane %v13916_v38, 2  ;;  %v14806_v38 = vrot.slane %v13606_v61, 2  ;;  %v14810_v61 = vld [vmem:[#allocation2_spill] sm:$0xff] }
 0x4c5   :  { %10477 = vmatmul.mubr.msk.f32.vlgmr.msra.gmra.mrb[0].mxu1 %vm2399_vm3, %v14794_v36 }
 0x4c6   :  { %10479 = vmatprep.mubr.msk.f32.mxu1 %vm2399_vm3, %v14795_v14 }
 0x4c9   :  { %10480 = vmatmul.mubr.msk.f32.gmra.mrb[2].mxu1 %vm2399_vm3, %v14796_v2 }
 0x4ca   :  { %10482 = vmatprep.mubr.msk.f32.mxu1 %vm2399_vm3, %v14797_v35 }
 0x4cd   :  { %10483 = vmatmul.mubr.msk.f32.gmra.mrb[4].mxu1 %vm2399_vm3, %v14798_v42 }
 0x4ce   :  { %10485 = vmatprep.mubr.msk.f32.mxu1 %vm2399_vm3, %v14799_v25 }
 0x4d1   :  { %10486 = vmatmul.mubr.msk.f32.gmra.mrb[6].mxu1 %vm2399_vm3, %v2268_v18 }
 0x4d2   :  { %10488 = vmatprep.mubr.msk.f32.mxu1 %vm2399_vm3, %v14800_v48 }
 0x4d5   :  { %10489 = vmatmul.mubr.msk.f32.gmra.mrb[8].mxu1 %vm2399_vm3, %v14801_v0 }
 0x4d6   :  { %10491 = vmatprep.mubr.msk.f32.mxu1 %vm2399_vm3, %v14802_v49 }
 0x4d9   :  { %10492 = vmatmul.mubr.msk.f32.gmra.mrb[10].mxu1 %vm2399_vm3, %v14803_v55 }
 0x4da   :  { %10494 = vmatprep.mubr.msk.f32.mxu1 %vm2399_vm3, %v14804_v6 }
 0x4dd   :  { %10495 = vmatmul.mubr.msk.f32.gmra.mrb[12].mxu1 %vm2399_vm3, %v14805_v59 }
 0x4de   :  { %10497 = vmatprep.mubr.msk.f32.mxu1 %vm2399_vm3, %v14806_v38 }
 0x4e1   :  { %10498 = vmatmul.mubr.msk.f32.gmra.mrb[14].mxu1 %vm2399_vm3, %v2292_v31 }
 0x598   :  { %v10478_v15 = vpop.f32.mrb[0].mxu1 }
 0x599   :  { %v10740_v13 = vadd.f32 %v10478_v15, %v14807_v19  ;;  %v7627_v33 = vpop.f32.mrb[1].mxu1 }
 0x59a   :  { %v10741_v50 = vadd.f32 %v7627_v33, %v14808_v56 }
 0x59b   :  { %7740 = vrot.lane.b32.xlu0 %v10740_v13, %s11307_s3 }
 0x59c   :  { %v10481_v40 = vpop.f32.mrb[2].mxu1 }
 0x59d   :  { %v10742_v17 = vadd.f32 %v10481_v40, %v14809_v29  ;;  %v7637_v47 = vpop.f32.mrb[3].mxu1 }
 0x59e   :  { %v10743_v45 = vadd.f32 %v7637_v47, %v14810_v61 }
 0x59f   :  { %7738 = vrot.lane.b32.xlu0 %v10741_v50, %s11307_s3  ;;  %7744 = vrot.lane.b32.xlu1 %v10742_v17, %s11307_s3 }
 0x5a0   :  { %v10484_v27 = vpop.f32.mrb[4].mxu1 }
 0x5a1   :  { %v10744_v51 = vadd.f32 %v10484_v27, %v14811_v16  ;;  %v7647_v54 = vpop.f32.mrb[5].mxu1 }
 0x5a2   :  { %v10745_v3 = vadd.f32 %v7647_v54, %v14812_v9 }
 0x5a3   :  { %7742 = vrot.lane.b32.xlu1 %v10743_v45, %s11307_s3 }
 0x5a4   :  { %7746 = vrot.lane.b32.xlu0 %v10745_v3, %s11307_s3  ;;  %v10487_v23 = vpop.f32.mrb[6].mxu1 }
 0x5a5   :  { %v14117_v26 = vadd.f32 %v10487_v23, %v14813_v46  ;;  %v7657_v52 = vpop.f32.mrb[7].mxu1 }
 0x5a6   :  { %v14120_v10 = vadd.f32 %v7657_v52, %v13819_v43 }
 0x5a7   :  { %7748 = vrot.lane.b32.xlu1 %v10744_v51, %s11307_s3 }
 0x5a8   :  { %7750 = vrot.lane.b32.xlu0 %v14120_v10, %s11307_s3  ;;  %v10490_v44 = vpop.f32.mrb[8].mxu1 }
 0x5a9   :  { %v14126_v12 = vadd.f32 %v10490_v44, %v13826_v11  ;;  %v7667_v62 = vpop.f32.mrb[9].mxu1 }
 0x5aa   :  { %v14129_v21 = vadd.f32 %v7667_v62, %v13834_v28 }
 0x5ab   :  { %7752 = vrot.lane.b32.xlu1 %v14117_v26, %s11307_s3 }
 0x5ac   :  { %7754 = vrot.lane.b32.xlu0 %v14129_v21, %s11307_s3  ;;  %v10493_v43 = vpop.f32.mrb[10].mxu1 }
 0x5ad   :  { %v14136_v57 = vadd.f32 %v10493_v43, %v13840_v7  ;;  %v7677_v58 = vpop.f32.mrb[11].mxu1 }
 0x5ae   :  { %v14139_v34 = vadd.f32 %v7677_v58, %v13842_v1 }
 0x5af   :  { %7756 = vrot.lane.b32.xlu1 %v14126_v12, %s11307_s3 }
 0x5b0   :  { %7758 = vrot.lane.b32.xlu0 %v14139_v34, %s11307_s3  ;;  %v10496_v28 = vpop.f32.mrb[12].mxu1 }
 0x5b1   :  { %v14146_v11 = vadd.f32 %v10496_v28, %v13850_v41  ;;  %v7687_v30 = vpop.f32.mrb[13].mxu1 }
 0x5b2   :  { %v14149_v4 = vadd.f32 %v7687_v30, %v13852_v8 }
 0x5b3   :  { %7760 = vrot.lane.b32.xlu1 %v14136_v57, %s11307_s3 }
 0x5b4   :  { %7762 = vrot.lane.b32.xlu0 %v14149_v4, %s11307_s3  ;;  %v10499_v7 = vpop.f32.mrb[14].mxu1 }
 0x5b5   :  { %v14156_v1 = vadd.f32 %v10499_v7, %v13860_v63  ;;  %v7697_v5 = vpop.f32.mrb[15].mxu1  ;;  %v14170_v63 = vld [vmem:[%s14226_s4] ss:$0 sm:$0xff] }
 0x5b6   :  { %v14159_v53 = vadd.f32 %v7697_v5, %v13862_v24 }
 0x5b7   :  { %7764 = vrot.lane.b32.xlu1 %v14146_v11, %s11307_s3 }
 0x5b8   :  { %7766 = vrot.lane.b32.xlu0 %v14159_v53, %s11307_s3 }
 0x5bb   :  { %7768 = vrot.lane.b32.xlu1 %v14156_v1, %s11307_s3 }
 0x60d   :  { %v7741_v41 = vpop.permute.xlu0 %7740 }
 0x60e   :  { %v7787_v37 = vmax.f32 %v10740_v13, %v7741_v41 }
 0x611   :  { %v7739_v8 = vpop.permute.xlu0 %7738  ;;  %v7745_v39 = vpop.permute.xlu1 %7744 }
 0x612   :  { %v7786_v60 = vmax.f32 %v10741_v50, %v7739_v8  ;;  %v7789_v20 = vmax.f32 %v10742_v17, %v7745_v39 }
 0x614   :  { %v7802_v24 = vmax.f32 %v7786_v60, %v7787_v37 }
 0x615   :  { %v7743_v32 = vpop.permute.xlu1 %7742 }
 0x616   :  { %v7817_v22 = vadd.f32 %v14170_v63, %v7802_v24  ;;  %v7788_v36 = vmax.f32 %v10743_v45, %v7743_v32  ;;  %v7747_v14 = vpop.permute.xlu0 %7746 }
 0x617   :  { %v7790_v48 = vmax.f32 %v10745_v3, %v7747_v14 }
 0x618   :  { %v7825_v2 = vmax.f32 %v7817_v22, 0.0  ;;  %v7803_v35 = vmax.f32 %v7788_v36, %v7789_v20 }
 0x619   :  { %v7749_v42 = vpop.permute.xlu1 %7748 }
 0x61a   :  { %v7833_v25 = vpack.c.bf16 %v7825_v2, %v7825_v2  ;;  %v7818_v18 = vadd.f32 %v14170_v63, %v7803_v35  ;;  %v7791_v0 = vmax.f32 %v10744_v51, %v7749_v42  ;;  %v7751_v49 = vpop.permute.xlu0 %7750 }
 0x61b   :  { %v7792_v15 = vmax.f32 %v14120_v10, %v7751_v49 }
 0x61c   :  { %7842 = vst.msk [vmem:[%s14227_s5] sm:$0x3] %vm7841_vm4, %v7833_v25  ;;  %v7826_v55 = vmax.f32 %v7818_v18, 0.0  ;;  %v7804_v6 = vmax.f32 %v7790_v48, %v7791_v0 }
 0x61d   :  { %v7753_v59 = vpop.permute.xlu1 %7752 }
 0x61e   :  { %v7834_v38 = vpack.c.bf16 %v7826_v55, %v7826_v55  ;;  %v7819_v31 = vadd.f32 %v14170_v63, %v7804_v6  ;;  %v7793_v19 = vmax.f32 %v14117_v26, %v7753_v59  ;;  %v7755_v13 = vpop.permute.xlu0 %7754 }
 0x61f   :  { %v7794_v17 = vmax.f32 %v14129_v21, %v7755_v13 }
 0x620   :  { %7843 = vst.msk [vmem:[%s14227_s5 + $0x2] sm:$0x3] %vm7841_vm4, %v7834_v38  ;;  %v7827_v33 = vmax.f32 %v7819_v31, 0.0  ;;  %v7805_v56 = vmax.f32 %v7792_v15, %v7793_v19 }
 0x621   :  { %v7757_v50 = vpop.permute.xlu1 %7756 }
 0x622   :  { %v7835_v40 = vpack.c.bf16 %v7827_v33, %v7827_v33  ;;  %v7820_v29 = vadd.f32 %v14170_v63, %v7805_v56  ;;  %v7795_v47 = vmax.f32 %v14126_v12, %v7757_v50  ;;  %v7759_v61 = vpop.permute.xlu0 %7758 }
 0x623   :  { %v7796_v9 = vmax.f32 %v14139_v34, %v7759_v61 }
 0x624   :  { %7844 = vst.msk [vmem:[%s14227_s5 + $0x4] sm:$0x3] %vm7841_vm4, %v7835_v40  ;;  %v7828_v45 = vmax.f32 %v7820_v29, 0.0  ;;  %v7806_v27 = vmax.f32 %v7794_v17, %v7795_v47 }
 0x625   :  { %v7761_v16 = vpop.permute.xlu1 %7760 }
 0x626   :  { %v7836_v51 = vpack.c.bf16 %v7828_v45, %v7828_v45  ;;  %v7821_v54 = vadd.f32 %v14170_v63, %v7806_v27  ;;  %v7797_v3 = vmax.f32 %v14136_v57, %v7761_v16  ;;  %v7763_v23 = vpop.permute.xlu0 %7762 }
 0x627   :  { %v7798_v12 = vmax.f32 %v14149_v4, %v7763_v23 }
 0x628   :  { %7845 = vst.msk [vmem:[%s14227_s5 + $0x6] sm:$0x3] %vm7841_vm4, %v7836_v51  ;;  %v7829_v46 = vmax.f32 %v7821_v54, 0.0  ;;  %v7807_v26 = vmax.f32 %v7796_v9, %v7797_v3 }
 0x629   :  { %v7765_v52 = vpop.permute.xlu1 %7764 }
 0x62a   :  { %v7837_v10 = vpack.c.bf16 %v7829_v46, %v7829_v46  ;;  %v7822_v44 = vadd.f32 %v14170_v63, %v7807_v26  ;;  %v7799_v62 = vmax.f32 %v14146_v11, %v7765_v52  ;;  %v7767_v21 = vpop.permute.xlu0 %7766 }
 0x62b   :  { %v7800_v30 = vmax.f32 %v14159_v53, %v7767_v21 }
 0x62c   :  { %7846 = vst.msk [vmem:[%s14227_s5 + $0x8] sm:$0x3] %vm7841_vm4, %v7837_v10  ;;  %v7830_v43 = vmax.f32 %v7822_v44, 0.0  ;;  %v7808_v57 = vmax.f32 %v7798_v12, %v7799_v62 }
 0x62d   :  { %v7769_v58 = vpop.permute.xlu1 %7768 }
 0x62e   :  { %v7838_v34 = vpack.c.bf16 %v7830_v43, %v7830_v43  ;;  %v7823_v28 = vadd.f32 %v14170_v63, %v7808_v57  ;;  %v7801_v7 = vmax.f32 %v14156_v1, %v7769_v58 }
 0x630   :  { %7847 = vst.msk [vmem:[%s14227_s5 + $0xa] sm:$0x3] %vm7841_vm4, %v7838_v34  ;;  %v7831_v11 = vmax.f32 %v7823_v28, 0.0  ;;  %v7809_v4 = vmax.f32 %v7800_v30, %v7801_v7 }
 0x632   :  { %v7839_v5 = vpack.c.bf16 %v7831_v11, %v7831_v11  ;;  %v7824_v41 = vadd.f32 %v14170_v63, %v7809_v4 }
 0x634   :  { %7848 = vst.msk [vmem:[%s14227_s5 + $0xc] sm:$0x3] %vm7841_vm4, %v7839_v5  ;;  %v7832_v8 = vmax.f32 %v7824_v41, 0.0 }
 0x636   :  { %v7840_v39 = vpack.c.bf16 %v7832_v8, %v7832_v8 }
 0x638   :  { %7849 = vst.msk [vmem:[%s14227_s5 + $0xe] sm:$0x3] %vm7841_vm4, %v7840_v39 }

</bundles_post_ra>
